<compile_context>
chip_gen: v6e
topology: v6e:2x2x1
jax: 0.10.0
libtpu: 0.0.40
codegen_flags: <defaults>
</compile_context>

<pallas_src>
import math

import jax
import jax.numpy as jnp
from jax.experimental import pallas as pl
from jax.experimental.pallas import tpu as pltpu

# ---- model hyper-parameters (MoETransformer defaults) -----------------------
INPUT_DIM = 6
NUM_CLASSES = 2
DIM = 64
DEPTH = 3
HEADS = 4
HEAD_DIM = DIM // HEADS
NUM_EXPERTS = 3
FF_DIM = 2 * DIM
LN_EPS = 1e-5
ATTN_SCALE = 1.0 / math.sqrt(HEAD_DIM)
MM_DTYPE = jnp.bfloat16        # matmul-input dtype inside the kernel (f32 accumulation)


# ---- math helpers (pure jnp; shared by the kernel and the f32 reference) -----
def _layer_norm(x, g, b):
    # mean and mean-of-squares computed from the same input -> the two cross-lane
    # reductions are independent and can overlap (var = E[x^2] - mu^2).
    mu = jnp.mean(x, axis=-1, keepdims=True)
    ms = jnp.mean(x * x, axis=-1, keepdims=True)
    var = ms - mu * mu
    return (x - mu) * jax.lax.rsqrt(var + LN_EPS) * g + b


def _softmax_last(s, approx):
    s = s - jnp.max(s, axis=-1, keepdims=True)
    p = jnp.exp(s)
    d = jnp.sum(p, axis=-1, keepdims=True)
    if approx:                                   # kernel attention path: EUP reciprocal
        return p * pl.reciprocal(d, approx=True)
    return p / d                                 # gate / reference path: exact divide


def _mha_experts(x, w_qkv, b_qkv, w_out, b_out, *, mm_dtype, approx):
    # x:     (NE, S, D) f32
    # w_qkv: (NE, D, 3*D)  lanes laid out per head as [q | k | v] of HEAD_DIM each
    # b_qkv: (NE, 1, 3*D)
    # w_out: (NE, D, D)    rows in concat-head order (fused out-proj + head reduction)
    # b_out: (NE, 1, D)
    qkv = jnp.einsum('esd,edk->esk', x.astype(mm_dtype), w_qkv,
                     preferred_element_type=jnp.float32) + b_qkv          # (NE, S, 3*D)
    heads = []
    for h in range(HEADS):                       # static lane slices per head
        base = h * 3 * HEAD_DIM
        q = qkv[:, :, base:base + HEAD_DIM]
        k = qkv[:, :, base + HEAD_DIM:base + 2 * HEAD_DIM]
        v = qkv[:, :, base + 2 * HEAD_DIM:base + 3 * HEAD_DIM]
        s = jnp.einsum('esk,etk->est', q.astype(mm_dtype), k.astype(mm_dtype),
                       preferred_element_type=jnp.float32) * ATTN_SCALE   # (NE, S, S)
        p = _softmax_last(s, approx)
        a = jnp.einsum('est,etk->esk', p.astype(mm_dtype), v.astype(mm_dtype),
                       preferred_element_type=jnp.float32)                # (NE, S, Hd)
        heads.append(a)
    a_cat = jnp.concatenate(heads, axis=-1)                               # (NE, S, D)
    # concat(heads) @ W_out : single contraction, MXU accumulates across heads
    return jnp.einsum('esk,ekd->esd', a_cat.astype(mm_dtype), w_out,
                      preferred_element_type=jnp.float32) + b_out         # (NE, S, D)


def _encoder_layer_experts(x, lw, *, mm_dtype, approx):
    # post-norm (norm_first=False), relu activation, eval-mode (no dropout).
    # x: (NE, S, D) f32 — all matmuls batched over the expert axis.
    (w_qkv, b_qkv, w_out, b_out, g1, b1, g2, b2, w1, fb1, w2, fb2) = lw
    a = _mha_experts(x, w_qkv, b_qkv, w_out, b_out, mm_dtype=mm_dtype, approx=approx)
    x = _layer_norm(x + a, g1, b1)
    h = jnp.maximum(
        jnp.einsum('esd,edf->esf', x.astype(mm_dtype), w1,
                   preferred_element_type=jnp.float32) + fb1, 0.0)
    f = jnp.einsum('esf,efd->esd', h.astype(mm_dtype), w2,
                   preferred_element_type=jnp.float32) + fb2
    x = _layer_norm(x + f, g2, b2)
    return x


# ---- Pallas kernel (single invocation, everything VMEM-resident) -------------
def moe_kernel(x_ref, emb_w, emb_b, gate_w, gate_b,
               wqkv, bqkv, wo, bo, l1g, l1b, l2g, l2b,
               f1w, f1b, f2w, f2b,
               cg, cb, cw, cbias, out_ref):
    x = x_ref[...]                                                       # (S, IN) f32
    S = x.shape[0]
    x_emb = jnp.dot(x.astype(MM_DTYPE), emb_w[...],
                    preferred_element_type=jnp.float32) + emb_b[...]     # (S, D) f32

    # gate — computed exactly once, kept f32 with exact-divide softmax
    logits = jnp.dot(x_emb, gate_w[...],
                     preferred_element_type=jnp.float32) + gate_b[...]   # (S, NE)
    probs = _softmax_last(logits, approx=False)

    # interleaved expert chains: carry (NE, S, D), batch every matmul over experts
    h = jnp.broadcast_to(x_emb[None], (NUM_EXPERTS, S, DIM))
    for l in range(DEPTH):                       # unrolled; static layer index
        lw = (wqkv[l], bqkv[l], wo[l], bo[l],
              l1g[l], l1b[l], l2g[l], l2b[l],
              f1w[l], f1b[l], f2w[l], f2b[l])
        h = _encoder_layer_experts(h, lw, mm_dtype=MM_DTYPE, approx=True)

    combined = jnp.zeros((S, DIM), jnp.float32)
    for e in range(NUM_EXPERTS):                 # static lane slice of the gate
        combined = combined + probs[:, e:e + 1] * h[e]

    c = _layer_norm(combined, cg[...], cb[...])
    out_ref[...] = (jnp.dot(c.astype(MM_DTYPE), cw[...],
                            preferred_element_type=jnp.float32)
                    + cbias[...]).astype(out_ref.dtype)


_PARAM_ORDER = ('emb_w', 'emb_b', 'gate_w', 'gate_b',
                'wqkv', 'bqkv', 'wo', 'bo', 'l1g', 'l1b', 'l2g', 'l2b',
                'f1w', 'f1b', 'f2w', 'f2b', 'cg', 'cb', 'cw', 'cbias')
# matmul weights are shipped bf16 (halves the only DMA); biases/LN/gate stay f32
_BF16_PARAMS = frozenset(('emb_w', 'wqkv', 'wo', 'f1w', 'f2w', 'cw'))


def moe_transformer_forward(x, p):
    B = x.shape[0]

    def _cast(k):
        v = p[k]
        return v.astype(MM_DTYPE) if k in _BF16_PARAMS else v

    inputs = [x] + [_cast(k) for k in _PARAM_ORDER]
    return pl.pallas_call(
        moe_kernel,
        out_shape=jax.ShapeDtypeStruct((B, NUM_CLASSES), jnp.float32),
        in_specs=[pl.BlockSpec(memory_space=pltpu.MemorySpace.VMEM) for _ in inputs],
        out_specs=pl.BlockSpec(memory_space=pltpu.MemorySpace.VMEM),
        # modest scoped-VMEM limit: whole problem needs <2 MiB resident (v7x headroom)
        compiler_params=pltpu.CompilerParams(vmem_limit_bytes=16 * 1024 * 1024),
    )(*inputs)


# ---- deterministic parameter init (synthetic weights, pre-transposed layout) --
def init_params(key):
    counter = [0]

    def draw(shape, scale):
        counter[0] += 1
        k = jax.random.fold_in(key, counter[0])
        return jax.random.normal(k, shape, jnp.float32) * scale

    s_d = 1.0 / math.sqrt(DIM)
    le = (DEPTH, NUM_EXPERTS)                    # layer-major so the kernel indexes ref[l]
    return {
        'emb_w': draw((INPUT_DIM, DIM), 1.0 / math.sqrt(INPUT_DIM)),
        'emb_b': draw((1, DIM), 0.02),
        'gate_w': draw((DIM, NUM_EXPERTS), s_d),
        'gate_b': draw((1, NUM_EXPERTS), 0.02),
        # fused, pre-transposed QKV (x @ W); lanes per head: [q | k | v] of HEAD_DIM each
        'wqkv': draw(le + (DIM, 3 * DIM), s_d),
        'bqkv': draw(le + (1, 3 * DIM), 0.02),
        # fused (concat-head) out-projection, pre-transposed
        'wo': draw(le + (DIM, DIM), s_d),
        'bo': draw(le + (1, DIM), 0.02),
        'l1g': jnp.ones(le + (1, DIM), jnp.float32),
        'l1b': jnp.zeros(le + (1, DIM), jnp.float32),
        'l2g': jnp.ones(le + (1, DIM), jnp.float32),
        'l2b': jnp.zeros(le + (1, DIM), jnp.float32),
        # pre-transposed FFN weights (x @ W)
        'f1w': draw(le + (DIM, FF_DIM), s_d),
        'f1b': draw(le + (1, FF_DIM), 0.02),
        'f2w': draw(le + (FF_DIM, DIM), 1.0 / math.sqrt(FF_DIM)),
        'f2b': draw(le + (1, DIM), 0.02),
        'cg': jnp.ones((1, DIM), jnp.float32),
        'cb': jnp.zeros((1, DIM), jnp.float32),
        'cw': draw((DIM, NUM_CLASSES), s_d),
        'cbias': draw((1, NUM_CLASSES), 0.02),
    }


# ---- pure-JAX f32 reference (same math, outside Pallas) -----------------------
def reference_forward(x, p):
    x_emb = x @ p['emb_w'] + p['emb_b']
    probs = jax.nn.softmax(x_emb @ p['gate_w'] + p['gate_b'], axis=-1)
    h = jnp.broadcast_to(x_emb[None], (NUM_EXPERTS,) + x_emb.shape)
    for l in range(DEPTH):
        lw = (p['wqkv'][l], p['bqkv'][l], p['wo'][l], p['bo'][l],
              p['l1g'][l], p['l1b'][l], p['l2g'][l], p['l2b'][l],
              p['f1w'][l], p['f1b'][l], p['f2w'][l], p['f2b'][l])
        h = _encoder_layer_experts(h, lw, mm_dtype=jnp.float32, approx=False)
    combined = jnp.zeros_like(x_emb)
    for e in range(NUM_EXPERTS):
        combined = combined + probs[:, e:e + 1] * h[e]
    c = _layer_norm(combined, p['cg'], p['cb'])
    return c @ p['cw'] + p['cbias']


if __name__ == "__main__":
    # Small batch; the batch axis doubles as the attention sequence axis (layout note).
    B = 8
    key = jax.random.PRNGKey(0)
    x = jax.random.normal(jax.random.fold_in(key, 999), (B, INPUT_DIM), jnp.float32)
    params = init_params(key)

    out = jax.block_until_ready(moe_transformer_forward(x, params))
    ref = reference_forward(x, params)

    assert out.shape == (B, NUM_CLASSES)
    # Kernel uses bf16 matmul inputs + approx-reciprocal attention softmax vs the f32
    # reference, so the tolerance is correspondingly looser than pure-f32.
    if not jnp.allclose(out, ref, atol=5e-2, rtol=5e-2):
        raise AssertionError(f"kernel/reference mismatch: max abs diff "
                             f"{float(jnp.max(jnp.abs(out - ref)))}")
    print("KERNEL_OK")
</pallas_src>

<mosaic_0001>
module attributes {stable_mosaic.version = 11 : i64} {
  func.func @moe_kernel(%arg0: memref<8x6xf32, #tpu.memory_space<vmem>>, %arg1: memref<6x64xbf16, #tpu.memory_space<vmem>>, %arg2: memref<1x64xf32, #tpu.memory_space<vmem>>, %arg3: memref<64x3xf32, #tpu.memory_space<vmem>>, %arg4: memref<1x3xf32, #tpu.memory_space<vmem>>, %arg5: memref<3x3x64x192xbf16, #tpu.memory_space<vmem>>, %arg6: memref<3x3x1x192xf32, #tpu.memory_space<vmem>>, %arg7: memref<3x3x64x64xbf16, #tpu.memory_space<vmem>>, %arg8: memref<3x3x1x64xf32, #tpu.memory_space<vmem>>, %arg9: memref<3x3x1x64xf32, #tpu.memory_space<vmem>>, %arg10: memref<3x3x1x64xf32, #tpu.memory_space<vmem>>, %arg11: memref<3x3x1x64xf32, #tpu.memory_space<vmem>>, %arg12: memref<3x3x1x64xf32, #tpu.memory_space<vmem>>, %arg13: memref<3x3x64x128xbf16, #tpu.memory_space<vmem>>, %arg14: memref<3x3x1x128xf32, #tpu.memory_space<vmem>>, %arg15: memref<3x3x128x64xbf16, #tpu.memory_space<vmem>>, %arg16: memref<3x3x1x64xf32, #tpu.memory_space<vmem>>, %arg17: memref<1x64xf32, #tpu.memory_space<vmem>>, %arg18: memref<1x64xf32, #tpu.memory_space<vmem>>, %arg19: memref<64x2xbf16, #tpu.memory_space<vmem>>, %arg20: memref<1x2xf32, #tpu.memory_space<vmem>>, %arg21: memref<8x2xf32, #tpu.memory_space<vmem>>) attributes {dimension_semantics = [], scalar_prefetch = 0 : i64, scratch_operands = 0 : i64, tpu.core_type = #tpu.core_type<tc>} {
    %c0 = arith.constant 0 : index
    %c0_0 = arith.constant 0 : index
    %0 = vector.load %arg0[%c0, %c0_0] : memref<8x6xf32, #tpu.memory_space<vmem>>, vector<8x6xf32>
    %1 = arith.truncf %0 : vector<8x6xf32> to vector<8x6xbf16>
    %c0_1 = arith.constant 0 : index
    %c0_2 = arith.constant 0 : index
    %2 = vector.load %arg1[%c0_1, %c0_2] : memref<6x64xbf16, #tpu.memory_space<vmem>>, vector<6x64xbf16>
    %cst = arith.constant dense<0.000000e+00> : vector<8x64xf32>
    %3 = tpu.matmul %1, %2, %cst {dimension_numbers = #tpu.dot_dimension_numbers<[1], [0], [0], [1], [0, 0, 1, 1], [], []>} : vector<8x6xbf16>, vector<6x64xbf16>, vector<8x64xf32> -> vector<8x64xf32>
    %c0_3 = arith.constant 0 : index
    %c0_4 = arith.constant 0 : index
    %4 = vector.load %arg2[%c0_3, %c0_4] : memref<1x64xf32, #tpu.memory_space<vmem>>, vector<1x64xf32>
    %5 = vector.broadcast %4 : vector<1x64xf32> to vector<8x64xf32>
    %6 = arith.addf %3, %5 : vector<8x64xf32>
    %c0_5 = arith.constant 0 : index
    %c0_6 = arith.constant 0 : index
    %7 = vector.load %arg3[%c0_5, %c0_6] : memref<64x3xf32, #tpu.memory_space<vmem>>, vector<64x3xf32>
    %cst_7 = arith.constant dense<0.000000e+00> : vector<8x3xf32>
    %8 = tpu.matmul %6, %7, %cst_7 {dimension_numbers = #tpu.dot_dimension_numbers<[1], [0], [0], [1], [0, 0, 1, 1], [], []>} : vector<8x64xf32>, vector<64x3xf32>, vector<8x3xf32> -> vector<8x3xf32>
    %c0_8 = arith.constant 0 : index
    %c0_9 = arith.constant 0 : index
    %9 = vector.load %arg4[%c0_8, %c0_9] : memref<1x3xf32, #tpu.memory_space<vmem>>, vector<1x3xf32>
    %10 = vector.broadcast %9 : vector<1x3xf32> to vector<8x3xf32>
    %11 = arith.addf %8, %10 : vector<8x3xf32>
    %cst_10 = arith.constant dense<0xFF800000> : vector<8xf32>
    %12 = vector.multi_reduction <maximumf>, %11, %cst_10 [1] : vector<8x3xf32> to vector<8xf32>
    %13 = vector.shape_cast %12 : vector<8xf32> to vector<8x1xf32>
    %14 = vector.broadcast %13 : vector<8x1xf32> to vector<8x3xf32>
    %15 = arith.subf %11, %14 : vector<8x3xf32>
    %16 = math.exp %15 : vector<8x3xf32>
    %cst_11 = arith.constant dense<0.000000e+00> : vector<8xf32>
    %17 = vector.multi_reduction <add>, %16, %cst_11 [1] : vector<8x3xf32> to vector<8xf32>
    %18 = vector.shape_cast %17 : vector<8xf32> to vector<8x1xf32>
    %19 = vector.broadcast %18 : vector<8x1xf32> to vector<8x3xf32>
    %20 = arith.divf %16, %19 : vector<8x3xf32>
    %21 = vector.shape_cast %6 : vector<8x64xf32> to vector<1x8x64xf32>
    %22 = vector.shape_cast %21 : vector<1x8x64xf32> to vector<1x8x64xf32>
    %23 = vector.broadcast %22 : vector<1x8x64xf32> to vector<3x8x64xf32>
    %c0_12 = arith.constant 0 : index
    %c0_13 = arith.constant 0 : index
    %c0_14 = arith.constant 0 : index
    %c0_15 = arith.constant 0 : index
    %24 = vector.load %arg5[%c0_12, %c0_13, %c0_14, %c0_15] : memref<3x3x64x192xbf16, #tpu.memory_space<vmem>>, vector<1x3x64x192xbf16>
    %25 = vector.shape_cast %24 : vector<1x3x64x192xbf16> to vector<3x64x192xbf16>
    %c0_16 = arith.constant 0 : index
    %c0_17 = arith.constant 0 : index
    %c0_18 = arith.constant 0 : index
    %c0_19 = arith.constant 0 : index
    %26 = vector.load %arg6[%c0_16, %c0_17, %c0_18, %c0_19] : memref<3x3x1x192xf32, #tpu.memory_space<vmem>>, vector<1x3x1x192xf32>
    %27 = vector.shape_cast %26 : vector<1x3x1x192xf32> to vector<3x1x192xf32>
    %c0_20 = arith.constant 0 : index
    %c0_21 = arith.constant 0 : index
    %c0_22 = arith.constant 0 : index
    %c0_23 = arith.constant 0 : index
    %28 = vector.load %arg7[%c0_20, %c0_21, %c0_22, %c0_23] : memref<3x3x64x64xbf16, #tpu.memory_space<vmem>>, vector<1x3x64x64xbf16>
    %29 = vector.shape_cast %28 : vector<1x3x64x64xbf16> to vector<3x64x64xbf16>
    %c0_24 = arith.constant 0 : index
    %c0_25 = arith.constant 0 : index
    %c0_26 = arith.constant 0 : index
    %c0_27 = arith.constant 0 : index
    %30 = vector.load %arg8[%c0_24, %c0_25, %c0_26, %c0_27] : memref<3x3x1x64xf32, #tpu.memory_space<vmem>>, vector<1x3x1x64xf32>
    %31 = vector.shape_cast %30 : vector<1x3x1x64xf32> to vector<3x1x64xf32>
    %c0_28 = arith.constant 0 : index
    %c0_29 = arith.constant 0 : index
    %c0_30 = arith.constant 0 : index
    %c0_31 = arith.constant 0 : index
    %32 = vector.load %arg9[%c0_28, %c0_29, %c0_30, %c0_31] : memref<3x3x1x64xf32, #tpu.memory_space<vmem>>, vector<1x3x1x64xf32>
    %33 = vector.shape_cast %32 : vector<1x3x1x64xf32> to vector<3x1x64xf32>
    %c0_32 = arith.constant 0 : index
    %c0_33 = arith.constant 0 : index
    %c0_34 = arith.constant 0 : index
    %c0_35 = arith.constant 0 : index
    %34 = vector.load %arg10[%c0_32, %c0_33, %c0_34, %c0_35] : memref<3x3x1x64xf32, #tpu.memory_space<vmem>>, vector<1x3x1x64xf32>
    %35 = vector.shape_cast %34 : vector<1x3x1x64xf32> to vector<3x1x64xf32>
    %c0_36 = arith.constant 0 : index
    %c0_37 = arith.constant 0 : index
    %c0_38 = arith.constant 0 : index
    %c0_39 = arith.constant 0 : index
    %36 = vector.load %arg11[%c0_36, %c0_37, %c0_38, %c0_39] : memref<3x3x1x64xf32, #tpu.memory_space<vmem>>, vector<1x3x1x64xf32>
    %37 = vector.shape_cast %36 : vector<1x3x1x64xf32> to vector<3x1x64xf32>
    %c0_40 = arith.constant 0 : index
    %c0_41 = arith.constant 0 : index
    %c0_42 = arith.constant 0 : index
    %c0_43 = arith.constant 0 : index
    %38 = vector.load %arg12[%c0_40, %c0_41, %c0_42, %c0_43] : memref<3x3x1x64xf32, #tpu.memory_space<vmem>>, vector<1x3x1x64xf32>
    %39 = vector.shape_cast %38 : vector<1x3x1x64xf32> to vector<3x1x64xf32>
    %c0_44 = arith.constant 0 : index
    %c0_45 = arith.constant 0 : index
    %c0_46 = arith.constant 0 : index
    %c0_47 = arith.constant 0 : index
    %40 = vector.load %arg13[%c0_44, %c0_45, %c0_46, %c0_47] : memref<3x3x64x128xbf16, #tpu.memory_space<vmem>>, vector<1x3x64x128xbf16>
    %41 = vector.shape_cast %40 : vector<1x3x64x128xbf16> to vector<3x64x128xbf16>
    %c0_48 = arith.constant 0 : index
    %c0_49 = arith.constant 0 : index
    %c0_50 = arith.constant 0 : index
    %c0_51 = arith.constant 0 : index
    %42 = vector.load %arg14[%c0_48, %c0_49, %c0_50, %c0_51] : memref<3x3x1x128xf32, #tpu.memory_space<vmem>>, vector<1x3x1x128xf32>
    %43 = vector.shape_cast %42 : vector<1x3x1x128xf32> to vector<3x1x128xf32>
    %c0_52 = arith.constant 0 : index
    %c0_53 = arith.constant 0 : index
    %c0_54 = arith.constant 0 : index
    %c0_55 = arith.constant 0 : index
    %44 = vector.load %arg15[%c0_52, %c0_53, %c0_54, %c0_55] : memref<3x3x128x64xbf16, #tpu.memory_space<vmem>>, vector<1x3x128x64xbf16>
    %45 = vector.shape_cast %44 : vector<1x3x128x64xbf16> to vector<3x128x64xbf16>
    %c0_56 = arith.constant 0 : index
    %c0_57 = arith.constant 0 : index
    %c0_58 = arith.constant 0 : index
    %c0_59 = arith.constant 0 : index
    %46 = vector.load %arg16[%c0_56, %c0_57, %c0_58, %c0_59] : memref<3x3x1x64xf32, #tpu.memory_space<vmem>>, vector<1x3x1x64xf32>
    %47 = vector.shape_cast %46 : vector<1x3x1x64xf32> to vector<3x1x64xf32>
    %48 = arith.truncf %23 : vector<3x8x64xf32> to vector<3x8x64xbf16>
    "tpu.trace_start"() <{level = 10 : i32, message = "esd,edk->esk"}> : () -> ()
    %cst_60 = arith.constant dense<0.000000e+00> : vector<3x8x192xf32>
    %49 = tpu.matmul %48, %25, %cst_60 {dimension_numbers = #tpu.dot_dimension_numbers<[2], [1], [1], [2], [0, 0, 0, 1, 1, 2], [0], [0]>} : vector<3x8x64xbf16>, vector<3x64x192xbf16>, vector<3x8x192xf32> -> vector<3x8x192xf32>
    "tpu.trace_stop"() : () -> ()
    %50 = vector.broadcast %27 : vector<3x1x192xf32> to vector<3x8x192xf32>
    %51 = arith.addf %49, %50 : vector<3x8x192xf32>
    %52 = vector.extract_strided_slice %51 {offsets = [0, 0, 0], sizes = [3, 8, 16], strides = [1, 1, 1]} : vector<3x8x192xf32> to vector<3x8x16xf32>
    %53 = vector.extract_strided_slice %51 {offsets = [0, 0, 16], sizes = [3, 8, 16], strides = [1, 1, 1]} : vector<3x8x192xf32> to vector<3x8x16xf32>
    %54 = vector.extract_strided_slice %51 {offsets = [0, 0, 32], sizes = [3, 8, 16], strides = [1, 1, 1]} : vector<3x8x192xf32> to vector<3x8x16xf32>
    %55 = arith.truncf %52 : vector<3x8x16xf32> to vector<3x8x16xbf16>
    %56 = arith.truncf %53 : vector<3x8x16xf32> to vector<3x8x16xbf16>
    "tpu.trace_start"() <{level = 10 : i32, message = "esk,etk->est"}> : () -> ()
    %cst_61 = arith.constant dense<0.000000e+00> : vector<3x8x8xf32>
    %57 = tpu.matmul %55, %56, %cst_61 {dimension_numbers = #tpu.dot_dimension_numbers<[2], [2], [1], [1], [0, 0, 0, 1, 1, 1], [0], [0]>} : vector<3x8x16xbf16>, vector<3x8x16xbf16>, vector<3x8x8xf32> -> vector<3x8x8xf32>
    "tpu.trace_stop"() : () -> ()
    %cst_62 = arith.constant 2.500000e-01 : f32
    %58 = vector.broadcast %cst_62 : f32 to vector<3x8x8xf32>
    %59 = arith.mulf %57, %58 : vector<3x8x8xf32>
    %cst_63 = arith.constant dense<0xFF800000> : vector<3x8xf32>
    %60 = vector.multi_reduction <maximumf>, %59, %cst_63 [2] : vector<3x8x8xf32> to vector<3x8xf32>
    %61 = vector.shape_cast %60 : vector<3x8xf32> to vector<3x8x1xf32>
    %62 = vector.broadcast %61 : vector<3x8x1xf32> to vector<3x8x8xf32>
    %63 = arith.subf %59, %62 : vector<3x8x8xf32>
    %64 = math.exp %63 : vector<3x8x8xf32>
    %cst_64 = arith.constant dense<0.000000e+00> : vector<3x8xf32>
    %65 = vector.multi_reduction <add>, %64, %cst_64 [2] : vector<3x8x8xf32> to vector<3x8xf32>
    %66 = vector.shape_cast %65 : vector<3x8xf32> to vector<3x8x1xf32>
    %67 = tpu.reciprocal %66 {approx = true} : vector<3x8x1xf32> -> vector<3x8x1xf32>
    %68 = vector.broadcast %67 : vector<3x8x1xf32> to vector<3x8x8xf32>
    %69 = arith.mulf %64, %68 : vector<3x8x8xf32>
    %70 = arith.truncf %69 : vector<3x8x8xf32> to vector<3x8x8xbf16>
    %71 = arith.truncf %54 : vector<3x8x16xf32> to vector<3x8x16xbf16>
    "tpu.trace_start"() <{level = 10 : i32, message = "est,etk->esk"}> : () -> ()
    %cst_65 = arith.constant dense<0.000000e+00> : vector<3x8x16xf32>
    %72 = tpu.matmul %70, %71, %cst_65 {dimension_numbers = #tpu.dot_dimension_numbers<[2], [1], [1], [2], [0, 0, 0, 1, 1, 2], [0], [0]>} : vector<3x8x8xbf16>, vector<3x8x16xbf16>, vector<3x8x16xf32> -> vector<3x8x16xf32>
    "tpu.trace_stop"() : () -> ()
    %73 = vector.extract_strided_slice %51 {offsets = [0, 0, 48], sizes = [3, 8, 16], strides = [1, 1, 1]} : vector<3x8x192xf32> to vector<3x8x16xf32>
    %74 = vector.extract_strided_slice %51 {offsets = [0, 0, 64], sizes = [3, 8, 16], strides = [1, 1, 1]} : vector<3x8x192xf32> to vector<3x8x16xf32>
    %75 = vector.extract_strided_slice %51 {offsets = [0, 0, 80], sizes = [3, 8, 16], strides = [1, 1, 1]} : vector<3x8x192xf32> to vector<3x8x16xf32>
    %76 = arith.truncf %73 : vector<3x8x16xf32> to vector<3x8x16xbf16>
    %77 = arith.truncf %74 : vector<3x8x16xf32> to vector<3x8x16xbf16>
    "tpu.trace_start"() <{level = 10 : i32, message = "esk,etk->est"}> : () -> ()
    %cst_66 = arith.constant dense<0.000000e+00> : vector<3x8x8xf32>
    %78 = tpu.matmul %76, %77, %cst_66 {dimension_numbers = #tpu.dot_dimension_numbers<[2], [2], [1], [1], [0, 0, 0, 1, 1, 1], [0], [0]>} : vector<3x8x16xbf16>, vector<3x8x16xbf16>, vector<3x8x8xf32> -> vector<3x8x8xf32>
    "tpu.trace_stop"() : () -> ()
    %cst_67 = arith.constant 2.500000e-01 : f32
    %79 = vector.broadcast %cst_67 : f32 to vector<3x8x8xf32>
    %80 = arith.mulf %78, %79 : vector<3x8x8xf32>
    %cst_68 = arith.constant dense<0xFF800000> : vector<3x8xf32>
    %81 = vector.multi_reduction <maximumf>, %80, %cst_68 [2] : vector<3x8x8xf32> to vector<3x8xf32>
    %82 = vector.shape_cast %81 : vector<3x8xf32> to vector<3x8x1xf32>
    %83 = vector.broadcast %82 : vector<3x8x1xf32> to vector<3x8x8xf32>
    %84 = arith.subf %80, %83 : vector<3x8x8xf32>
    %85 = math.exp %84 : vector<3x8x8xf32>
    %cst_69 = arith.constant dense<0.000000e+00> : vector<3x8xf32>
    %86 = vector.multi_reduction <add>, %85, %cst_69 [2] : vector<3x8x8xf32> to vector<3x8xf32>
    %87 = vector.shape_cast %86 : vector<3x8xf32> to vector<3x8x1xf32>
    %88 = tpu.reciprocal %87 {approx = true} : vector<3x8x1xf32> -> vector<3x8x1xf32>
    %89 = vector.broadcast %88 : vector<3x8x1xf32> to vector<3x8x8xf32>
    %90 = arith.mulf %85, %89 : vector<3x8x8xf32>
    %91 = arith.truncf %90 : vector<3x8x8xf32> to vector<3x8x8xbf16>
    %92 = arith.truncf %75 : vector<3x8x16xf32> to vector<3x8x16xbf16>
    "tpu.trace_start"() <{level = 10 : i32, message = "est,etk->esk"}> : () -> ()
    %cst_70 = arith.constant dense<0.000000e+00> : vector<3x8x16xf32>
    %93 = tpu.matmul %91, %92, %cst_70 {dimension_numbers = #tpu.dot_dimension_numbers<[2], [1], [1], [2], [0, 0, 0, 1, 1, 2], [0], [0]>} : vector<3x8x8xbf16>, vector<3x8x16xbf16>, vector<3x8x16xf32> -> vector<3x8x16xf32>
    "tpu.trace_stop"() : () -> ()
    %94 = vector.extract_strided_slice %51 {offsets = [0, 0, 96], sizes = [3, 8, 16], strides = [1, 1, 1]} : vector<3x8x192xf32> to vector<3x8x16xf32>
    %95 = vector.extract_strided_slice %51 {offsets = [0, 0, 112], sizes = [3, 8, 16], strides = [1, 1, 1]} : vector<3x8x192xf32> to vector<3x8x16xf32>
    %96 = vector.extract_strided_slice %51 {offsets = [0, 0, 128], sizes = [3, 8, 16], strides = [1, 1, 1]} : vector<3x8x192xf32> to vector<3x8x16xf32>
    %97 = arith.truncf %94 : vector<3x8x16xf32> to vector<3x8x16xbf16>
    %98 = arith.truncf %95 : vector<3x8x16xf32> to vector<3x8x16xbf16>
    "tpu.trace_start"() <{level = 10 : i32, message = "esk,etk->est"}> : () -> ()
    %cst_71 = arith.constant dense<0.000000e+00> : vector<3x8x8xf32>
    %99 = tpu.matmul %97, %98, %cst_71 {dimension_numbers = #tpu.dot_dimension_numbers<[2], [2], [1], [1], [0, 0, 0, 1, 1, 1], [0], [0]>} : vector<3x8x16xbf16>, vector<3x8x16xbf16>, vector<3x8x8xf32> -> vector<3x8x8xf32>
    "tpu.trace_stop"() : () -> ()
    %cst_72 = arith.constant 2.500000e-01 : f32
    %100 = vector.broadcast %cst_72 : f32 to vector<3x8x8xf32>
    %101 = arith.mulf %99, %100 : vector<3x8x8xf32>
    %cst_73 = arith.constant dense<0xFF800000> : vector<3x8xf32>
    %102 = vector.multi_reduction <maximumf>, %101, %cst_73 [2] : vector<3x8x8xf32> to vector<3x8xf32>
    %103 = vector.shape_cast %102 : vector<3x8xf32> to vector<3x8x1xf32>
    %104 = vector.broadcast %103 : vector<3x8x1xf32> to vector<3x8x8xf32>
    %105 = arith.subf %101, %104 : vector<3x8x8xf32>
    %106 = math.exp %105 : vector<3x8x8xf32>
    %cst_74 = arith.constant dense<0.000000e+00> : vector<3x8xf32>
    %107 = vector.multi_reduction <add>, %106, %cst_74 [2] : vector<3x8x8xf32> to vector<3x8xf32>
    %108 = vector.shape_cast %107 : vector<3x8xf32> to vector<3x8x1xf32>
    %109 = tpu.reciprocal %108 {approx = true} : vector<3x8x1xf32> -> vector<3x8x1xf32>
    %110 = vector.broadcast %109 : vector<3x8x1xf32> to vector<3x8x8xf32>
    %111 = arith.mulf %106, %110 : vector<3x8x8xf32>
    %112 = arith.truncf %111 : vector<3x8x8xf32> to vector<3x8x8xbf16>
    %113 = arith.truncf %96 : vector<3x8x16xf32> to vector<3x8x16xbf16>
    "tpu.trace_start"() <{level = 10 : i32, message = "est,etk->esk"}> : () -> ()
    %cst_75 = arith.constant dense<0.000000e+00> : vector<3x8x16xf32>
    %114 = tpu.matmul %112, %113, %cst_75 {dimension_numbers = #tpu.dot_dimension_numbers<[2], [1], [1], [2], [0, 0, 0, 1, 1, 2], [0], [0]>} : vector<3x8x8xbf16>, vector<3x8x16xbf16>, vector<3x8x16xf32> -> vector<3x8x16xf32>
    "tpu.trace_stop"() : () -> ()
    %115 = vector.extract_strided_slice %51 {offsets = [0, 0, 144], sizes = [3, 8, 16], strides = [1, 1, 1]} : vector<3x8x192xf32> to vector<3x8x16xf32>
    %116 = vector.extract_strided_slice %51 {offsets = [0, 0, 160], sizes = [3, 8, 16], strides = [1, 1, 1]} : vector<3x8x192xf32> to vector<3x8x16xf32>
    %117 = vector.extract_strided_slice %51 {offsets = [0, 0, 176], sizes = [3, 8, 16], strides = [1, 1, 1]} : vector<3x8x192xf32> to vector<3x8x16xf32>
    %118 = arith.truncf %115 : vector<3x8x16xf32> to vector<3x8x16xbf16>
    %119 = arith.truncf %116 : vector<3x8x16xf32> to vector<3x8x16xbf16>
    "tpu.trace_start"() <{level = 10 : i32, message = "esk,etk->est"}> : () -> ()
    %cst_76 = arith.constant dense<0.000000e+00> : vector<3x8x8xf32>
    %120 = tpu.matmul %118, %119, %cst_76 {dimension_numbers = #tpu.dot_dimension_numbers<[2], [2], [1], [1], [0, 0, 0, 1, 1, 1], [0], [0]>} : vector<3x8x16xbf16>, vector<3x8x16xbf16>, vector<3x8x8xf32> -> vector<3x8x8xf32>
    "tpu.trace_stop"() : () -> ()
    %cst_77 = arith.constant 2.500000e-01 : f32
    %121 = vector.broadcast %cst_77 : f32 to vector<3x8x8xf32>
    %122 = arith.mulf %120, %121 : vector<3x8x8xf32>
    %cst_78 = arith.constant dense<0xFF800000> : vector<3x8xf32>
    %123 = vector.multi_reduction <maximumf>, %122, %cst_78 [2] : vector<3x8x8xf32> to vector<3x8xf32>
    %124 = vector.shape_cast %123 : vector<3x8xf32> to vector<3x8x1xf32>
    %125 = vector.broadcast %124 : vector<3x8x1xf32> to vector<3x8x8xf32>
    %126 = arith.subf %122, %125 : vector<3x8x8xf32>
    %127 = math.exp %126 : vector<3x8x8xf32>
    %cst_79 = arith.constant dense<0.000000e+00> : vector<3x8xf32>
    %128 = vector.multi_reduction <add>, %127, %cst_79 [2] : vector<3x8x8xf32> to vector<3x8xf32>
    %129 = vector.shape_cast %128 : vector<3x8xf32> to vector<3x8x1xf32>
    %130 = tpu.reciprocal %129 {approx = true} : vector<3x8x1xf32> -> vector<3x8x1xf32>
    %131 = vector.broadcast %130 : vector<3x8x1xf32> to vector<3x8x8xf32>
    %132 = arith.mulf %127, %131 : vector<3x8x8xf32>
    %133 = arith.truncf %132 : vector<3x8x8xf32> to vector<3x8x8xbf16>
    %134 = arith.truncf %117 : vector<3x8x16xf32> to vector<3x8x16xbf16>
    "tpu.trace_start"() <{level = 10 : i32, message = "est,etk->esk"}> : () -> ()
    %cst_80 = arith.constant dense<0.000000e+00> : vector<3x8x16xf32>
    %135 = tpu.matmul %133, %134, %cst_80 {dimension_numbers = #tpu.dot_dimension_numbers<[2], [1], [1], [2], [0, 0, 0, 1, 1, 2], [0], [0]>} : vector<3x8x8xbf16>, vector<3x8x16xbf16>, vector<3x8x16xf32> -> vector<3x8x16xf32>
    "tpu.trace_stop"() : () -> ()
    %136 = tpu.concatenate %72, %93, %114, %135 in 2 : vector<3x8x16xf32>, vector<3x8x16xf32>, vector<3x8x16xf32>, vector<3x8x16xf32> -> vector<3x8x64xf32>
    %137 = arith.truncf %136 : vector<3x8x64xf32> to vector<3x8x64xbf16>
    "tpu.trace_start"() <{level = 10 : i32, message = "esk,ekd->esd"}> : () -> ()
    %cst_81 = arith.constant dense<0.000000e+00> : vector<3x8x64xf32>
    %138 = tpu.matmul %137, %29, %cst_81 {dimension_numbers = #tpu.dot_dimension_numbers<[2], [1], [1], [2], [0, 0, 0, 1, 1, 2], [0], [0]>} : vector<3x8x64xbf16>, vector<3x64x64xbf16>, vector<3x8x64xf32> -> vector<3x8x64xf32>
    "tpu.trace_stop"() : () -> ()
    %139 = vector.broadcast %31 : vector<3x1x64xf32> to vector<3x8x64xf32>
    %140 = arith.addf %138, %139 : vector<3x8x64xf32>
    %141 = arith.addf %23, %140 : vector<3x8x64xf32>
    %cst_82 = arith.constant dense<0.000000e+00> : vector<3x8xf32>
    %142 = vector.multi_reduction <add>, %141, %cst_82 [2] : vector<3x8x64xf32> to vector<3x8xf32>
    %143 = vector.shape_cast %142 : vector<3x8xf32> to vector<3x8x1xf32>
    %cst_83 = arith.constant 6.400000e+01 : f32
    %144 = vector.broadcast %cst_83 : f32 to vector<3x8x1xf32>
    %145 = arith.divf %143, %144 : vector<3x8x1xf32>
    %146 = arith.mulf %141, %141 : vector<3x8x64xf32>
    %cst_84 = arith.constant dense<0.000000e+00> : vector<3x8xf32>
    %147 = vector.multi_reduction <add>, %146, %cst_84 [2] : vector<3x8x64xf32> to vector<3x8xf32>
    %148 = vector.shape_cast %147 : vector<3x8xf32> to vector<3x8x1xf32>
    %cst_85 = arith.constant 6.400000e+01 : f32
    %149 = vector.broadcast %cst_85 : f32 to vector<3x8x1xf32>
    %150 = arith.divf %148, %149 : vector<3x8x1xf32>
    %151 = arith.mulf %145, %145 : vector<3x8x1xf32>
    %152 = arith.subf %150, %151 : vector<3x8x1xf32>
    %153 = vector.broadcast %145 : vector<3x8x1xf32> to vector<3x8x64xf32>
    %154 = arith.subf %141, %153 : vector<3x8x64xf32>
    %cst_86 = arith.constant 9.99999974E-6 : f32
    %155 = vector.broadcast %cst_86 : f32 to vector<3x8x1xf32>
    %156 = arith.addf %152, %155 : vector<3x8x1xf32>
    %157 = math.rsqrt %156 : vector<3x8x1xf32>
    %158 = vector.broadcast %157 : vector<3x8x1xf32> to vector<3x8x64xf32>
    %159 = arith.mulf %154, %158 : vector<3x8x64xf32>
    %160 = vector.broadcast %33 : vector<3x1x64xf32> to vector<3x8x64xf32>
    %161 = arith.mulf %159, %160 : vector<3x8x64xf32>
    %162 = vector.broadcast %35 : vector<3x1x64xf32> to vector<3x8x64xf32>
    %163 = arith.addf %161, %162 : vector<3x8x64xf32>
    %164 = arith.truncf %163 : vector<3x8x64xf32> to vector<3x8x64xbf16>
    "tpu.trace_start"() <{level = 10 : i32, message = "esd,edf->esf"}> : () -> ()
    %cst_87 = arith.constant dense<0.000000e+00> : vector<3x8x128xf32>
    %165 = tpu.matmul %164, %41, %cst_87 {dimension_numbers = #tpu.dot_dimension_numbers<[2], [1], [1], [2], [0, 0, 0, 1, 1, 2], [0], [0]>} : vector<3x8x64xbf16>, vector<3x64x128xbf16>, vector<3x8x128xf32> -> vector<3x8x128xf32>
    "tpu.trace_stop"() : () -> ()
    %166 = vector.broadcast %43 : vector<3x1x128xf32> to vector<3x8x128xf32>
    %167 = arith.addf %165, %166 : vector<3x8x128xf32>
    %cst_88 = arith.constant 0.000000e+00 : f32
    %168 = vector.broadcast %cst_88 : f32 to vector<3x8x128xf32>
    %169 = arith.maximumf %167, %168 : vector<3x8x128xf32>
    %170 = arith.truncf %169 : vector<3x8x128xf32> to vector<3x8x128xbf16>
    "tpu.trace_start"() <{level = 10 : i32, message = "esf,efd->esd"}> : () -> ()
    %cst_89 = arith.constant dense<0.000000e+00> : vector<3x8x64xf32>
    %171 = tpu.matmul %170, %45, %cst_89 {dimension_numbers = #tpu.dot_dimension_numbers<[2], [1], [1], [2], [0, 0, 0, 1, 1, 2], [0], [0]>} : vector<3x8x128xbf16>, vector<3x128x64xbf16>, vector<3x8x64xf32> -> vector<3x8x64xf32>
    "tpu.trace_stop"() : () -> ()
    %172 = vector.broadcast %47 : vector<3x1x64xf32> to vector<3x8x64xf32>
    %173 = arith.addf %171, %172 : vector<3x8x64xf32>
    %174 = arith.addf %163, %173 : vector<3x8x64xf32>
    %cst_90 = arith.constant dense<0.000000e+00> : vector<3x8xf32>
    %175 = vector.multi_reduction <add>, %174, %cst_90 [2] : vector<3x8x64xf32> to vector<3x8xf32>
    %176 = vector.shape_cast %175 : vector<3x8xf32> to vector<3x8x1xf32>
    %cst_91 = arith.constant 6.400000e+01 : f32
    %177 = vector.broadcast %cst_91 : f32 to vector<3x8x1xf32>
    %178 = arith.divf %176, %177 : vector<3x8x1xf32>
    %179 = arith.mulf %174, %174 : vector<3x8x64xf32>
    %cst_92 = arith.constant dense<0.000000e+00> : vector<3x8xf32>
    %180 = vector.multi_reduction <add>, %179, %cst_92 [2] : vector<3x8x64xf32> to vector<3x8xf32>
    %181 = vector.shape_cast %180 : vector<3x8xf32> to vector<3x8x1xf32>
    %cst_93 = arith.constant 6.400000e+01 : f32
    %182 = vector.broadcast %cst_93 : f32 to vector<3x8x1xf32>
    %183 = arith.divf %181, %182 : vector<3x8x1xf32>
    %184 = arith.mulf %178, %178 : vector<3x8x1xf32>
    %185 = arith.subf %183, %184 : vector<3x8x1xf32>
    %186 = vector.broadcast %178 : vector<3x8x1xf32> to vector<3x8x64xf32>
    %187 = arith.subf %174, %186 : vector<3x8x64xf32>
    %cst_94 = arith.constant 9.99999974E-6 : f32
    %188 = vector.broadcast %cst_94 : f32 to vector<3x8x1xf32>
    %189 = arith.addf %185, %188 : vector<3x8x1xf32>
    %190 = math.rsqrt %189 : vector<3x8x1xf32>
    %191 = vector.broadcast %190 : vector<3x8x1xf32> to vector<3x8x64xf32>
    %192 = arith.mulf %187, %191 : vector<3x8x64xf32>
    %193 = vector.broadcast %37 : vector<3x1x64xf32> to vector<3x8x64xf32>
    %194 = arith.mulf %192, %193 : vector<3x8x64xf32>
    %195 = vector.broadcast %39 : vector<3x1x64xf32> to vector<3x8x64xf32>
    %196 = arith.addf %194, %195 : vector<3x8x64xf32>
    %c1 = arith.constant 1 : index
    %c0_95 = arith.constant 0 : index
    %c0_96 = arith.constant 0 : index
    %c0_97 = arith.constant 0 : index
    %197 = vector.load %arg5[%c1, %c0_95, %c0_96, %c0_97] : memref<3x3x64x192xbf16, #tpu.memory_space<vmem>>, vector<1x3x64x192xbf16>
    %198 = vector.shape_cast %197 : vector<1x3x64x192xbf16> to vector<3x64x192xbf16>
    %c1_98 = arith.constant 1 : index
    %c0_99 = arith.constant 0 : index
    %c0_100 = arith.constant 0 : index
    %c0_101 = arith.constant 0 : index
    %199 = vector.load %arg6[%c1_98, %c0_99, %c0_100, %c0_101] : memref<3x3x1x192xf32, #tpu.memory_space<vmem>>, vector<1x3x1x192xf32>
    %200 = vector.shape_cast %199 : vector<1x3x1x192xf32> to vector<3x1x192xf32>
    %c1_102 = arith.constant 1 : index
    %c0_103 = arith.constant 0 : index
    %c0_104 = arith.constant 0 : index
    %c0_105 = arith.constant 0 : index
    %201 = vector.load %arg7[%c1_102, %c0_103, %c0_104, %c0_105] : memref<3x3x64x64xbf16, #tpu.memory_space<vmem>>, vector<1x3x64x64xbf16>
    %202 = vector.shape_cast %201 : vector<1x3x64x64xbf16> to vector<3x64x64xbf16>
    %c1_106 = arith.constant 1 : index
    %c0_107 = arith.constant 0 : index
    %c0_108 = arith.constant 0 : index
    %c0_109 = arith.constant 0 : index
    %203 = vector.load %arg8[%c1_106, %c0_107, %c0_108, %c0_109] : memref<3x3x1x64xf32, #tpu.memory_space<vmem>>, vector<1x3x1x64xf32>
    %204 = vector.shape_cast %203 : vector<1x3x1x64xf32> to vector<3x1x64xf32>
    %c1_110 = arith.constant 1 : index
    %c0_111 = arith.constant 0 : index
    %c0_112 = arith.constant 0 : index
    %c0_113 = arith.constant 0 : index
    %205 = vector.load %arg9[%c1_110, %c0_111, %c0_112, %c0_113] : memref<3x3x1x64xf32, #tpu.memory_space<vmem>>, vector<1x3x1x64xf32>
    %206 = vector.shape_cast %205 : vector<1x3x1x64xf32> to vector<3x1x64xf32>
    %c1_114 = arith.constant 1 : index
    %c0_115 = arith.constant 0 : index
    %c0_116 = arith.constant 0 : index
    %c0_117 = arith.constant 0 : index
    %207 = vector.load %arg10[%c1_114, %c0_115, %c0_116, %c0_117] : memref<3x3x1x64xf32, #tpu.memory_space<vmem>>, vector<1x3x1x64xf32>
    %208 = vector.shape_cast %207 : vector<1x3x1x64xf32> to vector<3x1x64xf32>
    %c1_118 = arith.constant 1 : index
    %c0_119 = arith.constant 0 : index
    %c0_120 = arith.constant 0 : index
    %c0_121 = arith.constant 0 : index
    %209 = vector.load %arg11[%c1_118, %c0_119, %c0_120, %c0_121] : memref<3x3x1x64xf32, #tpu.memory_space<vmem>>, vector<1x3x1x64xf32>
    %210 = vector.shape_cast %209 : vector<1x3x1x64xf32> to vector<3x1x64xf32>
    %c1_122 = arith.constant 1 : index
    %c0_123 = arith.constant 0 : index
    %c0_124 = arith.constant 0 : index
    %c0_125 = arith.constant 0 : index
    %211 = vector.load %arg12[%c1_122, %c0_123, %c0_124, %c0_125] : memref<3x3x1x64xf32, #tpu.memory_space<vmem>>, vector<1x3x1x64xf32>
    %212 = vector.shape_cast %211 : vector<1x3x1x64xf32> to vector<3x1x64xf32>
    %c1_126 = arith.constant 1 : index
    %c0_127 = arith.constant 0 : index
    %c0_128 = arith.constant 0 : index
    %c0_129 = arith.constant 0 : index
    %213 = vector.load %arg13[%c1_126, %c0_127, %c0_128, %c0_129] : memref<3x3x64x128xbf16, #tpu.memory_space<vmem>>, vector<1x3x64x128xbf16>
    %214 = vector.shape_cast %213 : vector<1x3x64x128xbf16> to vector<3x64x128xbf16>
    %c1_130 = arith.constant 1 : index
    %c0_131 = arith.constant 0 : index
    %c0_132 = arith.constant 0 : index
    %c0_133 = arith.constant 0 : index
    %215 = vector.load %arg14[%c1_130, %c0_131, %c0_132, %c0_133] : memref<3x3x1x128xf32, #tpu.memory_space<vmem>>, vector<1x3x1x128xf32>
    %216 = vector.shape_cast %215 : vector<1x3x1x128xf32> to vector<3x1x128xf32>
    %c1_134 = arith.constant 1 : index
    %c0_135 = arith.constant 0 : index
    %c0_136 = arith.constant 0 : index
    %c0_137 = arith.constant 0 : index
    %217 = vector.load %arg15[%c1_134, %c0_135, %c0_136, %c0_137] : memref<3x3x128x64xbf16, #tpu.memory_space<vmem>>, vector<1x3x128x64xbf16>
    %218 = vector.shape_cast %217 : vector<1x3x128x64xbf16> to vector<3x128x64xbf16>
    %c1_138 = arith.constant 1 : index
    %c0_139 = arith.constant 0 : index
    %c0_140 = arith.constant 0 : index
    %c0_141 = arith.constant 0 : index
    %219 = vector.load %arg16[%c1_138, %c0_139, %c0_140, %c0_141] : memref<3x3x1x64xf32, #tpu.memory_space<vmem>>, vector<1x3x1x64xf32>
    %220 = vector.shape_cast %219 : vector<1x3x1x64xf32> to vector<3x1x64xf32>
    %221 = arith.truncf %196 : vector<3x8x64xf32> to vector<3x8x64xbf16>
    "tpu.trace_start"() <{level = 10 : i32, message = "esd,edk->esk"}> : () -> ()
    %cst_142 = arith.constant dense<0.000000e+00> : vector<3x8x192xf32>
    %222 = tpu.matmul %221, %198, %cst_142 {dimension_numbers = #tpu.dot_dimension_numbers<[2], [1], [1], [2], [0, 0, 0, 1, 1, 2], [0], [0]>} : vector<3x8x64xbf16>, vector<3x64x192xbf16>, vector<3x8x192xf32> -> vector<3x8x192xf32>
    "tpu.trace_stop"() : () -> ()
    %223 = vector.broadcast %200 : vector<3x1x192xf32> to vector<3x8x192xf32>
    %224 = arith.addf %222, %223 : vector<3x8x192xf32>
    %225 = vector.extract_strided_slice %224 {offsets = [0, 0, 0], sizes = [3, 8, 16], strides = [1, 1, 1]} : vector<3x8x192xf32> to vector<3x8x16xf32>
    %226 = vector.extract_strided_slice %224 {offsets = [0, 0, 16], sizes = [3, 8, 16], strides = [1, 1, 1]} : vector<3x8x192xf32> to vector<3x8x16xf32>
    %227 = vector.extract_strided_slice %224 {offsets = [0, 0, 32], sizes = [3, 8, 16], strides = [1, 1, 1]} : vector<3x8x192xf32> to vector<3x8x16xf32>
    %228 = arith.truncf %225 : vector<3x8x16xf32> to vector<3x8x16xbf16>
    %229 = arith.truncf %226 : vector<3x8x16xf32> to vector<3x8x16xbf16>
    "tpu.trace_start"() <{level = 10 : i32, message = "esk,etk->est"}> : () -> ()
    %cst_143 = arith.constant dense<0.000000e+00> : vector<3x8x8xf32>
    %230 = tpu.matmul %228, %229, %cst_143 {dimension_numbers = #tpu.dot_dimension_numbers<[2], [2], [1], [1], [0, 0, 0, 1, 1, 1], [0], [0]>} : vector<3x8x16xbf16>, vector<3x8x16xbf16>, vector<3x8x8xf32> -> vector<3x8x8xf32>
    "tpu.trace_stop"() : () -> ()
    %cst_144 = arith.constant 2.500000e-01 : f32
    %231 = vector.broadcast %cst_144 : f32 to vector<3x8x8xf32>
    %232 = arith.mulf %230, %231 : vector<3x8x8xf32>
    %cst_145 = arith.constant dense<0xFF800000> : vector<3x8xf32>
    %233 = vector.multi_reduction <maximumf>, %232, %cst_145 [2] : vector<3x8x8xf32> to vector<3x8xf32>
    %234 = vector.shape_cast %233 : vector<3x8xf32> to vector<3x8x1xf32>
    %235 = vector.broadcast %234 : vector<3x8x1xf32> to vector<3x8x8xf32>
    %236 = arith.subf %232, %235 : vector<3x8x8xf32>
    %237 = math.exp %236 : vector<3x8x8xf32>
    %cst_146 = arith.constant dense<0.000000e+00> : vector<3x8xf32>
    %238 = vector.multi_reduction <add>, %237, %cst_146 [2] : vector<3x8x8xf32> to vector<3x8xf32>
    %239 = vector.shape_cast %238 : vector<3x8xf32> to vector<3x8x1xf32>
    %240 = tpu.reciprocal %239 {approx = true} : vector<3x8x1xf32> -> vector<3x8x1xf32>
    %241 = vector.broadcast %240 : vector<3x8x1xf32> to vector<3x8x8xf32>
    %242 = arith.mulf %237, %241 : vector<3x8x8xf32>
    %243 = arith.truncf %242 : vector<3x8x8xf32> to vector<3x8x8xbf16>
    %244 = arith.truncf %227 : vector<3x8x16xf32> to vector<3x8x16xbf16>
    "tpu.trace_start"() <{level = 10 : i32, message = "est,etk->esk"}> : () -> ()
    %cst_147 = arith.constant dense<0.000000e+00> : vector<3x8x16xf32>
    %245 = tpu.matmul %243, %244, %cst_147 {dimension_numbers = #tpu.dot_dimension_numbers<[2], [1], [1], [2], [0, 0, 0, 1, 1, 2], [0], [0]>} : vector<3x8x8xbf16>, vector<3x8x16xbf16>, vector<3x8x16xf32> -> vector<3x8x16xf32>
    "tpu.trace_stop"() : () -> ()
    %246 = vector.extract_strided_slice %224 {offsets = [0, 0, 48], sizes = [3, 8, 16], strides = [1, 1, 1]} : vector<3x8x192xf32> to vector<3x8x16xf32>
    %247 = vector.extract_strided_slice %224 {offsets = [0, 0, 64], sizes = [3, 8, 16], strides = [1, 1, 1]} : vector<3x8x192xf32> to vector<3x8x16xf32>
    %248 = vector.extract_strided_slice %224 {offsets = [0, 0, 80], sizes = [3, 8, 16], strides = [1, 1, 1]} : vector<3x8x192xf32> to vector<3x8x16xf32>
    %249 = arith.truncf %246 : vector<3x8x16xf32> to vector<3x8x16xbf16>
    %250 = arith.truncf %247 : vector<3x8x16xf32> to vector<3x8x16xbf16>
    "tpu.trace_start"() <{level = 10 : i32, message = "esk,etk->est"}> : () -> ()
    %cst_148 = arith.constant dense<0.000000e+00> : vector<3x8x8xf32>
    %251 = tpu.matmul %249, %250, %cst_148 {dimension_numbers = #tpu.dot_dimension_numbers<[2], [2], [1], [1], [0, 0, 0, 1, 1, 1], [0], [0]>} : vector<3x8x16xbf16>, vector<3x8x16xbf16>, vector<3x8x8xf32> -> vector<3x8x8xf32>
    "tpu.trace_stop"() : () -> ()
    %cst_149 = arith.constant 2.500000e-01 : f32
    %252 = vector.broadcast %cst_149 : f32 to vector<3x8x8xf32>
    %253 = arith.mulf %251, %252 : vector<3x8x8xf32>
    %cst_150 = arith.constant dense<0xFF800000> : vector<3x8xf32>
    %254 = vector.multi_reduction <maximumf>, %253, %cst_150 [2] : vector<3x8x8xf32> to vector<3x8xf32>
    %255 = vector.shape_cast %254 : vector<3x8xf32> to vector<3x8x1xf32>
    %256 = vector.broadcast %255 : vector<3x8x1xf32> to vector<3x8x8xf32>
    %257 = arith.subf %253, %256 : vector<3x8x8xf32>
    %258 = math.exp %257 : vector<3x8x8xf32>
    %cst_151 = arith.constant dense<0.000000e+00> : vector<3x8xf32>
    %259 = vector.multi_reduction <add>, %258, %cst_151 [2] : vector<3x8x8xf32> to vector<3x8xf32>
    %260 = vector.shape_cast %259 : vector<3x8xf32> to vector<3x8x1xf32>
    %261 = tpu.reciprocal %260 {approx = true} : vector<3x8x1xf32> -> vector<3x8x1xf32>
    %262 = vector.broadcast %261 : vector<3x8x1xf32> to vector<3x8x8xf32>
    %263 = arith.mulf %258, %262 : vector<3x8x8xf32>
    %264 = arith.truncf %263 : vector<3x8x8xf32> to vector<3x8x8xbf16>
    %265 = arith.truncf %248 : vector<3x8x16xf32> to vector<3x8x16xbf16>
    "tpu.trace_start"() <{level = 10 : i32, message = "est,etk->esk"}> : () -> ()
    %cst_152 = arith.constant dense<0.000000e+00> : vector<3x8x16xf32>
    %266 = tpu.matmul %264, %265, %cst_152 {dimension_numbers = #tpu.dot_dimension_numbers<[2], [1], [1], [2], [0, 0, 0, 1, 1, 2], [0], [0]>} : vector<3x8x8xbf16>, vector<3x8x16xbf16>, vector<3x8x16xf32> -> vector<3x8x16xf32>
    "tpu.trace_stop"() : () -> ()
    %267 = vector.extract_strided_slice %224 {offsets = [0, 0, 96], sizes = [3, 8, 16], strides = [1, 1, 1]} : vector<3x8x192xf32> to vector<3x8x16xf32>
    %268 = vector.extract_strided_slice %224 {offsets = [0, 0, 112], sizes = [3, 8, 16], strides = [1, 1, 1]} : vector<3x8x192xf32> to vector<3x8x16xf32>
    %269 = vector.extract_strided_slice %224 {offsets = [0, 0, 128], sizes = [3, 8, 16], strides = [1, 1, 1]} : vector<3x8x192xf32> to vector<3x8x16xf32>
    %270 = arith.truncf %267 : vector<3x8x16xf32> to vector<3x8x16xbf16>
    %271 = arith.truncf %268 : vector<3x8x16xf32> to vector<3x8x16xbf16>
    "tpu.trace_start"() <{level = 10 : i32, message = "esk,etk->est"}> : () -> ()
    %cst_153 = arith.constant dense<0.000000e+00> : vector<3x8x8xf32>
    %272 = tpu.matmul %270, %271, %cst_153 {dimension_numbers = #tpu.dot_dimension_numbers<[2], [2], [1], [1], [0, 0, 0, 1, 1, 1], [0], [0]>} : vector<3x8x16xbf16>, vector<3x8x16xbf16>, vector<3x8x8xf32> -> vector<3x8x8xf32>
    "tpu.trace_stop"() : () -> ()
    %cst_154 = arith.constant 2.500000e-01 : f32
    %273 = vector.broadcast %cst_154 : f32 to vector<3x8x8xf32>
    %274 = arith.mulf %272, %273 : vector<3x8x8xf32>
    %cst_155 = arith.constant dense<0xFF800000> : vector<3x8xf32>
    %275 = vector.multi_reduction <maximumf>, %274, %cst_155 [2] : vector<3x8x8xf32> to vector<3x8xf32>
    %276 = vector.shape_cast %275 : vector<3x8xf32> to vector<3x8x1xf32>
    %277 = vector.broadcast %276 : vector<3x8x1xf32> to vector<3x8x8xf32>
    %278 = arith.subf %274, %277 : vector<3x8x8xf32>
    %279 = math.exp %278 : vector<3x8x8xf32>
    %cst_156 = arith.constant dense<0.000000e+00> : vector<3x8xf32>
    %280 = vector.multi_reduction <add>, %279, %cst_156 [2] : vector<3x8x8xf32> to vector<3x8xf32>
    %281 = vector.shape_cast %280 : vector<3x8xf32> to vector<3x8x1xf32>
    %282 = tpu.reciprocal %281 {approx = true} : vector<3x8x1xf32> -> vector<3x8x1xf32>
    %283 = vector.broadcast %282 : vector<3x8x1xf32> to vector<3x8x8xf32>
    %284 = arith.mulf %279, %283 : vector<3x8x8xf32>
    %285 = arith.truncf %284 : vector<3x8x8xf32> to vector<3x8x8xbf16>
    %286 = arith.truncf %269 : vector<3x8x16xf32> to vector<3x8x16xbf16>
    "tpu.trace_start"() <{level = 10 : i32, message = "est,etk->esk"}> : () -> ()
    %cst_157 = arith.constant dense<0.000000e+00> : vector<3x8x16xf32>
    %287 = tpu.matmul %285, %286, %cst_157 {dimension_numbers = #tpu.dot_dimension_numbers<[2], [1], [1], [2], [0, 0, 0, 1, 1, 2], [0], [0]>} : vector<3x8x8xbf16>, vector<3x8x16xbf16>, vector<3x8x16xf32> -> vector<3x8x16xf32>
    "tpu.trace_stop"() : () -> ()
    %288 = vector.extract_strided_slice %224 {offsets = [0, 0, 144], sizes = [3, 8, 16], strides = [1, 1, 1]} : vector<3x8x192xf32> to vector<3x8x16xf32>
    %289 = vector.extract_strided_slice %224 {offsets = [0, 0, 160], sizes = [3, 8, 16], strides = [1, 1, 1]} : vector<3x8x192xf32> to vector<3x8x16xf32>
    %290 = vector.extract_strided_slice %224 {offsets = [0, 0, 176], sizes = [3, 8, 16], strides = [1, 1, 1]} : vector<3x8x192xf32> to vector<3x8x16xf32>
    %291 = arith.truncf %288 : vector<3x8x16xf32> to vector<3x8x16xbf16>
    %292 = arith.truncf %289 : vector<3x8x16xf32> to vector<3x8x16xbf16>
    "tpu.trace_start"() <{level = 10 : i32, message = "esk,etk->est"}> : () -> ()
    %cst_158 = arith.constant dense<0.000000e+00> : vector<3x8x8xf32>
    %293 = tpu.matmul %291, %292, %cst_158 {dimension_numbers = #tpu.dot_dimension_numbers<[2], [2], [1], [1], [0, 0, 0, 1, 1, 1], [0], [0]>} : vector<3x8x16xbf16>, vector<3x8x16xbf16>, vector<3x8x8xf32> -> vector<3x8x8xf32>
    "tpu.trace_stop"() : () -> ()
    %cst_159 = arith.constant 2.500000e-01 : f32
    %294 = vector.broadcast %cst_159 : f32 to vector<3x8x8xf32>
    %295 = arith.mulf %293, %294 : vector<3x8x8xf32>
    %cst_160 = arith.constant dense<0xFF800000> : vector<3x8xf32>
    %296 = vector.multi_reduction <maximumf>, %295, %cst_160 [2] : vector<3x8x8xf32> to vector<3x8xf32>
    %297 = vector.shape_cast %296 : vector<3x8xf32> to vector<3x8x1xf32>
    %298 = vector.broadcast %297 : vector<3x8x1xf32> to vector<3x8x8xf32>
    %299 = arith.subf %295, %298 : vector<3x8x8xf32>
    %300 = math.exp %299 : vector<3x8x8xf32>
    %cst_161 = arith.constant dense<0.000000e+00> : vector<3x8xf32>
    %301 = vector.multi_reduction <add>, %300, %cst_161 [2] : vector<3x8x8xf32> to vector<3x8xf32>
    %302 = vector.shape_cast %301 : vector<3x8xf32> to vector<3x8x1xf32>
    %303 = tpu.reciprocal %302 {approx = true} : vector<3x8x1xf32> -> vector<3x8x1xf32>
    %304 = vector.broadcast %303 : vector<3x8x1xf32> to vector<3x8x8xf32>
    %305 = arith.mulf %300, %304 : vector<3x8x8xf32>
    %306 = arith.truncf %305 : vector<3x8x8xf32> to vector<3x8x8xbf16>
    %307 = arith.truncf %290 : vector<3x8x16xf32> to vector<3x8x16xbf16>
    "tpu.trace_start"() <{level = 10 : i32, message = "est,etk->esk"}> : () -> ()
    %cst_162 = arith.constant dense<0.000000e+00> : vector<3x8x16xf32>
    %308 = tpu.matmul %306, %307, %cst_162 {dimension_numbers = #tpu.dot_dimension_numbers<[2], [1], [1], [2], [0, 0, 0, 1, 1, 2], [0], [0]>} : vector<3x8x8xbf16>, vector<3x8x16xbf16>, vector<3x8x16xf32> -> vector<3x8x16xf32>
    "tpu.trace_stop"() : () -> ()
    %309 = tpu.concatenate %245, %266, %287, %308 in 2 : vector<3x8x16xf32>, vector<3x8x16xf32>, vector<3x8x16xf32>, vector<3x8x16xf32> -> vector<3x8x64xf32>
    %310 = arith.truncf %309 : vector<3x8x64xf32> to vector<3x8x64xbf16>
    "tpu.trace_start"() <{level = 10 : i32, message = "esk,ekd->esd"}> : () -> ()
    %cst_163 = arith.constant dense<0.000000e+00> : vector<3x8x64xf32>
    %311 = tpu.matmul %310, %202, %cst_163 {dimension_numbers = #tpu.dot_dimension_numbers<[2], [1], [1], [2], [0, 0, 0, 1, 1, 2], [0], [0]>} : vector<3x8x64xbf16>, vector<3x64x64xbf16>, vector<3x8x64xf32> -> vector<3x8x64xf32>
    "tpu.trace_stop"() : () -> ()
    %312 = vector.broadcast %204 : vector<3x1x64xf32> to vector<3x8x64xf32>
    %313 = arith.addf %311, %312 : vector<3x8x64xf32>
    %314 = arith.addf %196, %313 : vector<3x8x64xf32>
    %cst_164 = arith.constant dense<0.000000e+00> : vector<3x8xf32>
    %315 = vector.multi_reduction <add>, %314, %cst_164 [2] : vector<3x8x64xf32> to vector<3x8xf32>
    %316 = vector.shape_cast %315 : vector<3x8xf32> to vector<3x8x1xf32>
    %cst_165 = arith.constant 6.400000e+01 : f32
    %317 = vector.broadcast %cst_165 : f32 to vector<3x8x1xf32>
    %318 = arith.divf %316, %317 : vector<3x8x1xf32>
    %319 = arith.mulf %314, %314 : vector<3x8x64xf32>
    %cst_166 = arith.constant dense<0.000000e+00> : vector<3x8xf32>
    %320 = vector.multi_reduction <add>, %319, %cst_166 [2] : vector<3x8x64xf32> to vector<3x8xf32>
    %321 = vector.shape_cast %320 : vector<3x8xf32> to vector<3x8x1xf32>
    %cst_167 = arith.constant 6.400000e+01 : f32
    %322 = vector.broadcast %cst_167 : f32 to vector<3x8x1xf32>
    %323 = arith.divf %321, %322 : vector<3x8x1xf32>
    %324 = arith.mulf %318, %318 : vector<3x8x1xf32>
    %325 = arith.subf %323, %324 : vector<3x8x1xf32>
    %326 = vector.broadcast %318 : vector<3x8x1xf32> to vector<3x8x64xf32>
    %327 = arith.subf %314, %326 : vector<3x8x64xf32>
    %cst_168 = arith.constant 9.99999974E-6 : f32
    %328 = vector.broadcast %cst_168 : f32 to vector<3x8x1xf32>
    %329 = arith.addf %325, %328 : vector<3x8x1xf32>
    %330 = math.rsqrt %329 : vector<3x8x1xf32>
    %331 = vector.broadcast %330 : vector<3x8x1xf32> to vector<3x8x64xf32>
    %332 = arith.mulf %327, %331 : vector<3x8x64xf32>
    %333 = vector.broadcast %206 : vector<3x1x64xf32> to vector<3x8x64xf32>
    %334 = arith.mulf %332, %333 : vector<3x8x64xf32>
    %335 = vector.broadcast %208 : vector<3x1x64xf32> to vector<3x8x64xf32>
    %336 = arith.addf %334, %335 : vector<3x8x64xf32>
    %337 = arith.truncf %336 : vector<3x8x64xf32> to vector<3x8x64xbf16>
    "tpu.trace_start"() <{level = 10 : i32, message = "esd,edf->esf"}> : () -> ()
    %cst_169 = arith.constant dense<0.000000e+00> : vector<3x8x128xf32>
    %338 = tpu.matmul %337, %214, %cst_169 {dimension_numbers = #tpu.dot_dimension_numbers<[2], [1], [1], [2], [0, 0, 0, 1, 1, 2], [0], [0]>} : vector<3x8x64xbf16>, vector<3x64x128xbf16>, vector<3x8x128xf32> -> vector<3x8x128xf32>
    "tpu.trace_stop"() : () -> ()
    %339 = vector.broadcast %216 : vector<3x1x128xf32> to vector<3x8x128xf32>
    %340 = arith.addf %338, %339 : vector<3x8x128xf32>
    %cst_170 = arith.constant 0.000000e+00 : f32
    %341 = vector.broadcast %cst_170 : f32 to vector<3x8x128xf32>
    %342 = arith.maximumf %340, %341 : vector<3x8x128xf32>
    %343 = arith.truncf %342 : vector<3x8x128xf32> to vector<3x8x128xbf16>
    "tpu.trace_start"() <{level = 10 : i32, message = "esf,efd->esd"}> : () -> ()
    %cst_171 = arith.constant dense<0.000000e+00> : vector<3x8x64xf32>
    %344 = tpu.matmul %343, %218, %cst_171 {dimension_numbers = #tpu.dot_dimension_numbers<[2], [1], [1], [2], [0, 0, 0, 1, 1, 2], [0], [0]>} : vector<3x8x128xbf16>, vector<3x128x64xbf16>, vector<3x8x64xf32> -> vector<3x8x64xf32>
    "tpu.trace_stop"() : () -> ()
    %345 = vector.broadcast %220 : vector<3x1x64xf32> to vector<3x8x64xf32>
    %346 = arith.addf %344, %345 : vector<3x8x64xf32>
    %347 = arith.addf %336, %346 : vector<3x8x64xf32>
    %cst_172 = arith.constant dense<0.000000e+00> : vector<3x8xf32>
    %348 = vector.multi_reduction <add>, %347, %cst_172 [2] : vector<3x8x64xf32> to vector<3x8xf32>
    %349 = vector.shape_cast %348 : vector<3x8xf32> to vector<3x8x1xf32>
    %cst_173 = arith.constant 6.400000e+01 : f32
    %350 = vector.broadcast %cst_173 : f32 to vector<3x8x1xf32>
    %351 = arith.divf %349, %350 : vector<3x8x1xf32>
    %352 = arith.mulf %347, %347 : vector<3x8x64xf32>
    %cst_174 = arith.constant dense<0.000000e+00> : vector<3x8xf32>
    %353 = vector.multi_reduction <add>, %352, %cst_174 [2] : vector<3x8x64xf32> to vector<3x8xf32>
    %354 = vector.shape_cast %353 : vector<3x8xf32> to vector<3x8x1xf32>
    %cst_175 = arith.constant 6.400000e+01 : f32
    %355 = vector.broadcast %cst_175 : f32 to vector<3x8x1xf32>
    %356 = arith.divf %354, %355 : vector<3x8x1xf32>
    %357 = arith.mulf %351, %351 : vector<3x8x1xf32>
    %358 = arith.subf %356, %357 : vector<3x8x1xf32>
    %359 = vector.broadcast %351 : vector<3x8x1xf32> to vector<3x8x64xf32>
    %360 = arith.subf %347, %359 : vector<3x8x64xf32>
    %cst_176 = arith.constant 9.99999974E-6 : f32
    %361 = vector.broadcast %cst_176 : f32 to vector<3x8x1xf32>
    %362 = arith.addf %358, %361 : vector<3x8x1xf32>
    %363 = math.rsqrt %362 : vector<3x8x1xf32>
    %364 = vector.broadcast %363 : vector<3x8x1xf32> to vector<3x8x64xf32>
    %365 = arith.mulf %360, %364 : vector<3x8x64xf32>
    %366 = vector.broadcast %210 : vector<3x1x64xf32> to vector<3x8x64xf32>
    %367 = arith.mulf %365, %366 : vector<3x8x64xf32>
    %368 = vector.broadcast %212 : vector<3x1x64xf32> to vector<3x8x64xf32>
    %369 = arith.addf %367, %368 : vector<3x8x64xf32>
    %c2 = arith.constant 2 : index
    %c0_177 = arith.constant 0 : index
    %c0_178 = arith.constant 0 : index
    %c0_179 = arith.constant 0 : index
    %370 = vector.load %arg5[%c2, %c0_177, %c0_178, %c0_179] : memref<3x3x64x192xbf16, #tpu.memory_space<vmem>>, vector<1x3x64x192xbf16>
    %371 = vector.shape_cast %370 : vector<1x3x64x192xbf16> to vector<3x64x192xbf16>
    %c2_180 = arith.constant 2 : index
    %c0_181 = arith.constant 0 : index
    %c0_182 = arith.constant 0 : index
    %c0_183 = arith.constant 0 : index
    %372 = vector.load %arg6[%c2_180, %c0_181, %c0_182, %c0_183] : memref<3x3x1x192xf32, #tpu.memory_space<vmem>>, vector<1x3x1x192xf32>
    %373 = vector.shape_cast %372 : vector<1x3x1x192xf32> to vector<3x1x192xf32>
    %c2_184 = arith.constant 2 : index
    %c0_185 = arith.constant 0 : index
    %c0_186 = arith.constant 0 : index
    %c0_187 = arith.constant 0 : index
    %374 = vector.load %arg7[%c2_184, %c0_185, %c0_186, %c0_187] : memref<3x3x64x64xbf16, #tpu.memory_space<vmem>>, vector<1x3x64x64xbf16>
    %375 = vector.shape_cast %374 : vector<1x3x64x64xbf16> to vector<3x64x64xbf16>
    %c2_188 = arith.constant 2 : index
    %c0_189 = arith.constant 0 : index
    %c0_190 = arith.constant 0 : index
    %c0_191 = arith.constant 0 : index
    %376 = vector.load %arg8[%c2_188, %c0_189, %c0_190, %c0_191] : memref<3x3x1x64xf32, #tpu.memory_space<vmem>>, vector<1x3x1x64xf32>
    %377 = vector.shape_cast %376 : vector<1x3x1x64xf32> to vector<3x1x64xf32>
    %c2_192 = arith.constant 2 : index
    %c0_193 = arith.constant 0 : index
    %c0_194 = arith.constant 0 : index
    %c0_195 = arith.constant 0 : index
    %378 = vector.load %arg9[%c2_192, %c0_193, %c0_194, %c0_195] : memref<3x3x1x64xf32, #tpu.memory_space<vmem>>, vector<1x3x1x64xf32>
    %379 = vector.shape_cast %378 : vector<1x3x1x64xf32> to vector<3x1x64xf32>
    %c2_196 = arith.constant 2 : index
    %c0_197 = arith.constant 0 : index
    %c0_198 = arith.constant 0 : index
    %c0_199 = arith.constant 0 : index
    %380 = vector.load %arg10[%c2_196, %c0_197, %c0_198, %c0_199] : memref<3x3x1x64xf32, #tpu.memory_space<vmem>>, vector<1x3x1x64xf32>
    %381 = vector.shape_cast %380 : vector<1x3x1x64xf32> to vector<3x1x64xf32>
    %c2_200 = arith.constant 2 : index
    %c0_201 = arith.constant 0 : index
    %c0_202 = arith.constant 0 : index
    %c0_203 = arith.constant 0 : index
    %382 = vector.load %arg11[%c2_200, %c0_201, %c0_202, %c0_203] : memref<3x3x1x64xf32, #tpu.memory_space<vmem>>, vector<1x3x1x64xf32>
    %383 = vector.shape_cast %382 : vector<1x3x1x64xf32> to vector<3x1x64xf32>
    %c2_204 = arith.constant 2 : index
    %c0_205 = arith.constant 0 : index
    %c0_206 = arith.constant 0 : index
    %c0_207 = arith.constant 0 : index
    %384 = vector.load %arg12[%c2_204, %c0_205, %c0_206, %c0_207] : memref<3x3x1x64xf32, #tpu.memory_space<vmem>>, vector<1x3x1x64xf32>
    %385 = vector.shape_cast %384 : vector<1x3x1x64xf32> to vector<3x1x64xf32>
    %c2_208 = arith.constant 2 : index
    %c0_209 = arith.constant 0 : index
    %c0_210 = arith.constant 0 : index
    %c0_211 = arith.constant 0 : index
    %386 = vector.load %arg13[%c2_208, %c0_209, %c0_210, %c0_211] : memref<3x3x64x128xbf16, #tpu.memory_space<vmem>>, vector<1x3x64x128xbf16>
    %387 = vector.shape_cast %386 : vector<1x3x64x128xbf16> to vector<3x64x128xbf16>
    %c2_212 = arith.constant 2 : index
    %c0_213 = arith.constant 0 : index
    %c0_214 = arith.constant 0 : index
    %c0_215 = arith.constant 0 : index
    %388 = vector.load %arg14[%c2_212, %c0_213, %c0_214, %c0_215] : memref<3x3x1x128xf32, #tpu.memory_space<vmem>>, vector<1x3x1x128xf32>
    %389 = vector.shape_cast %388 : vector<1x3x1x128xf32> to vector<3x1x128xf32>
    %c2_216 = arith.constant 2 : index
    %c0_217 = arith.constant 0 : index
    %c0_218 = arith.constant 0 : index
    %c0_219 = arith.constant 0 : index
    %390 = vector.load %arg15[%c2_216, %c0_217, %c0_218, %c0_219] : memref<3x3x128x64xbf16, #tpu.memory_space<vmem>>, vector<1x3x128x64xbf16>
    %391 = vector.shape_cast %390 : vector<1x3x128x64xbf16> to vector<3x128x64xbf16>
    %c2_220 = arith.constant 2 : index
    %c0_221 = arith.constant 0 : index
    %c0_222 = arith.constant 0 : index
    %c0_223 = arith.constant 0 : index
    %392 = vector.load %arg16[%c2_220, %c0_221, %c0_222, %c0_223] : memref<3x3x1x64xf32, #tpu.memory_space<vmem>>, vector<1x3x1x64xf32>
    %393 = vector.shape_cast %392 : vector<1x3x1x64xf32> to vector<3x1x64xf32>
    %394 = arith.truncf %369 : vector<3x8x64xf32> to vector<3x8x64xbf16>
    "tpu.trace_start"() <{level = 10 : i32, message = "esd,edk->esk"}> : () -> ()
    %cst_224 = arith.constant dense<0.000000e+00> : vector<3x8x192xf32>
    %395 = tpu.matmul %394, %371, %cst_224 {dimension_numbers = #tpu.dot_dimension_numbers<[2], [1], [1], [2], [0, 0, 0, 1, 1, 2], [0], [0]>} : vector<3x8x64xbf16>, vector<3x64x192xbf16>, vector<3x8x192xf32> -> vector<3x8x192xf32>
    "tpu.trace_stop"() : () -> ()
    %396 = vector.broadcast %373 : vector<3x1x192xf32> to vector<3x8x192xf32>
    %397 = arith.addf %395, %396 : vector<3x8x192xf32>
    %398 = vector.extract_strided_slice %397 {offsets = [0, 0, 0], sizes = [3, 8, 16], strides = [1, 1, 1]} : vector<3x8x192xf32> to vector<3x8x16xf32>
    %399 = vector.extract_strided_slice %397 {offsets = [0, 0, 16], sizes = [3, 8, 16], strides = [1, 1, 1]} : vector<3x8x192xf32> to vector<3x8x16xf32>
    %400 = vector.extract_strided_slice %397 {offsets = [0, 0, 32], sizes = [3, 8, 16], strides = [1, 1, 1]} : vector<3x8x192xf32> to vector<3x8x16xf32>
    %401 = arith.truncf %398 : vector<3x8x16xf32> to vector<3x8x16xbf16>
    %402 = arith.truncf %399 : vector<3x8x16xf32> to vector<3x8x16xbf16>
    "tpu.trace_start"() <{level = 10 : i32, message = "esk,etk->est"}> : () -> ()
    %cst_225 = arith.constant dense<0.000000e+00> : vector<3x8x8xf32>
    %403 = tpu.matmul %401, %402, %cst_225 {dimension_numbers = #tpu.dot_dimension_numbers<[2], [2], [1], [1], [0, 0, 0, 1, 1, 1], [0], [0]>} : vector<3x8x16xbf16>, vector<3x8x16xbf16>, vector<3x8x8xf32> -> vector<3x8x8xf32>
    "tpu.trace_stop"() : () -> ()
    %cst_226 = arith.constant 2.500000e-01 : f32
    %404 = vector.broadcast %cst_226 : f32 to vector<3x8x8xf32>
    %405 = arith.mulf %403, %404 : vector<3x8x8xf32>
    %cst_227 = arith.constant dense<0xFF800000> : vector<3x8xf32>
    %406 = vector.multi_reduction <maximumf>, %405, %cst_227 [2] : vector<3x8x8xf32> to vector<3x8xf32>
    %407 = vector.shape_cast %406 : vector<3x8xf32> to vector<3x8x1xf32>
    %408 = vector.broadcast %407 : vector<3x8x1xf32> to vector<3x8x8xf32>
    %409 = arith.subf %405, %408 : vector<3x8x8xf32>
    %410 = math.exp %409 : vector<3x8x8xf32>
    %cst_228 = arith.constant dense<0.000000e+00> : vector<3x8xf32>
    %411 = vector.multi_reduction <add>, %410, %cst_228 [2] : vector<3x8x8xf32> to vector<3x8xf32>
    %412 = vector.shape_cast %411 : vector<3x8xf32> to vector<3x8x1xf32>
    %413 = tpu.reciprocal %412 {approx = true} : vector<3x8x1xf32> -> vector<3x8x1xf32>
    %414 = vector.broadcast %413 : vector<3x8x1xf32> to vector<3x8x8xf32>
    %415 = arith.mulf %410, %414 : vector<3x8x8xf32>
    %416 = arith.truncf %415 : vector<3x8x8xf32> to vector<3x8x8xbf16>
    %417 = arith.truncf %400 : vector<3x8x16xf32> to vector<3x8x16xbf16>
    "tpu.trace_start"() <{level = 10 : i32, message = "est,etk->esk"}> : () -> ()
    %cst_229 = arith.constant dense<0.000000e+00> : vector<3x8x16xf32>
    %418 = tpu.matmul %416, %417, %cst_229 {dimension_numbers = #tpu.dot_dimension_numbers<[2], [1], [1], [2], [0, 0, 0, 1, 1, 2], [0], [0]>} : vector<3x8x8xbf16>, vector<3x8x16xbf16>, vector<3x8x16xf32> -> vector<3x8x16xf32>
    "tpu.trace_stop"() : () -> ()
    %419 = vector.extract_strided_slice %397 {offsets = [0, 0, 48], sizes = [3, 8, 16], strides = [1, 1, 1]} : vector<3x8x192xf32> to vector<3x8x16xf32>
    %420 = vector.extract_strided_slice %397 {offsets = [0, 0, 64], sizes = [3, 8, 16], strides = [1, 1, 1]} : vector<3x8x192xf32> to vector<3x8x16xf32>
    %421 = vector.extract_strided_slice %397 {offsets = [0, 0, 80], sizes = [3, 8, 16], strides = [1, 1, 1]} : vector<3x8x192xf32> to vector<3x8x16xf32>
    %422 = arith.truncf %419 : vector<3x8x16xf32> to vector<3x8x16xbf16>
    %423 = arith.truncf %420 : vector<3x8x16xf32> to vector<3x8x16xbf16>
    "tpu.trace_start"() <{level = 10 : i32, message = "esk,etk->est"}> : () -> ()
    %cst_230 = arith.constant dense<0.000000e+00> : vector<3x8x8xf32>
    %424 = tpu.matmul %422, %423, %cst_230 {dimension_numbers = #tpu.dot_dimension_numbers<[2], [2], [1], [1], [0, 0, 0, 1, 1, 1], [0], [0]>} : vector<3x8x16xbf16>, vector<3x8x16xbf16>, vector<3x8x8xf32> -> vector<3x8x8xf32>
    "tpu.trace_stop"() : () -> ()
    %cst_231 = arith.constant 2.500000e-01 : f32
    %425 = vector.broadcast %cst_231 : f32 to vector<3x8x8xf32>
    %426 = arith.mulf %424, %425 : vector<3x8x8xf32>
    %cst_232 = arith.constant dense<0xFF800000> : vector<3x8xf32>
    %427 = vector.multi_reduction <maximumf>, %426, %cst_232 [2] : vector<3x8x8xf32> to vector<3x8xf32>
    %428 = vector.shape_cast %427 : vector<3x8xf32> to vector<3x8x1xf32>
    %429 = vector.broadcast %428 : vector<3x8x1xf32> to vector<3x8x8xf32>
    %430 = arith.subf %426, %429 : vector<3x8x8xf32>
    %431 = math.exp %430 : vector<3x8x8xf32>
    %cst_233 = arith.constant dense<0.000000e+00> : vector<3x8xf32>
    %432 = vector.multi_reduction <add>, %431, %cst_233 [2] : vector<3x8x8xf32> to vector<3x8xf32>
    %433 = vector.shape_cast %432 : vector<3x8xf32> to vector<3x8x1xf32>
    %434 = tpu.reciprocal %433 {approx = true} : vector<3x8x1xf32> -> vector<3x8x1xf32>
    %435 = vector.broadcast %434 : vector<3x8x1xf32> to vector<3x8x8xf32>
    %436 = arith.mulf %431, %435 : vector<3x8x8xf32>
    %437 = arith.truncf %436 : vector<3x8x8xf32> to vector<3x8x8xbf16>
    %438 = arith.truncf %421 : vector<3x8x16xf32> to vector<3x8x16xbf16>
    "tpu.trace_start"() <{level = 10 : i32, message = "est,etk->esk"}> : () -> ()
    %cst_234 = arith.constant dense<0.000000e+00> : vector<3x8x16xf32>
    %439 = tpu.matmul %437, %438, %cst_234 {dimension_numbers = #tpu.dot_dimension_numbers<[2], [1], [1], [2], [0, 0, 0, 1, 1, 2], [0], [0]>} : vector<3x8x8xbf16>, vector<3x8x16xbf16>, vector<3x8x16xf32> -> vector<3x8x16xf32>
    "tpu.trace_stop"() : () -> ()
    %440 = vector.extract_strided_slice %397 {offsets = [0, 0, 96], sizes = [3, 8, 16], strides = [1, 1, 1]} : vector<3x8x192xf32> to vector<3x8x16xf32>
    %441 = vector.extract_strided_slice %397 {offsets = [0, 0, 112], sizes = [3, 8, 16], strides = [1, 1, 1]} : vector<3x8x192xf32> to vector<3x8x16xf32>
    %442 = vector.extract_strided_slice %397 {offsets = [0, 0, 128], sizes = [3, 8, 16], strides = [1, 1, 1]} : vector<3x8x192xf32> to vector<3x8x16xf32>
    %443 = arith.truncf %440 : vector<3x8x16xf32> to vector<3x8x16xbf16>
    %444 = arith.truncf %441 : vector<3x8x16xf32> to vector<3x8x16xbf16>
    "tpu.trace_start"() <{level = 10 : i32, message = "esk,etk->est"}> : () -> ()
    %cst_235 = arith.constant dense<0.000000e+00> : vector<3x8x8xf32>
    %445 = tpu.matmul %443, %444, %cst_235 {dimension_numbers = #tpu.dot_dimension_numbers<[2], [2], [1], [1], [0, 0, 0, 1, 1, 1], [0], [0]>} : vector<3x8x16xbf16>, vector<3x8x16xbf16>, vector<3x8x8xf32> -> vector<3x8x8xf32>
    "tpu.trace_stop"() : () -> ()
    %cst_236 = arith.constant 2.500000e-01 : f32
    %446 = vector.broadcast %cst_236 : f32 to vector<3x8x8xf32>
    %447 = arith.mulf %445, %446 : vector<3x8x8xf32>
    %cst_237 = arith.constant dense<0xFF800000> : vector<3x8xf32>
    %448 = vector.multi_reduction <maximumf>, %447, %cst_237 [2] : vector<3x8x8xf32> to vector<3x8xf32>
    %449 = vector.shape_cast %448 : vector<3x8xf32> to vector<3x8x1xf32>
    %450 = vector.broadcast %449 : vector<3x8x1xf32> to vector<3x8x8xf32>
    %451 = arith.subf %447, %450 : vector<3x8x8xf32>
    %452 = math.exp %451 : vector<3x8x8xf32>
    %cst_238 = arith.constant dense<0.000000e+00> : vector<3x8xf32>
    %453 = vector.multi_reduction <add>, %452, %cst_238 [2] : vector<3x8x8xf32> to vector<3x8xf32>
    %454 = vector.shape_cast %453 : vector<3x8xf32> to vector<3x8x1xf32>
    %455 = tpu.reciprocal %454 {approx = true} : vector<3x8x1xf32> -> vector<3x8x1xf32>
    %456 = vector.broadcast %455 : vector<3x8x1xf32> to vector<3x8x8xf32>
    %457 = arith.mulf %452, %456 : vector<3x8x8xf32>
    %458 = arith.truncf %457 : vector<3x8x8xf32> to vector<3x8x8xbf16>
    %459 = arith.truncf %442 : vector<3x8x16xf32> to vector<3x8x16xbf16>
    "tpu.trace_start"() <{level = 10 : i32, message = "est,etk->esk"}> : () -> ()
    %cst_239 = arith.constant dense<0.000000e+00> : vector<3x8x16xf32>
    %460 = tpu.matmul %458, %459, %cst_239 {dimension_numbers = #tpu.dot_dimension_numbers<[2], [1], [1], [2], [0, 0, 0, 1, 1, 2], [0], [0]>} : vector<3x8x8xbf16>, vector<3x8x16xbf16>, vector<3x8x16xf32> -> vector<3x8x16xf32>
    "tpu.trace_stop"() : () -> ()
    %461 = vector.extract_strided_slice %397 {offsets = [0, 0, 144], sizes = [3, 8, 16], strides = [1, 1, 1]} : vector<3x8x192xf32> to vector<3x8x16xf32>
    %462 = vector.extract_strided_slice %397 {offsets = [0, 0, 160], sizes = [3, 8, 16], strides = [1, 1, 1]} : vector<3x8x192xf32> to vector<3x8x16xf32>
    %463 = vector.extract_strided_slice %397 {offsets = [0, 0, 176], sizes = [3, 8, 16], strides = [1, 1, 1]} : vector<3x8x192xf32> to vector<3x8x16xf32>
    %464 = arith.truncf %461 : vector<3x8x16xf32> to vector<3x8x16xbf16>
    %465 = arith.truncf %462 : vector<3x8x16xf32> to vector<3x8x16xbf16>
    "tpu.trace_start"() <{level = 10 : i32, message = "esk,etk->est"}> : () -> ()
    %cst_240 = arith.constant dense<0.000000e+00> : vector<3x8x8xf32>
    %466 = tpu.matmul %464, %465, %cst_240 {dimension_numbers = #tpu.dot_dimension_numbers<[2], [2], [1], [1], [0, 0, 0, 1, 1, 1], [0], [0]>} : vector<3x8x16xbf16>, vector<3x8x16xbf16>, vector<3x8x8xf32> -> vector<3x8x8xf32>
    "tpu.trace_stop"() : () -> ()
    %cst_241 = arith.constant 2.500000e-01 : f32
    %467 = vector.broadcast %cst_241 : f32 to vector<3x8x8xf32>
    %468 = arith.mulf %466, %467 : vector<3x8x8xf32>
    %cst_242 = arith.constant dense<0xFF800000> : vector<3x8xf32>
    %469 = vector.multi_reduction <maximumf>, %468, %cst_242 [2] : vector<3x8x8xf32> to vector<3x8xf32>
    %470 = vector.shape_cast %469 : vector<3x8xf32> to vector<3x8x1xf32>
    %471 = vector.broadcast %470 : vector<3x8x1xf32> to vector<3x8x8xf32>
    %472 = arith.subf %468, %471 : vector<3x8x8xf32>
    %473 = math.exp %472 : vector<3x8x8xf32>
    %cst_243 = arith.constant dense<0.000000e+00> : vector<3x8xf32>
    %474 = vector.multi_reduction <add>, %473, %cst_243 [2] : vector<3x8x8xf32> to vector<3x8xf32>
    %475 = vector.shape_cast %474 : vector<3x8xf32> to vector<3x8x1xf32>
    %476 = tpu.reciprocal %475 {approx = true} : vector<3x8x1xf32> -> vector<3x8x1xf32>
    %477 = vector.broadcast %476 : vector<3x8x1xf32> to vector<3x8x8xf32>
    %478 = arith.mulf %473, %477 : vector<3x8x8xf32>
    %479 = arith.truncf %478 : vector<3x8x8xf32> to vector<3x8x8xbf16>
    %480 = arith.truncf %463 : vector<3x8x16xf32> to vector<3x8x16xbf16>
    "tpu.trace_start"() <{level = 10 : i32, message = "est,etk->esk"}> : () -> ()
    %cst_244 = arith.constant dense<0.000000e+00> : vector<3x8x16xf32>
    %481 = tpu.matmul %479, %480, %cst_244 {dimension_numbers = #tpu.dot_dimension_numbers<[2], [1], [1], [2], [0, 0, 0, 1, 1, 2], [0], [0]>} : vector<3x8x8xbf16>, vector<3x8x16xbf16>, vector<3x8x16xf32> -> vector<3x8x16xf32>
    "tpu.trace_stop"() : () -> ()
    %482 = tpu.concatenate %418, %439, %460, %481 in 2 : vector<3x8x16xf32>, vector<3x8x16xf32>, vector<3x8x16xf32>, vector<3x8x16xf32> -> vector<3x8x64xf32>
    %483 = arith.truncf %482 : vector<3x8x64xf32> to vector<3x8x64xbf16>
    "tpu.trace_start"() <{level = 10 : i32, message = "esk,ekd->esd"}> : () -> ()
    %cst_245 = arith.constant dense<0.000000e+00> : vector<3x8x64xf32>
    %484 = tpu.matmul %483, %375, %cst_245 {dimension_numbers = #tpu.dot_dimension_numbers<[2], [1], [1], [2], [0, 0, 0, 1, 1, 2], [0], [0]>} : vector<3x8x64xbf16>, vector<3x64x64xbf16>, vector<3x8x64xf32> -> vector<3x8x64xf32>
    "tpu.trace_stop"() : () -> ()
    %485 = vector.broadcast %377 : vector<3x1x64xf32> to vector<3x8x64xf32>
    %486 = arith.addf %484, %485 : vector<3x8x64xf32>
    %487 = arith.addf %369, %486 : vector<3x8x64xf32>
    %cst_246 = arith.constant dense<0.000000e+00> : vector<3x8xf32>
    %488 = vector.multi_reduction <add>, %487, %cst_246 [2] : vector<3x8x64xf32> to vector<3x8xf32>
    %489 = vector.shape_cast %488 : vector<3x8xf32> to vector<3x8x1xf32>
    %cst_247 = arith.constant 6.400000e+01 : f32
    %490 = vector.broadcast %cst_247 : f32 to vector<3x8x1xf32>
    %491 = arith.divf %489, %490 : vector<3x8x1xf32>
    %492 = arith.mulf %487, %487 : vector<3x8x64xf32>
    %cst_248 = arith.constant dense<0.000000e+00> : vector<3x8xf32>
    %493 = vector.multi_reduction <add>, %492, %cst_248 [2] : vector<3x8x64xf32> to vector<3x8xf32>
    %494 = vector.shape_cast %493 : vector<3x8xf32> to vector<3x8x1xf32>
    %cst_249 = arith.constant 6.400000e+01 : f32
    %495 = vector.broadcast %cst_249 : f32 to vector<3x8x1xf32>
    %496 = arith.divf %494, %495 : vector<3x8x1xf32>
    %497 = arith.mulf %491, %491 : vector<3x8x1xf32>
    %498 = arith.subf %496, %497 : vector<3x8x1xf32>
    %499 = vector.broadcast %491 : vector<3x8x1xf32> to vector<3x8x64xf32>
    %500 = arith.subf %487, %499 : vector<3x8x64xf32>
    %cst_250 = arith.constant 9.99999974E-6 : f32
    %501 = vector.broadcast %cst_250 : f32 to vector<3x8x1xf32>
    %502 = arith.addf %498, %501 : vector<3x8x1xf32>
    %503 = math.rsqrt %502 : vector<3x8x1xf32>
    %504 = vector.broadcast %503 : vector<3x8x1xf32> to vector<3x8x64xf32>
    %505 = arith.mulf %500, %504 : vector<3x8x64xf32>
    %506 = vector.broadcast %379 : vector<3x1x64xf32> to vector<3x8x64xf32>
    %507 = arith.mulf %505, %506 : vector<3x8x64xf32>
    %508 = vector.broadcast %381 : vector<3x1x64xf32> to vector<3x8x64xf32>
    %509 = arith.addf %507, %508 : vector<3x8x64xf32>
    %510 = arith.truncf %509 : vector<3x8x64xf32> to vector<3x8x64xbf16>
    "tpu.trace_start"() <{level = 10 : i32, message = "esd,edf->esf"}> : () -> ()
    %cst_251 = arith.constant dense<0.000000e+00> : vector<3x8x128xf32>
    %511 = tpu.matmul %510, %387, %cst_251 {dimension_numbers = #tpu.dot_dimension_numbers<[2], [1], [1], [2], [0, 0, 0, 1, 1, 2], [0], [0]>} : vector<3x8x64xbf16>, vector<3x64x128xbf16>, vector<3x8x128xf32> -> vector<3x8x128xf32>
    "tpu.trace_stop"() : () -> ()
    %512 = vector.broadcast %389 : vector<3x1x128xf32> to vector<3x8x128xf32>
    %513 = arith.addf %511, %512 : vector<3x8x128xf32>
    %cst_252 = arith.constant 0.000000e+00 : f32
    %514 = vector.broadcast %cst_252 : f32 to vector<3x8x128xf32>
    %515 = arith.maximumf %513, %514 : vector<3x8x128xf32>
    %516 = arith.truncf %515 : vector<3x8x128xf32> to vector<3x8x128xbf16>
    "tpu.trace_start"() <{level = 10 : i32, message = "esf,efd->esd"}> : () -> ()
    %cst_253 = arith.constant dense<0.000000e+00> : vector<3x8x64xf32>
    %517 = tpu.matmul %516, %391, %cst_253 {dimension_numbers = #tpu.dot_dimension_numbers<[2], [1], [1], [2], [0, 0, 0, 1, 1, 2], [0], [0]>} : vector<3x8x128xbf16>, vector<3x128x64xbf16>, vector<3x8x64xf32> -> vector<3x8x64xf32>
    "tpu.trace_stop"() : () -> ()
    %518 = vector.broadcast %393 : vector<3x1x64xf32> to vector<3x8x64xf32>
    %519 = arith.addf %517, %518 : vector<3x8x64xf32>
    %520 = arith.addf %509, %519 : vector<3x8x64xf32>
    %cst_254 = arith.constant dense<0.000000e+00> : vector<3x8xf32>
    %521 = vector.multi_reduction <add>, %520, %cst_254 [2] : vector<3x8x64xf32> to vector<3x8xf32>
    %522 = vector.shape_cast %521 : vector<3x8xf32> to vector<3x8x1xf32>
    %cst_255 = arith.constant 6.400000e+01 : f32
    %523 = vector.broadcast %cst_255 : f32 to vector<3x8x1xf32>
    %524 = arith.divf %522, %523 : vector<3x8x1xf32>
    %525 = arith.mulf %520, %520 : vector<3x8x64xf32>
    %cst_256 = arith.constant dense<0.000000e+00> : vector<3x8xf32>
    %526 = vector.multi_reduction <add>, %525, %cst_256 [2] : vector<3x8x64xf32> to vector<3x8xf32>
    %527 = vector.shape_cast %526 : vector<3x8xf32> to vector<3x8x1xf32>
    %cst_257 = arith.constant 6.400000e+01 : f32
    %528 = vector.broadcast %cst_257 : f32 to vector<3x8x1xf32>
    %529 = arith.divf %527, %528 : vector<3x8x1xf32>
    %530 = arith.mulf %524, %524 : vector<3x8x1xf32>
    %531 = arith.subf %529, %530 : vector<3x8x1xf32>
    %532 = vector.broadcast %524 : vector<3x8x1xf32> to vector<3x8x64xf32>
    %533 = arith.subf %520, %532 : vector<3x8x64xf32>
    %cst_258 = arith.constant 9.99999974E-6 : f32
    %534 = vector.broadcast %cst_258 : f32 to vector<3x8x1xf32>
    %535 = arith.addf %531, %534 : vector<3x8x1xf32>
    %536 = math.rsqrt %535 : vector<3x8x1xf32>
    %537 = vector.broadcast %536 : vector<3x8x1xf32> to vector<3x8x64xf32>
    %538 = arith.mulf %533, %537 : vector<3x8x64xf32>
    %539 = vector.broadcast %383 : vector<3x1x64xf32> to vector<3x8x64xf32>
    %540 = arith.mulf %538, %539 : vector<3x8x64xf32>
    %541 = vector.broadcast %385 : vector<3x1x64xf32> to vector<3x8x64xf32>
    %542 = arith.addf %540, %541 : vector<3x8x64xf32>
    %cst_259 = arith.constant 0.000000e+00 : f32
    %543 = vector.broadcast %cst_259 : f32 to vector<8x64xf32>
    %544 = vector.extract_strided_slice %20 {offsets = [0, 0], sizes = [8, 1], strides = [1, 1]} : vector<8x3xf32> to vector<8x1xf32>
    %545 = vector.extract_strided_slice %542 {offsets = [0, 0, 0], sizes = [1, 8, 64], strides = [1, 1, 1]} : vector<3x8x64xf32> to vector<1x8x64xf32>
    %546 = vector.shape_cast %545 : vector<1x8x64xf32> to vector<8x64xf32>
    %547 = vector.broadcast %544 : vector<8x1xf32> to vector<8x64xf32>
    %548 = arith.mulf %547, %546 : vector<8x64xf32>
    %549 = arith.addf %543, %548 : vector<8x64xf32>
    %550 = vector.extract_strided_slice %20 {offsets = [0, 1], sizes = [8, 1], strides = [1, 1]} : vector<8x3xf32> to vector<8x1xf32>
    %551 = vector.extract_strided_slice %542 {offsets = [1, 0, 0], sizes = [1, 8, 64], strides = [1, 1, 1]} : vector<3x8x64xf32> to vector<1x8x64xf32>
    %552 = vector.shape_cast %551 : vector<1x8x64xf32> to vector<8x64xf32>
    %553 = vector.broadcast %550 : vector<8x1xf32> to vector<8x64xf32>
    %554 = arith.mulf %553, %552 : vector<8x64xf32>
    %555 = arith.addf %549, %554 : vector<8x64xf32>
    %556 = vector.extract_strided_slice %20 {offsets = [0, 2], sizes = [8, 1], strides = [1, 1]} : vector<8x3xf32> to vector<8x1xf32>
    %557 = vector.extract_strided_slice %542 {offsets = [2, 0, 0], sizes = [1, 8, 64], strides = [1, 1, 1]} : vector<3x8x64xf32> to vector<1x8x64xf32>
    %558 = vector.shape_cast %557 : vector<1x8x64xf32> to vector<8x64xf32>
    %559 = vector.broadcast %556 : vector<8x1xf32> to vector<8x64xf32>
    %560 = arith.mulf %559, %558 : vector<8x64xf32>
    %561 = arith.addf %555, %560 : vector<8x64xf32>
    %c0_260 = arith.constant 0 : index
    %c0_261 = arith.constant 0 : index
    %562 = vector.load %arg17[%c0_260, %c0_261] : memref<1x64xf32, #tpu.memory_space<vmem>>, vector<1x64xf32>
    %c0_262 = arith.constant 0 : index
    %c0_263 = arith.constant 0 : index
    %563 = vector.load %arg18[%c0_262, %c0_263] : memref<1x64xf32, #tpu.memory_space<vmem>>, vector<1x64xf32>
    %cst_264 = arith.constant dense<0.000000e+00> : vector<8xf32>
    %564 = vector.multi_reduction <add>, %561, %cst_264 [1] : vector<8x64xf32> to vector<8xf32>
    %565 = vector.shape_cast %564 : vector<8xf32> to vector<8x1xf32>
    %cst_265 = arith.constant 6.400000e+01 : f32
    %566 = vector.broadcast %cst_265 : f32 to vector<8x1xf32>
    %567 = arith.divf %565, %566 : vector<8x1xf32>
    %568 = arith.mulf %561, %561 : vector<8x64xf32>
    %cst_266 = arith.constant dense<0.000000e+00> : vector<8xf32>
    %569 = vector.multi_reduction <add>, %568, %cst_266 [1] : vector<8x64xf32> to vector<8xf32>
    %570 = vector.shape_cast %569 : vector<8xf32> to vector<8x1xf32>
    %cst_267 = arith.constant 6.400000e+01 : f32
    %571 = vector.broadcast %cst_267 : f32 to vector<8x1xf32>
    %572 = arith.divf %570, %571 : vector<8x1xf32>
    %573 = arith.mulf %567, %567 : vector<8x1xf32>
    %574 = arith.subf %572, %573 : vector<8x1xf32>
    %575 = vector.broadcast %567 : vector<8x1xf32> to vector<8x64xf32>
    %576 = arith.subf %561, %575 : vector<8x64xf32>
    %cst_268 = arith.constant 9.99999974E-6 : f32
    %577 = vector.broadcast %cst_268 : f32 to vector<8x1xf32>
    %578 = arith.addf %574, %577 : vector<8x1xf32>
    %579 = math.rsqrt %578 : vector<8x1xf32>
    %580 = vector.broadcast %579 : vector<8x1xf32> to vector<8x64xf32>
    %581 = arith.mulf %576, %580 : vector<8x64xf32>
    %582 = vector.broadcast %562 : vector<1x64xf32> to vector<8x64xf32>
    %583 = arith.mulf %581, %582 : vector<8x64xf32>
    %584 = vector.broadcast %563 : vector<1x64xf32> to vector<8x64xf32>
    %585 = arith.addf %583, %584 : vector<8x64xf32>
    %586 = arith.truncf %585 : vector<8x64xf32> to vector<8x64xbf16>
    %c0_269 = arith.constant 0 : index
    %c0_270 = arith.constant 0 : index
    %587 = vector.load %arg19[%c0_269, %c0_270] : memref<64x2xbf16, #tpu.memory_space<vmem>>, vector<64x2xbf16>
    %cst_271 = arith.constant dense<0.000000e+00> : vector<8x2xf32>
    %588 = tpu.matmul %586, %587, %cst_271 {dimension_numbers = #tpu.dot_dimension_numbers<[1], [0], [0], [1], [0, 0, 1, 1], [], []>} : vector<8x64xbf16>, vector<64x2xbf16>, vector<8x2xf32> -> vector<8x2xf32>
    %c0_272 = arith.constant 0 : index
    %c0_273 = arith.constant 0 : index
    %589 = vector.load %arg20[%c0_272, %c0_273] : memref<1x2xf32, #tpu.memory_space<vmem>>, vector<1x2xf32>
    %590 = vector.broadcast %589 : vector<1x2xf32> to vector<8x2xf32>
    %591 = arith.addf %588, %590 : vector<8x2xf32>
    %c0_274 = arith.constant 0 : index
    %c0_275 = arith.constant 0 : index
    %592 = vector.load %arg21[%c0_274, %c0_275] : memref<8x2xf32, #tpu.memory_space<vmem>>, vector<8x2xf32>
    tpu.vector_store %arg21[%c0_274, %c0_275], %591 {strides = array<i32>} : memref<8x2xf32, #tpu.memory_space<vmem>>, vector<8x2xf32>,
    return
  }
}

</mosaic_0001>

<bundles_post_ra>
// kernel: tpu_custom_call.1
= control target key start
LH: loop header
LB: loop body
LE: loop exit
PB: predicated region body
PF: predicated region fallthrough
CT: control target
= control target key end

     0   :  { %s13181_s0 = inlined_call_operand.vmem [shape: f32[8,6], index: 0, kind: input, shape index: {}]   ;;  %s13182_s1 = inlined_call_operand.vmem [shape: bf16[6,64], index: 1, kind: input, shape index: {}]   ;;  %s13183_s2 = inlined_call_operand.vmem [shape: f32[1,64], index: 2, kind: input, shape index: {}]   ;;  %s13184_s3 = inlined_call_operand.vmem [shape: f32[64,3], index: 3, kind: input, shape index: {}]   ;;  %s13185_s4 = inlined_call_operand.vmem [shape: f32[1,3], index: 4, kind: input, shape index: {}]   ;;  %s13186_s5 = inlined_call_operand.vmem [shape: bf16[3,3,64,192], index: 5, kind: input, shape index: {}]   ;;  %s13187_s6 = inlined_call_operand.vmem [shape: f32[3,3,1,192], index: 6, kind: input, shape index: {}]   ;;  %s13188_s7 = inlined_call_operand.vmem [shape: bf16[3,3,64,64], index: 7, kind: input, shape index: {}]   ;;  %s13189_s8 = inlined_call_operand.vmem [shape: f32[3,3,1,64], index: 8, kind: input, shape index: {}]   ;;  %s13190_s9 = inlined_call_operand.vmem [shape: f32[3,3,1,64], index: 9, kind: input, shape index: {}]   ;;  %s13191_s10 = inlined_call_operand.vmem [shape: f32[3,3,1,64], index: 10, kind: input, shape index: {}]   ;;  %s13192_s11 = inlined_call_operand.vmem [shape: f32[3,3,1,64], index: 11, kind: input, shape index: {}]   ;;  %s13193_s12 = inlined_call_operand.vmem [shape: f32[3,3,1,64], index: 12, kind: input, shape index: {}]   ;;  %s13194_s13 = inlined_call_operand.hbm [shape: bf16[3,3,64,128], index: 13, kind: input, shape index: {}]   ;;  %s13195_s14 = inlined_call_operand.vmem [shape: f32[3,3,1,128], index: 14, kind: input, shape index: {}]   ;;  %s13196_s15 = inlined_call_operand.vmem [shape: bf16[3,3,128,64], index: 15, kind: input, shape index: {}]   ;;  %s13197_s16 = inlined_call_operand.vmem [shape: f32[3,3,1,64], index: 16, kind: input, shape index: {}]   ;;  %s13198_s17 = inlined_call_operand.vmem [shape: f32[1,64], index: 17, kind: input, shape index: {}]   ;;  %s13199_s18 = inlined_call_operand.vmem [shape: f32[1,64], index: 18, kind: input, shape index: {}]   ;;  %s13200_s19 = inlined_call_operand.vmem [shape: bf16[64,2], index: 19, kind: input, shape index: {}]   ;;  %s13201_s20 = inlined_call_operand.vmem [shape: f32[1,2], index: 20, kind: input, shape index: {}]   ;;  %s13202_s21 = inlined_call_operand.vmem [shape: f32[8,2], index: 21, kind: output, shape index: {}]  }
   0x1   :  { %13213 = sst [smem:[#allocation5_spill]] %s13181_s0 }
   0x2   :  { %13214 = sst [smem:[#allocation6_spill]] %s13182_s1 }
   0x3   :  { %13215 = sst [smem:[#allocation7_spill]] %s13183_s2 }
   0x4   :  { %13216 = sst [smem:[#allocation8_spill]] %s13184_s3 }
   0x5   :  { %13217 = sst [smem:[#allocation9_spill]] %s13185_s4 }
   0x6   :  { %13218 = sst [smem:[#allocation10_spill]] %s13186_s5 }
   0x7   :  { %26 = vsyncpa [#allocation3], 0  ;;  %s10885_s2 = smov [#allocation2]  }
   0x8   :  { %s58_s25 = sshll.u32 %s10885_s2, 4  ;;  %s59_s25 = int_to_ptr.vmem [resolvable:$true] %s58_s25 }
   0x9   :  { %s10871_s26 = scalar_lea.vmem %s59_s25, 4608  ;;  %p10876_p1 = scmp.lt.s32.totalorder %s59_s25, %s59_s25 }
   0xa   :  { %p10872_p0 = scmp.ne.s32.totalorder %s59_s25, %s10871_s26  ;;  %p10877_p2 = scmp.lt.s32.totalorder %s10871_s26, %s10871_s26 }
   0xc   :  { %p10878_p3 = por %p10877_p2, %p10876_p1 }
   0xe   :  { %p10879_p4 = pnand %p10878_p3, %p10872_p0 }
  0x10   :  { %10882 = shalt.err (!%p10879_p4)
}
  0x11   :  { %s10886_s27 = smov 64   ;;  %s10887_s3 = smov 4  }
  0x12   :  { %64 = dma.hbm_to_vmem [thread:$0]  %s13194_s13, 4608, %s59_s25, [#allocation3], %s10886_s27, %s10886_s27, %s10887_s3  }
  0x13   :  { %10883 = dma.done.wait [#allocation3], 4608  }
  0x14   :  { %10884 = vsyncadd [#allocation3], 4294962688  ;;  %v10888_v0 = vmov 0.0   ;;  %vm10889_vm0 = vmmov 0   ;;  %vm97_vm1 = vcmask 1042432   ;;  %s13219_s30 = sld [smem:[#allocation6_spill]]  ;;  %v390_v45 = vlaneseq }
  0x15   :  { %9528 = vmatprep.subr.bf16.mxu0 %v10888_v0  ;;  %9530 = vmatprep.mubr.msk.bf16.mxu0 %vm10889_vm0, %v10888_v0  ;;  %s13220_s22 = sld [smem:[#allocation5_spill]]  ;;  %vm93_vm2 = vcmask 48128   ;;  %v10890_v23 = vmov 0   ;;  %vm156_vm3 = vcmask 523264   ;;  %v266_v48 = vld [vmem:[%s13187_s6] sm:$0x3] }
  0x16   :  { %9534 = vmatprep.subr.mxu1 %v10888_v0  ;;  %9550 = vmatprep.mubr.msk.f32.mxu1 %vm10889_vm0, %v10888_v0  ;;  %s13221_s24 = sld [smem:[#allocation8_spill]]  ;;  %v391_v46 = vshrl.u32 %v390_v45, 7  ;;  %s10891_s1 = smov 112   ;;  %v267_v61 = vld [vmem:[%s13187_s6 + $0x2] sm:$0x3]  ;;  %vm672_vm4 = vcmask 130048  }
  0x17   :  { %s13222_s26 = sld [smem:[#allocation10_spill]]  ;;  %10417 = vset.pattern.permute.xlu1 %v10890_v23  ;;  %v268_v62 = vld [vmem:[%s13187_s6 + $0x4] sm:$0x3]  ;;  %vm820_vm5 = vcmask 64512   ;;  %s10892_s29 = smov 96   ;;  %vm862_vm6 = vcmask 1043456  }
  0x18   :  { %v11151_v47 = vsub.s32 0, %v391_v46  ;;  %v11156_v49 = vsub.s32 1, %v391_v46  ;;  %s13211_s0 = smov 80   ;;  %s13209_s4 = smov 48   ;;  %vm2040_vm7 = vcmask 261120   ;;  %vm2044_vm8 = vcmask 392192  }
  0x19   :  { %s13205_s13 = smov 32   ;;  %s13224_s3 = smov 16   ;;  %vm230_vm9 = vcmask 23552   ;;  %vm8560_vm10 = vcmask 15360  }
  0x1a   :  { %v85_v1 = vld [vmem:[%s13219_s30] sm:$0x7]  ;;  %v393_v50 = vrot.slane %v266_v48, %v11151_v47  ;;  %v397_v52 = vrot.slane %v266_v48, %v11156_v49  ;;  %v401_v63 = vrot.slane %v267_v61, %v11151_v47  ;;  %s13207_s30 = smov 16   ;;  %s13225_s28 = smov 32  }
  0x1b   :  { %v83_v2 = vld [vmem:[%s13220_s22] sm:$0xff]  ;;  %v99_v4 = vsel %vm97_vm1, %v85_v1, 0  ;;  %v405_v1 = vrot.slane %v267_v61, %v11156_v49 }
  0x1c   :  { %v148_v3 = vld [vmem:[%s13221_s24 + $0x38] sm:$0xff]  ;;  %v84_v5 = vpack.c.bf16 %v83_v2, %v83_v2  ;;  %9529 = vmatpush3.bf16.msra.mxu0 %v99_v4  ;;  %v147_v8 = vld [vmem:[%s13221_s24 + $0x30] sm:$0xff]  ;;  %v146_v9 = vld [vmem:[%s13221_s24 + $0x28] sm:$0xff]  ;;  %v409_v2 = vrot.slane %v268_v62, %v11151_v47 }
  0x1d   :  { %9535 = vmatpush3.msra.mxu1 %v148_v3  ;;  %v10421_v6 = vld [vmem:[%s13222_s26 + $0x30] ss:$8 sps:$4 sm:$0xff]   ;;  %v10423_v7 = vld [vmem:[%s13222_s26 + $0x34] ss:$8 sps:$4 sm:$0xff]   ;;  %v10426_v10 = vld [vmem:[%s13222_s26 + $0x24] ss:$8 sps:$4 sm:$0xff]  }
  0x1e   :  { %9536 = vmatprep.subr.mxu1 %v10888_v0  ;;  %471 = vmatprep.subr.bf16.mxu0 %v10423_v7  ;;  %v145_v11 = vld [vmem:[%s13221_s24 + $0x20] sm:$0xff]  ;;  %v144_v13 = vld [vmem:[%s13221_s24 + $0x18] sm:$0xff]  ;;  %v143_v15 = vld [vmem:[%s13221_s24 + $0x10] sm:$0xff] }
  0x1f   :  { %9537 = vmatpush3.msra.mxu1 %v147_v8  ;;  %9531 = vmatmul.mubr.msk.bf16.vlgmr.msra.gmra.mxu0 %vm93_vm2, %v84_v5  ;;  %v10424_v12 = vld [vmem:[%s13222_s26 + $0x20] ss:$8 sps:$4 sm:$0xff]   ;;  %v10429_v14 = vld [vmem:[%s13222_s26 + $0x14] ss:$8 sps:$4 sm:$0xff]   ;;  %v10427_v16 = vld [vmem:[%s13222_s26 + $0x10] ss:$8 sps:$4 sm:$0xff]   ;;  %v413_v5 = vrot.slane %v268_v62, %v11156_v49 }
  0x20   :  { %9538 = vmatprep.subr.mxu1 %v10888_v0  ;;  %472 = vmatpush1.bf16.msra.mxu0 %v10421_v6  ;;  %v142_v17 = vld [vmem:[%s13221_s24 + $0x8] sm:$0xff]  ;;  %v141_v20 = vld [vmem:[%s13221_s24] sm:$0xff]  ;;  %v10435_v21 = vld [vmem:[%s13222_s26 + $0x74] ss:$8 sps:$4 sm:$0xff]   ;;  %s13223_s24 = sld [smem:[#allocation7_spill]] }
  0x21   :  { %9539 = vmatpush3.msra.mxu1 %v146_v9  ;;  %473 = vmatprep.subr.bf16.mxu0 %v10426_v10  ;;  %v10432_v18 = vld [vmem:[%s13222_s26 + $0x4] ss:$8 sps:$4 sm:$0xff]   ;;  %v10430_v19 = vld [vmem:[%s13222_s26] ss:$8 sps:$4 sm:$0xff]   ;;  %v10438_v22 = vld [vmem:[%s13222_s26 + $0xb4] ss:$8 sps:$4 sm:$0xff]  }
  0x22   :  { %9540 = vmatprep.subr.mxu1 %v10888_v0  ;;  %495 = vmatprep.mubr.bf16.mxu0 %v10890_v23  ;;  %v10433_v26 = vld [vmem:[%s13222_s26 + $0x70] ss:$8 sps:$4 sm:$0xff]   ;;  %v10441_v28 = vld [vmem:[%s13222_s26 + $0x64] ss:$8 sps:$4 sm:$0xff]   ;;  %v10439_v34 = vld [vmem:[%s13222_s26 + $0x60] ss:$8 sps:$4 sm:$0xff]  }
  0x23   :  { %9541 = vmatpush3.msra.mxu1 %v145_v11  ;;  %v10436_v30 = vld [vmem:[%s13222_s26 + $0xb0] ss:$8 sps:$4 sm:$0xff]   ;;  %v10444_v32 = vld [vmem:[%s13222_s26 + $0xa4] ss:$8 sps:$4 sm:$0xff]   ;;  %v10447_v35 = vld [vmem:[%s13222_s26 + $0x54] ss:$8 sps:$4 sm:$0xff]  }
  0x24   :  { %9542 = vmatprep.subr.mxu1 %v10888_v0  ;;  %474 = vmatpush1.bf16.msra.mxu0 %v10424_v12  ;;  %v10442_v37 = vld [vmem:[%s13222_s26 + $0xa0] ss:$8 sps:$4 sm:$0xff]   ;;  %v10450_v38 = vld [vmem:[%s13222_s26 + $0x94] ss:$8 sps:$4 sm:$0xff]   ;;  %v10445_v39 = vld [vmem:[%s13222_s26 + $0x50] ss:$8 sps:$4 sm:$0xff]  }
  0x25   :  { %9543 = vmatpush3.msra.mxu1 %v144_v13  ;;  %475 = vmatprep.subr.bf16.mxu0 %v10429_v14  ;;  %v10453_v40 = vld [vmem:[%s13222_s26 + $0x44] ss:$8 sps:$4 sm:$0xff]   ;;  %v10448_v41 = vld [vmem:[%s13222_s26 + $0x90] ss:$8 sps:$4 sm:$0xff]   ;;  %v10451_v43 = vld [vmem:[%s13222_s26 + $0x40] ss:$8 sps:$4 sm:$0xff]  }
  0x26   :  { %9544 = vmatprep.subr.mxu1 %v10888_v0  ;;  %v8567_v24 = vld [vmem:[%s13223_s24] ss:$0 sm:$0xff]  ;;  %v10456_v42 = vld [vmem:[%s13222_s26 + $0x84] ss:$8 sps:$4 sm:$0xff]  }
  0x27   :  { %9545 = vmatpush3.msra.mxu1 %v143_v15  ;;  %v10454_v44 = vld [vmem:[%s13222_s26 + $0x80] ss:$8 sps:$4 sm:$0xff]  }
  0x28   :  { %9546 = vmatprep.subr.mxu1 %v10888_v0  ;;  %476 = vmatpush1.bf16.msra.mxu0 %v10427_v16 }
  0x29   :  { %9547 = vmatpush3.msra.mxu1 %v142_v17  ;;  %477 = vmatprep.subr.bf16.mxu0 %v10432_v18 }
  0x2a   :  { %9548 = vmatprep.subr.mxu1 %v10888_v0 }
  0x2b   :  { %9549 = vmatpush3.msra.mxu1 %v141_v20 }
  0x2c   :  { %478 = vmatpush1.bf16.msra.mxu0 %v10430_v19  ;;  %552 = vmatprep.subr.bf16.mxu1 %v10435_v21 }
  0x2d   :  { %633 = vmatprep.subr.bf16.mxu0 %v10438_v22 }
  0xdf   :  { %v135_v25 = vpop.f32.mrf.mxu0 }
  0xe0   :  { %v11095_v27 = vadd.f32 %v8567_v24, %v135_v25 }
  0xe1   :  { %v9532_v29 = vpop.f32.mrf.mxu0 }
  0xe2   :  { %9551 = vmatmul.mubr.msk.f32.vlgmr.msra.gmra.mxu1 %vm156_vm3, %v11095_v27  ;;  %v386_v31 = vpack.c.bf16 %v11095_v27, %v11095_v27 }
  0xe3   :  { %553 = vmatpush1.bf16.msra.mxu1 %v10433_v26  ;;  %v138_v33 = vpop.f32.mrf.mxu0  ;;  %576 = vmatprep.mubr.bf16.mxu1 %v10890_v23 }
  0xe4   :  { %8579 = vmatmul.mubr.msk.bf16.vlgmr.msra.gmra.mxu0 %vm156_vm3, %v386_v31  ;;  %554 = vmatprep.subr.bf16.mxu1 %v10441_v28 }
  0xe5   :  { %634 = vmatpush1.bf16.msra.mxu0 %v10436_v30  ;;  %v9533_v36 = vpop.f32.mrf.mxu0  ;;  %657 = vmatprep.mubr.bf16.mxu0 %v10890_v23 }
  0xe6   :  { %635 = vmatprep.subr.bf16.mxu0 %v10444_v32 }
  0xe7   :  { %555 = vmatpush1.bf16.msra.mxu1 %v10439_v34 }
  0xe8   :  { %556 = vmatprep.subr.bf16.mxu1 %v10447_v35 }
  0xe9   :  { %636 = vmatpush1.bf16.msra.mxu0 %v10442_v37 }
  0xea   :  { %637 = vmatprep.subr.bf16.mxu0 %v10450_v38 }
  0xeb   :  { %557 = vmatpush1.bf16.msra.mxu1 %v10445_v39 }
  0xec   :  { %558 = vmatprep.subr.bf16.mxu1 %v10453_v40 }
  0xed   :  { %638 = vmatpush1.bf16.msra.mxu0 %v10448_v41 }
  0xee   :  { %639 = vmatprep.subr.bf16.mxu0 %v10456_v42 }
  0xef   :  { %559 = vmatpush1.bf16.msra.mxu1 %v10451_v43 }
  0xf0   :  { %9565 = vmatprep.subr.bf16.mxu1 %v10888_v0 }
  0xf1   :  { %640 = vmatpush1.bf16.msra.mxu0 %v10454_v44 }
  0xf2   :  { %8588 = vmatmul.mubr.msk.bf16.vlgmr.msra.gmra.mxu1 %vm156_vm3, %v386_v31  ;;  %9553 = vmatprep.subr.bf16.mxu0 %v10888_v0 }
  0xf3   :  { %9567 = vmatprep.mubr.msk.bf16.mxu1 %vm10889_vm0, %v10888_v0 }
  0xf4   :  { %8597 = vmatmul.mubr.msk.bf16.vlgmr.msra.gmra.mxu0 %vm156_vm3, %v386_v31 }
  0xf5   :  { %9555 = vmatprep.mubr.msk.bf16.mxu0 %vm10889_vm0, %v10888_v0 }
 0x1a2   :  { %v11159_v51 = vpop.f32.mrf.mxu1 }
 0x1a4   :  { %v9552_v53 = vpop.f32.mrf.mxu1  ;;  %v497_v54 = vpop.f32.mrf.mxu0 }
 0x1a5   :  { %v498_v55 = vadd.f32 %v497_v54, %v393_v50 }
 0x1a6   :  { %v499_v56 = vpop.f32.mrf.mxu0 }
 0x1a7   :  { %v11162_v57 = vpack.c.bf16 %v498_v55, %v498_v55  ;;  %v11164_v58 = vadd.f32 %v499_v56, %v397_v52 }
 0x1a8   :  { %v501_v59 = vpop.f32.mrf.mxu0 }
 0x1a9   :  { %670 = vrot.lane.b32.xlu0 %v11162_v57, %s10891_s1 }
 0x1aa   :  { %v502_v60 = vpop.f32.mrf.mxu0 }
 0x1b2   :  { %v578_v3 = vpop.f32.mrf.mxu1 }
 0x1b3   :  { %v579_v4 = vadd.f32 %v578_v3, %v401_v63 }
 0x1b4   :  { %v580_v6 = vpop.f32.mrf.mxu1  ;;  %v659_v7 = vpop.f32.mrf.mxu0 }
 0x1b5   :  { %v11178_v8 = vpack.c.bf16 %v579_v4, %v579_v4  ;;  %v11180_v9 = vadd.f32 %v580_v6, %v405_v1  ;;  %v660_v10 = vadd.f32 %v659_v7, %v409_v2 }
 0x1b6   :  { %v582_v11 = vpop.f32.mrf.mxu1  ;;  %v661_v12 = vpop.f32.mrf.mxu0 }
 0x1b7   :  { %v11182_v13 = vpack.c.bf16 %v660_v10, %v660_v10  ;;  %v11184_v14 = vadd.f32 %v661_v12, %v413_v5  ;;  %720 = vrot.lane.b32.xlu0 %v11178_v8, %s10891_s1 }
 0x1b8   :  { %v583_v15 = vpop.f32.mrf.mxu1  ;;  %v663_v16 = vpop.f32.mrf.mxu0 }
 0x1b9   :  { %769 = vrot.lane.b32.xlu1 %v11182_v13, %s10891_s1 }
 0x1ba   :  { %v664_v17 = vpop.f32.mrf.mxu0 }
 0x21b   :  { %v671_v18 = vpop.permute.xlu0 %670 }
 0x21c   :  { %v677_v19 = vsel %vm672_vm4, %v671_v18, 0 }
 0x21d   :  { %9554 = vmatpush3.bf16.xpose.msra.mxu0 %v677_v19 }
 0x21e   :  { %9559 = vmatprep.subr.bf16.mxu0 %v10888_v0 }
 0x224   :  { %9556 = vmatmul.mubr.msk.bf16.vlgmr.msra.gmra.mxu0 %vm672_vm4, %v11162_v57 }
 0x225   :  { %9561 = vmatprep.mubr.msk.bf16.mxu0 %vm10889_vm0, %v10888_v0 }
 0x229   :  { %v721_v20 = vpop.permute.xlu0 %720 }
 0x22a   :  { %v726_v21 = vsel %vm672_vm4, %v721_v20, 0 }
 0x22b   :  { %v770_v22 = vpop.permute.xlu1 %769  ;;  %9560 = vmatpush3.bf16.xpose.msra.mxu0 %v726_v21 }
 0x22c   :  { %v775_v24 = vsel %vm672_vm4, %v770_v22, 0  ;;  %9571 = vmatprep.subr.bf16.mxu0 %v10888_v0 }
 0x22d   :  { %9566 = vmatpush3.bf16.xpose.msra.mxu1 %v775_v24 }
 0x22e   :  { %9577 = vmatprep.subr.bf16.mxu1 %v10888_v0 }
 0x232   :  { %9562 = vmatmul.mubr.msk.bf16.vlgmr.msra.gmra.mxu0 %vm672_vm4, %v11178_v8 }
 0x233   :  { %9573 = vmatprep.mubr.msk.bf16.mxu0 %vm10889_vm0, %v10888_v0 }
 0x234   :  { %9568 = vmatmul.mubr.msk.bf16.vlgmr.msra.gmra.mxu1 %vm672_vm4, %v11182_v13 }
 0x235   :  { %9579 = vmatprep.mubr.msk.bf16.mxu1 %vm10889_vm0, %v10888_v0 }
 0x2e4   :  { %v713_v25 = vpop.f32.mrf.mxu0 }
 0x2e5   :  { %v817_v26 = vmul.f32 0.25, %v713_v25 }
 0x2e6   :  { %v9557_v28 = vpop.f32.mrf.mxu0 }
 0x2e7   :  { %v821_v29 = vsel %vm820_vm5, %v817_v26, -inf }
 0x2e8   :  { %822 = vmax.xlane.f32.xlu0 %v821_v29  ;;  %v716_v30 = vpop.f32.mrf.mxu0 }
 0x2ea   :  { %v9558_v31 = vpop.f32.mrf.mxu0 }
 0x2f2   :  { %v762_v32 = vpop.f32.mrf.mxu0 }
 0x2f3   :  { %v818_v33 = vmul.f32 0.25, %v762_v32 }
 0x2f4   :  { %v9563_v34 = vpop.f32.mrf.mxu0  ;;  %v811_v35 = vpop.f32.mrf.mxu1 }
 0x2f5   :  { %v819_v36 = vmul.f32 0.25, %v811_v35  ;;  %v824_v37 = vsel %vm820_vm5, %v818_v33, -inf }
 0x2f6   :  { %v9569_v38 = vpop.f32.mrf.mxu1  ;;  %825 = vmax.xlane.f32.xlu1 %v824_v37  ;;  %v765_v39 = vpop.f32.mrf.mxu0 }
 0x2f7   :  { %v827_v40 = vsel %vm820_vm5, %v819_v36, -inf }
 0x2f8   :  { %v814_v41 = vpop.f32.mrf.mxu1  ;;  %828 = vmax.xlane.f32.xlu0 %v827_v40  ;;  %v9564_v42 = vpop.f32.mrf.mxu0 }
 0x2fa   :  { %v9570_v43 = vpop.f32.mrf.mxu1 }
 0x307   :  { %1004 = vrot.lane.b32.xlu1 %v11162_v57, %s10886_s27 }
 0x30b   :  { %857 = vrot.lane.b32.xlu1 %v11162_v57, %s10892_s29 }
 0x30e   :  { %906 = vrot.lane.b32.xlu0 %v11178_v8, %s10892_s29 }
 0x371   :  { %v823_v44 = vpop.xlane.xlu0 %822 }
 0x372   :  { %v830_v45 = vsub.f32 %v817_v26, %v823_v44 }
 0x374   :  { %v833_v46 = vmul.f32 1.442695, %v830_v45 }
 0x376   :  { %10677 = vpow2.f32 %v833_v46 }
 0x37f   :  { %v826_v48 = vpop.xlane.xlu1 %825 }
 0x380   :  { %v831_v50 = vsub.f32 %v818_v33, %v826_v48 }
 0x381   :  { %v829_v52 = vpop.xlane.xlu0 %828 }
 0x382   :  { %v835_v53 = vmul.f32 1.442695, %v831_v50  ;;  %v832_v2 = vsub.f32 %v819_v36, %v829_v52 }
 0x383   :  { %v10678_v54 = vpop.eup %10677  ;;  %v1005_v55 = vpop.permute.xlu1 %1004 }
 0x384   :  { %10679 = vpow2.f32 %v835_v53  ;;  %v839_v56 = vsel %vm820_vm5, %v10678_v54, 0.0  ;;  %v837_v3 = vmul.f32 1.442695, %v832_v2  ;;  %v1010_v21 = vsel %vm672_vm4, %v1005_v55, 0 }
 0x385   :  { %v907_v59 = vpop.permute.xlu0 %906  ;;  %840 = vadd.xlane.f32.xlu0 %v839_v56 }
 0x386   :  { %v912_v60 = vsel %vm862_vm6, %v907_v59, 0  ;;  %10681 = vpow2.f32 %v837_v3 }
 0x387   :  { %v858_v61 = vpop.permute.xlu1 %857  ;;  %9578 = vmatpush3.bf16.msra.mxu1 %v912_v60 }
 0x388   :  { %v864_v62 = vsel %vm862_vm6, %v858_v61, 0  ;;  %9589 = vmatprep.subr.bf16.mxu1 %v10888_v0 }
 0x389   :  { %9572 = vmatpush3.bf16.msra.mxu0 %v864_v62 }
 0x38a   :  { %9583 = vmatprep.subr.bf16.mxu0 %v10888_v0 }
 0x391   :  { %v10680_v63 = vpop.eup %10679 }
 0x392   :  { %v842_v1 = vsel %vm820_vm5, %v10680_v63, 0.0 }
 0x393   :  { %843 = vadd.xlane.f32.xlu1 %v842_v1  ;;  %v10682_v4 = vpop.eup %10681 }
 0x394   :  { %v845_v5 = vsel %vm820_vm5, %v10682_v4, 0.0 }
 0x39b   :  { %1002 = vrot.lane.b32.xlu0 %v11162_v57, %s13211_s0 }
 0x39f   :  { %954 = vrot.lane.b32.xlu0 %v11182_v13, %s10892_s29 }
 0x3a3   :  { %1102 = vrot.lane.b32.xlu0 %v11182_v13, %s13211_s0 }
 0x3a4   :  { %1104 = vrot.lane.b32.xlu1 %v11182_v13, %s10886_s27 }
 0x3c8   :  { %846 = vadd.xlane.f32.xlu1 %v845_v5 }
 0x3d9   :  { %1054 = vrot.lane.b32.xlu1 %v11178_v8, %s10886_s27 }
 0x3dd   :  { %1052 = vrot.lane.b32.xlu1 %v11178_v8, %s13211_s0 }
 0x40e   :  { %v841_v6 = vpop.xlane.xlu0 %840 }
 0x40f   :  { %10683 = vrcp.f32 %v841_v6 }
 0x412   :  { %v1003_v7 = vpop.permute.xlu0 %1002 }
 0x416   :  { %v955_v15 = vpop.permute.xlu0 %954 }
 0x417   :  { %v960_v17 = vsel %vm862_vm6, %v955_v15, 0 }
 0x41a   :  { %v1103_v25 = vpop.permute.xlu0 %1102 }
 0x41c   :  { %v10684_v10 = vpop.eup %10683  ;;  %v844_v11 = vpop.xlane.xlu1 %843 }
 0x41d   :  { %10685 = vrcp.f32 %v844_v11  ;;  %v851_v12 = vmul.f32 %v10684_v10, %v10678_v54 }
 0x41f   :  { %v854_v16 = vpack.c.bf16 %v851_v12, %v851_v12 }
 0x420   :  { %v1105_v22 = vpop.permute.xlu1 %1104 }
 0x421   :  { %9574 = vmatmul.mubr.msk.bf16.vlgmr.msra.gmra.mxu0 %vm820_vm5, %v854_v16  ;;  %v1110_v24 = vsel %vm672_vm4, %v1105_v22, 0 }
 0x422   :  { %9584 = vmatpush3.bf16.msra.mxu0 %v960_v17  ;;  %9585 = vmatprep.mubr.msk.bf16.mxu0 %vm10889_vm0, %v10888_v0 }
 0x423   :  { %9595 = vmatprep.subr.bf16.mxu0 %v10888_v0 }
 0x42a   :  { %v10686_v18 = vpop.eup %10685 }
 0x42b   :  { %v852_v19 = vmul.f32 %v10686_v18, %v10680_v63 }
 0x42d   :  { %v855_v20 = vpack.c.bf16 %v852_v19, %v852_v19 }
 0x42f   :  { %9580 = vmatmul.mubr.msk.bf16.vlgmr.msra.gmra.mxu1 %vm820_vm5, %v855_v20 }
 0x430   :  { %9590 = vmatpush3.bf16.xpose.msra.mxu1 %v1010_v21  ;;  %9591 = vmatprep.mubr.msk.bf16.mxu1 %vm10889_vm0, %v10888_v0 }
 0x431   :  { %9601 = vmatprep.subr.bf16.mxu1 %v10888_v0 }
 0x437   :  { %9592 = vmatmul.mubr.msk.bf16.vlgmr.msra.gmra.mxu1 %vm672_vm4, %v1003_v7 }
 0x438   :  { %9602 = vmatpush3.bf16.xpose.msra.mxu1 %v1110_v24  ;;  %9603 = vmatprep.mubr.msk.bf16.mxu1 %vm10889_vm0, %v10888_v0 }
 0x439   :  { %9613 = vmatprep.subr.bf16.mxu1 %v10888_v0 }
 0x43f   :  { %9604 = vmatmul.mubr.msk.bf16.vlgmr.msra.gmra.mxu1 %vm672_vm4, %v1103_v25 }
 0x440   :  { %9615 = vmatprep.mubr.msk.bf16.mxu1 %vm10889_vm0, %v10888_v0 }
 0x451   :  { %v847_v26 = vpop.xlane.xlu1 %846 }
 0x452   :  { %10687 = vrcp.f32 %v847_v26 }
 0x455   :  { %v1055_v30 = vpop.permute.xlu1 %1054 }
 0x456   :  { %v1060_v32 = vsel %vm672_vm4, %v1055_v30, 0 }
 0x459   :  { %v1053_v33 = vpop.permute.xlu1 %1052 }
 0x45f   :  { %v10688_v28 = vpop.eup %10687 }
 0x460   :  { %v853_v29 = vmul.f32 %v10688_v28, %v10682_v4 }
 0x462   :  { %v856_v31 = vpack.c.bf16 %v853_v29, %v853_v29 }
 0x464   :  { %9586 = vmatmul.mubr.msk.bf16.vlgmr.msra.gmra.mxu0 %vm820_vm5, %v856_v31 }
 0x465   :  { %9596 = vmatpush3.bf16.xpose.msra.mxu0 %v1060_v32  ;;  %9597 = vmatprep.mubr.msk.bf16.mxu0 %vm10889_vm0, %v10888_v0 }
 0x466   :  { %9607 = vmatprep.subr.bf16.mxu0 %v10888_v0 }
 0x46c   :  { %9598 = vmatmul.mubr.msk.bf16.vlgmr.msra.gmra.mxu0 %vm672_vm4, %v1053_v33 }
 0x46d   :  { %9609 = vmatprep.mubr.msk.bf16.mxu0 %vm10889_vm0, %v10888_v0 }
 0x4e1   :  { %v11262_v34 = vpop.f32.mrf.mxu0 }
 0x4e3   :  { %v9575_v35 = vpop.f32.mrf.mxu0 }
 0x4e5   :  { %v903_v36 = vpop.f32.mrf.mxu0 }
 0x4e7   :  { %v9576_v37 = vpop.f32.mrf.mxu0 }
 0x4ef   :  { %v11264_v38 = vpop.f32.mrf.mxu1 }
 0x4f1   :  { %v9581_v39 = vpop.f32.mrf.mxu1 }
 0x4f3   :  { %v951_v40 = vpop.f32.mrf.mxu1 }
 0x4f5   :  { %v9582_v41 = vpop.f32.mrf.mxu1 }
 0x4f7   :  { %v1046_v42 = vpop.f32.mrf.mxu1 }
 0x4f8   :  { %v1152_v43 = vmul.f32 0.25, %v1046_v42  ;;  %v11308_v42 = vpack.c.bf16 %v11164_v58, %v11164_v58 }
 0x4f9   :  { %v9593_v44 = vpop.f32.mrf.mxu1 }
 0x4fa   :  { %v1155_v45 = vsel %vm820_vm5, %v1152_v43, -inf  ;;  %v1531_v44 = vsel %vm862_vm6, %v11308_v42, 0 }
 0x4fb   :  { %1156 = vmax.xlane.f32.xlu0 %v1155_v45  ;;  %v1049_v46 = vpop.f32.mrf.mxu1 }
 0x4fd   :  { %v9594_v48 = vpop.f32.mrf.mxu1 }
 0x4ff   :  { %v1146_v50 = vpop.f32.mrf.mxu1 }
 0x500   :  { %v1154_v52 = vmul.f32 0.25, %v1146_v50 }
 0x501   :  { %v9605_v53 = vpop.f32.mrf.mxu1 }
 0x502   :  { %v1161_v54 = vsel %vm820_vm5, %v1154_v52, -inf }
 0x503   :  { %1162 = vmax.xlane.f32.xlu1 %v1161_v54  ;;  %v1149_v55 = vpop.f32.mrf.mxu1 }
 0x505   :  { %v9606_v56 = vpop.f32.mrf.mxu1 }
 0x506   :  { %v11328_v56 = vpack.c.bf16 %v11180_v9, %v11180_v9 }
 0x514   :  { %1191 = vrot.lane.b32.xlu1 %v11162_v57, %s13209_s4 }
 0x518   :  { %1387 = vrot.lane.b32.xlu1 %v11178_v8, %s13207_s30 }
 0x524   :  { %v11272_v59 = vpop.f32.mrf.mxu0 }
 0x526   :  { %v9587_v60 = vpop.f32.mrf.mxu0 }
 0x528   :  { %v999_v61 = vpop.f32.mrf.mxu0 }
 0x529   :  { %v1577_v61 = vsel %vm862_vm6, %v11328_v56, 0 }
 0x52a   :  { %v9588_v62 = vpop.f32.mrf.mxu0 }
 0x52c   :  { %v1096_v63 = vpop.f32.mrf.mxu0 }
 0x52d   :  { %v1153_v1 = vmul.f32 0.25, %v1096_v63 }
 0x52e   :  { %v9599_v2 = vpop.f32.mrf.mxu0 }
 0x52f   :  { %v1158_v3 = vsel %vm820_vm5, %v1153_v1, -inf }
 0x530   :  { %1159 = vmax.xlane.f32.xlu0 %v1158_v3  ;;  %v1099_v4 = vpop.f32.mrf.mxu0 }
 0x532   :  { %v9600_v5 = vpop.f32.mrf.mxu0 }
 0x584   :  { %v1157_v6 = vpop.xlane.xlu0 %1156 }
 0x585   :  { %v1164_v7 = vsub.f32 %v1152_v43, %v1157_v6 }
 0x587   :  { %v1167_v10 = vmul.f32 1.442695, %v1164_v7 }
 0x589   :  { %10689 = vpow2.f32 %v1167_v10 }
 0x58c   :  { %v1163_v11 = vpop.xlane.xlu1 %1162 }
 0x58d   :  { %v1166_v12 = vsub.f32 %v1154_v52, %v1163_v11 }
 0x58f   :  { %v1171_v15 = vmul.f32 1.442695, %v1166_v12 }
 0x590   :  { %v1192_v16 = vpop.permute.xlu1 %1191 }
 0x591   :  { %10691 = vpow2.f32 %v1171_v15  ;;  %v1197_v17 = vsel %vm862_vm6, %v1192_v16, 0 }
 0x592   :  { %9608 = vmatpush3.bf16.msra.mxu0 %v1197_v17 }
 0x593   :  { %9619 = vmatprep.subr.bf16.mxu0 %v10888_v0 }
 0x594   :  { %v1388_v29 = vpop.permute.xlu1 %1387 }
 0x595   :  { %v1393_v41 = vsel %vm672_vm4, %v1388_v29, 0 }
 0x596   :  { %v10690_v18 = vpop.eup %10689 }
 0x597   :  { %v1173_v19 = vsel %vm820_vm5, %v10690_v18, 0.0 }
 0x598   :  { %1174 = vadd.xlane.f32.xlu0 %v1173_v19 }
 0x59e   :  { %v10692_v20 = vpop.eup %10691 }
 0x59f   :  { %v1179_v21 = vsel %vm820_vm5, %v10692_v20, 0.0 }
 0x5a0   :  { %1180 = vadd.xlane.f32.xlu1 %v1179_v21 }
 0x5ae   :  { %1287 = vrot.lane.b32.xlu0 %v11182_v13, %s13209_s4 }
 0x5b1   :  { %1239 = vrot.lane.b32.xlu1 %v11178_v8, %s13209_s4 }
 0x5b5   :  { %1385 = vrot.lane.b32.xlu1 %v11178_v8, %s13205_s13 }
 0x5b9   :  { %1437 = vrot.lane.b32.xlu1 %v11182_v13, %s13207_s30  ;;  %v1160_v22 = vpop.xlane.xlu0 %1159 }
 0x5ba   :  { %v1165_v24 = vsub.f32 %v1153_v1, %v1160_v22 }
 0x5bc   :  { %v1169_v25 = vmul.f32 1.442695, %v1165_v24 }
 0x5be   :  { %10693 = vpow2.f32 %v1169_v25 }
 0x5cb   :  { %v10694_v26 = vpop.eup %10693 }
 0x5cc   :  { %v1176_v28 = vsel %vm820_vm5, %v10694_v26, 0.0 }
 0x5cd   :  { %1177 = vadd.xlane.f32.xlu0 %v1176_v28 }
 0x5e3   :  { %1337 = vrot.lane.b32.xlu0 %v11162_v57, %s13207_s30 }
 0x5e7   :  { %1335 = vrot.lane.b32.xlu0 %v11162_v57, %s13205_s13 }
 0x5eb   :  { %1435 = vrot.lane.b32.xlu0 %v11182_v13, %s13205_s13 }
 0x621   :  { %v1175_v8 = vpop.xlane.xlu0 %1174 }
 0x622   :  { %10695 = vrcp.f32 %v1175_v8 }
 0x625   :  { %v1288_v36 = vpop.permute.xlu0 %1287 }
 0x626   :  { %v1293_v57 = vsel %vm862_vm6, %v1288_v36, 0 }
 0x629   :  { %v1181_v30 = vpop.xlane.xlu1 %1180 }
 0x62a   :  { %10697 = vrcp.f32 %v1181_v30 }
 0x62d   :  { %v1240_v31 = vpop.permute.xlu1 %1239 }
 0x62e   :  { %v1245_v32 = vsel %vm862_vm6, %v1240_v31, 0 }
 0x62f   :  { %v10696_v33 = vpop.eup %10695  ;;  %9614 = vmatpush3.bf16.msra.mxu1 %v1245_v32 }
 0x630   :  { %v1185_v35 = vmul.f32 %v10696_v33, %v10690_v18  ;;  %9625 = vmatprep.subr.bf16.mxu1 %v10888_v0 }
 0x631   :  { %v1386_v43 = vpop.permute.xlu1 %1385 }
 0x632   :  { %v1188_v37 = vpack.c.bf16 %v1185_v35, %v1185_v35 }
 0x634   :  { %9610 = vmatmul.mubr.msk.bf16.vlgmr.msra.gmra.mxu0 %vm820_vm5, %v1188_v37 }
 0x635   :  { %9620 = vmatpush3.bf16.msra.mxu0 %v1293_v57  ;;  %9621 = vmatprep.mubr.msk.bf16.mxu0 %vm10889_vm0, %v10888_v0  ;;  %v1438_v53 = vpop.permute.xlu1 %1437 }
 0x636   :  { %9631 = vmatprep.subr.bf16.mxu0 %v10888_v0  ;;  %v1443_v55 = vsel %vm672_vm4, %v1438_v53, 0 }
 0x637   :  { %v10698_v13 = vpop.eup %10697 }
 0x638   :  { %v1187_v39 = vmul.f32 %v10698_v13, %v10692_v20 }
 0x63a   :  { %v1190_v40 = vpack.c.bf16 %v1187_v39, %v1187_v39 }
 0x63c   :  { %9622 = vmatmul.mubr.msk.bf16.vlgmr.msra.gmra.mxu0 %vm820_vm5, %v1190_v40 }
 0x63d   :  { %9632 = vmatpush3.bf16.xpose.msra.mxu0 %v1393_v41  ;;  %9633 = vmatprep.mubr.msk.bf16.mxu0 %vm10889_vm0, %v10888_v0 }
 0x63e   :  { %9643 = vmatprep.subr.bf16.mxu0 %v10888_v0 }
 0x644   :  { %9634 = vmatmul.mubr.msk.bf16.vlgmr.msra.gmra.mxu0 %vm672_vm4, %v1386_v43 }
 0x645   :  { %9644 = vmatpush3.bf16.msra.mxu0 %v1531_v44  ;;  %9645 = vmatprep.mubr.msk.bf16.mxu0 %vm10889_vm0, %v10888_v0 }
 0x646   :  { %9655 = vmatprep.subr.bf16.mxu0 %v10888_v0 }
 0x656   :  { %v1178_v45 = vpop.xlane.xlu0 %1177 }
 0x657   :  { %10699 = vrcp.f32 %v1178_v45 }
 0x65a   :  { %v1338_v50 = vpop.permute.xlu0 %1337 }
 0x65b   :  { %v1343_v58 = vsel %vm672_vm4, %v1338_v50, 0 }
 0x65e   :  { %v1336_v54 = vpop.permute.xlu0 %1335 }
 0x662   :  { %v1436_v60 = vpop.permute.xlu0 %1435 }
 0x664   :  { %v10700_v46 = vpop.eup %10699 }
 0x665   :  { %v1186_v48 = vmul.f32 %v10700_v46, %v10694_v26 }
 0x667   :  { %v1189_v52 = vpack.c.bf16 %v1186_v48, %v1186_v48 }
 0x669   :  { %9616 = vmatmul.mubr.msk.bf16.vlgmr.msra.gmra.mxu1 %vm820_vm5, %v1189_v52  ;;  %v11358_v52 = vpack.c.bf16 %v11184_v14, %v11184_v14 }
 0x66a   :  { %9626 = vmatpush3.bf16.xpose.msra.mxu1 %v1343_v58  ;;  %9627 = vmatprep.mubr.msk.bf16.mxu1 %vm10889_vm0, %v10888_v0 }
 0x66b   :  { %9637 = vmatprep.subr.bf16.mxu1 %v10888_v0 }
 0x671   :  { %9628 = vmatmul.mubr.msk.bf16.vlgmr.msra.gmra.mxu1 %vm672_vm4, %v1336_v54 }
 0x672   :  { %9638 = vmatpush3.bf16.xpose.msra.mxu1 %v1443_v55  ;;  %9639 = vmatprep.mubr.msk.bf16.mxu1 %vm10889_vm0, %v10888_v0 }
 0x673   :  { %9649 = vmatprep.subr.bf16.mxu1 %v10888_v0 }
 0x679   :  { %9640 = vmatmul.mubr.msk.bf16.vlgmr.msra.gmra.mxu1 %vm672_vm4, %v1436_v60 }
 0x67a   :  { %9650 = vmatpush3.bf16.msra.mxu1 %v1577_v61  ;;  %9651 = vmatprep.mubr.msk.bf16.mxu1 %vm10889_vm0, %v10888_v0 }
 0x67b   :  { %9661 = vmatprep.subr.bf16.mxu1 %v10888_v0 }
 0x6f4   :  { %v11336_v62 = vpop.f32.mrf.mxu0 }
 0x6f6   :  { %v9611_v63 = vpop.f32.mrf.mxu0 }
 0x6f8   :  { %v1236_v1 = vpop.f32.mrf.mxu0 }
 0x6fa   :  { %v9612_v2 = vpop.f32.mrf.mxu0 }
 0x6fc   :  { %v11338_v3 = vpop.f32.mrf.mxu0 }
 0x6fe   :  { %v9623_v9 = vpop.f32.mrf.mxu0 }
 0x700   :  { %v1332_v4 = vpop.f32.mrf.mxu0 }
 0x702   :  { %v9624_v5 = vpop.f32.mrf.mxu0 }
 0x704   :  { %v1429_v6 = vpop.f32.mrf.mxu0 }
 0x705   :  { %v1486_v7 = vmul.f32 0.25, %v1429_v6 }
 0x706   :  { %v9635_v10 = vpop.f32.mrf.mxu0 }
 0x707   :  { %v1491_v11 = vsel %vm820_vm5, %v1486_v7, -inf }
 0x708   :  { %1492 = vmax.xlane.f32.xlu1 %v1491_v11  ;;  %v1432_v12 = vpop.f32.mrf.mxu0  ;;  %v1623_v11 = vsel %vm862_vm6, %v11358_v52, 0 }
 0x70a   :  { %v9636_v15 = vpop.f32.mrf.mxu0 }
 0x729   :  { %v11341_v16 = vpop.f32.mrf.mxu1 }
 0x72b   :  { %v9617_v17 = vpop.f32.mrf.mxu1 }
 0x72d   :  { %v1284_v18 = vpop.f32.mrf.mxu1 }
 0x72f   :  { %v9618_v19 = vpop.f32.mrf.mxu1 }
 0x731   :  { %v1379_v20 = vpop.f32.mrf.mxu1 }
 0x732   :  { %v1485_v21 = vmul.f32 0.25, %v1379_v20 }
 0x733   :  { %v9629_v22 = vpop.f32.mrf.mxu1 }
 0x734   :  { %v1488_v24 = vsel %vm820_vm5, %v1485_v21, -inf }
 0x735   :  { %1489 = vmax.xlane.f32.xlu0 %v1488_v24  ;;  %v1382_v25 = vpop.f32.mrf.mxu1 }
 0x737   :  { %v9630_v26 = vpop.f32.mrf.mxu1 }
 0x739   :  { %v1479_v28 = vpop.f32.mrf.mxu1 }
 0x73a   :  { %v1487_v8 = vmul.f32 0.25, %v1479_v28 }
 0x73b   :  { %v9641_v29 = vpop.f32.mrf.mxu1 }
 0x73c   :  { %v1494_v30 = vsel %vm820_vm5, %v1487_v8, -inf }
 0x73d   :  { %1495 = vmax.xlane.f32.xlu0 %v1494_v30  ;;  %v1482_v31 = vpop.f32.mrf.mxu1 }
 0x73f   :  { %v9642_v32 = vpop.f32.mrf.mxu1 }
 0x791   :  { %v1493_v33 = vpop.xlane.xlu1 %1492 }
 0x792   :  { %v1498_v35 = vsub.f32 %v1486_v7, %v1493_v33 }
 0x794   :  { %v1502_v36 = vmul.f32 1.442695, %v1498_v35 }
 0x796   :  { %10701 = vpow2.f32 %v1502_v36 }
 0x7a3   :  { %v10702_v37 = vpop.eup %10701 }
 0x7a4   :  { %v1509_v57 = vsel %vm820_vm5, %v10702_v37, 0.0 }
 0x7a5   :  { %1510 = vadd.xlane.f32.xlu1 %v1509_v57 }
 0x7b6   :  { %1666 = vrot.lane.b32.xlu1 %v11308_v42, %s10891_s1 }
 0x7be   :  { %v1490_v13 = vpop.xlane.xlu0 %1489 }
 0x7bf   :  { %v1497_v39 = vsub.f32 %v1485_v21, %v1490_v13 }
 0x7c1   :  { %v1500_v40 = vmul.f32 1.442695, %v1497_v39 }
 0x7c3   :  { %10703 = vpow2.f32 %v1500_v40 }
 0x7c6   :  { %v1496_v41 = vpop.xlane.xlu0 %1495 }
 0x7c7   :  { %v1499_v43 = vsub.f32 %v1487_v8, %v1496_v41 }
 0x7c9   :  { %v1504_v44 = vmul.f32 1.442695, %v1499_v43 }
 0x7cb   :  { %10705 = vpow2.f32 %v1504_v44 }
 0x7d0   :  { %v10704_v45 = vpop.eup %10703 }
 0x7d1   :  { %v1506_v46 = vsel %vm820_vm5, %v10704_v45, 0.0 }
 0x7d2   :  { %1507 = vadd.xlane.f32.xlu0 %v1506_v46 }
 0x7d8   :  { %v10706_v48 = vpop.eup %10705 }
 0x7d9   :  { %v1512_v50 = vsel %vm820_vm5, %v10706_v48, 0.0 }
 0x7da   :  { %1513 = vadd.xlane.f32.xlu1 %v1512_v50 }
 0x7e8   :  { %1668 = vrot.lane.b32.xlu0 %v11308_v42, %s10892_s29 }
 0x7eb   :  { %1719 = vrot.lane.b32.xlu1 %v11328_v56, %s10892_s29 }
 0x7ec   :  { %1717 = vrot.lane.b32.xlu0 %v11328_v56, %s10891_s1 }
 0x7ef   :  { %1770 = vrot.lane.b32.xlu1 %v11358_v52, %s10892_s29 }
 0x7f0   :  { %1768 = vrot.lane.b32.xlu0 %v11358_v52, %s10891_s1 }
 0x82e   :  { %v1511_v58 = vpop.xlane.xlu1 %1510 }
 0x82f   :  { %10707 = vrcp.f32 %v1511_v58 }
 0x832   :  { %v1667_v14 = vpop.permute.xlu1 %1666 }
 0x83c   :  { %v10708_v53 = vpop.eup %10707 }
 0x83d   :  { %v1519_v54 = vmul.f32 %v10708_v53, %v10702_v37 }
 0x83f   :  { %v1522_v55 = vpack.c.bf16 %v1519_v54, %v1519_v54 }
 0x841   :  { %9652 = vmatmul.mubr.msk.bf16.vlgmr.msra.gmra.mxu1 %vm820_vm5, %v1522_v55 }
 0x842   :  { %9663 = vmatprep.mubr.msk.bf16.mxu1 %vm10889_vm0, %v10888_v0 }
 0x85b   :  { %v1508_v60 = vpop.xlane.xlu0 %1507 }
 0x85c   :  { %10709 = vrcp.f32 %v1508_v60 }
 0x85f   :  { %v1669_v61 = vpop.permute.xlu0 %1668 }
 0x860   :  { %v1674_v63 = vsel %vm672_vm4, %v1669_v61, 0 }
 0x861   :  { %9662 = vmatpush3.bf16.xpose.msra.mxu1 %v1674_v63 }
 0x862   :  { %9673 = vmatprep.subr.bf16.mxu1 %v10888_v0 }
 0x863   :  { %v1514_v1 = vpop.xlane.xlu1 %1513  ;;  %v1718_v10 = vpop.permute.xlu0 %1717 }
 0x864   :  { %10711 = vrcp.f32 %v1514_v1 }
 0x867   :  { %v1720_v2 = vpop.permute.xlu1 %1719  ;;  %v1769_v17 = vpop.permute.xlu0 %1768 }
 0x868   :  { %9664 = vmatmul.mubr.msk.bf16.vlgmr.msra.gmra.mxu1 %vm672_vm4, %v1667_v14  ;;  %v1725_v19 = vsel %vm672_vm4, %v1720_v2, 0 }
 0x869   :  { %v10710_v9 = vpop.eup %10709  ;;  %9675 = vmatprep.mubr.msk.bf16.mxu1 %vm10889_vm0, %v10888_v0 }
 0x86a   :  { %v1518_v4 = vmul.f32 %v10710_v9, %v10704_v45 }
 0x86b   :  { %v1771_v5 = vpop.permute.xlu1 %1770 }
 0x86c   :  { %v1776_v6 = vsel %vm672_vm4, %v1771_v5, 0  ;;  %v1521_v7 = vpack.c.bf16 %v1518_v4, %v1518_v4 }
 0x86d   :  { %9674 = vmatpush3.bf16.xpose.msra.mxu1 %v1776_v6 }
 0x86e   :  { %9646 = vmatmul.mubr.msk.bf16.vlgmr.msra.gmra.mxu0 %vm820_vm5, %v1521_v7  ;;  %9685 = vmatprep.subr.bf16.mxu1 %v10888_v0 }
 0x86f   :  { %9656 = vmatpush3.bf16.msra.mxu0 %v1623_v11  ;;  %9657 = vmatprep.mubr.msk.bf16.mxu0 %vm10889_vm0, %v10888_v0 }
 0x870   :  { %9667 = vmatprep.subr.bf16.mxu0 %v10888_v0 }
 0x871   :  { %v10712_v12 = vpop.eup %10711 }
 0x872   :  { %v1520_v15 = vmul.f32 %v10712_v12, %v10706_v48 }
 0x874   :  { %9676 = vmatmul.mubr.msk.bf16.vlgmr.msra.gmra.mxu1 %vm672_vm4, %v1769_v17  ;;  %v1523_v18 = vpack.c.bf16 %v1520_v15, %v1520_v15 }
 0x875   :  { %9687 = vmatprep.mubr.msk.bf16.mxu1 %vm10889_vm0, %v10888_v0 }
 0x876   :  { %9658 = vmatmul.mubr.msk.bf16.vlgmr.msra.gmra.mxu0 %vm820_vm5, %v1523_v18 }
 0x877   :  { %9668 = vmatpush3.bf16.xpose.msra.mxu0 %v1725_v19  ;;  %9669 = vmatprep.mubr.msk.bf16.mxu0 %vm10889_vm0, %v10888_v0 }
 0x878   :  { %9679 = vmatprep.subr.bf16.mxu0 %v10888_v0 }
 0x87e   :  { %9670 = vmatmul.mubr.msk.bf16.vlgmr.msra.gmra.mxu0 %vm672_vm4, %v1718_v10 }
 0x87f   :  { %9681 = vmatprep.mubr.msk.bf16.mxu0 %vm10889_vm0, %v10888_v0 }
 0x901   :  { %v11391_v20 = vpop.f32.mrf.mxu1 }
 0x903   :  { %v9653_v21 = vpop.f32.mrf.mxu1 }
 0x905   :  { %v1616_v22 = vpop.f32.mrf.mxu1 }
 0x907   :  { %v9654_v24 = vpop.f32.mrf.mxu1 }
 0x928   :  { %v1710_v25 = vpop.f32.mrf.mxu1 }
 0x929   :  { %v1818_v26 = vmul.f32 0.25, %v1710_v25 }
 0x92a   :  { %v9665_v28 = vpop.f32.mrf.mxu1 }
 0x92b   :  { %v1821_v8 = vsel %vm820_vm5, %v1818_v26, -inf }
 0x92c   :  { %1822 = vmax.xlane.f32.xlu1 %v1821_v8  ;;  %v1713_v29 = vpop.f32.mrf.mxu1 }
 0x92e   :  { %v1567_v30 = vpop.f32.mrf.mxu0  ;;  %v9666_v31 = vpop.f32.mrf.mxu1 }
 0x92f   :  { %v10457_v31 = vld [vmem:[%s13188_s7 + $0x18] sm:$0xff]  }
 0x930   :  { %v9647_v32 = vpop.f32.mrf.mxu0 }
 0x931   :  { %v10458_v32 = vld [vmem:[%s13188_s7 + $0x10] sm:$0xff]  }
 0x932   :  { %v1570_v33 = vpop.f32.mrf.mxu0 }
 0x933   :  { %v10459_v33 = vld [vmem:[%s13188_s7 + $0x8] sm:$0xff]  }
 0x934   :  { %v9648_v35 = vpop.f32.mrf.mxu0  ;;  %v1812_v36 = vpop.f32.mrf.mxu1 }
 0x935   :  { %v1820_v48 = vmul.f32 0.25, %v1812_v36  ;;  %v10460_v35 = vld [vmem:[%s13188_s7] sm:$0xff]   ;;  %v10461_v36 = vld [vmem:[%s13188_s7 + $0x38] sm:$0xff]  }
 0x936   :  { %v11394_v37 = vpop.f32.mrf.mxu0  ;;  %v9677_v57 = vpop.f32.mrf.mxu1 }
 0x937   :  { %v1827_v54 = vsel %vm820_vm5, %v1820_v48, -inf  ;;  %v10462_v57 = vld [vmem:[%s13188_s7 + $0x30] sm:$0xff]  }
 0x938   :  { %v9659_v13 = vpop.f32.mrf.mxu0  ;;  %v1815_v39 = vpop.f32.mrf.mxu1 }
 0x93a   :  { %v1662_v40 = vpop.f32.mrf.mxu0  ;;  %v9678_v41 = vpop.f32.mrf.mxu1 }
 0x93b   :  { %v10464_v40 = vld [vmem:[%s13188_s7 + $0x28] sm:$0xff]  }
 0x93c   :  { %v9660_v43 = vpop.f32.mrf.mxu0 }
 0x93e   :  { %v1761_v44 = vpop.f32.mrf.mxu0 }
 0x93f   :  { %v1819_v45 = vmul.f32 0.25, %v1761_v44  ;;  %v10466_v44 = vld [vmem:[%s13188_s7 + $0x20] sm:$0xff]  }
 0x940   :  { %v9671_v46 = vpop.f32.mrf.mxu0 }
 0x941   :  { %v1824_v50 = vsel %vm820_vm5, %v1819_v45, -inf }
 0x942   :  { %1825 = vmax.xlane.f32.xlu0 %v1824_v50  ;;  %v1764_v58 = vpop.f32.mrf.mxu0 }
 0x944   :  { %v9672_v53 = vpop.f32.mrf.mxu0 }
 0x946   :  { %1828 = vmax.xlane.f32.xlu0 %v1827_v54 }
 0x9b5   :  { %v1823_v55 = vpop.xlane.xlu1 %1822 }
 0x9b6   :  { %v1830_v60 = vsub.f32 %v1818_v26, %v1823_v55 }
 0x9b8   :  { %v1833_v14 = vmul.f32 1.442695, %v1830_v60 }
 0x9ba   :  { %10713 = vpow2.f32 %v1833_v14 }
 0x9c7   :  { %v10714_v61 = vpop.eup %10713 }
 0x9c8   :  { %v1839_v63 = vsel %vm820_vm5, %v10714_v61, 0.0 }
 0x9c9   :  { %1840 = vadd.xlane.f32.xlu1 %v1839_v63 }
 0x9cb   :  { %v1826_v1 = vpop.xlane.xlu0 %1825 }
 0x9cc   :  { %v1831_v2 = vsub.f32 %v1819_v45, %v1826_v1 }
 0x9ce   :  { %v1835_v9 = vmul.f32 1.442695, %v1831_v2  ;;  %v10465_v2 = vld [vmem:[%s13188_s7 + $0x50] sm:$0xff]  }
 0x9cf   :  { %v1829_v4 = vpop.xlane.xlu0 %1828 }
 0x9d0   :  { %10715 = vpow2.f32 %v1835_v9  ;;  %v1832_v5 = vsub.f32 %v1820_v48, %v1829_v4  ;;  %v10468_v9 = vld [vmem:[%s13188_s7 + $0x40] sm:$0xff]  }
 0x9d2   :  { %v1837_v6 = vmul.f32 1.442695, %v1832_v5 }
 0x9d4   :  { %10717 = vpow2.f32 %v1837_v6 }
 0x9da   :  { %1857 = vrot.lane.b32.xlu1 %v11308_v42, %s13211_s0 }
 0x9dd   :  { %v10716_v7 = vpop.eup %10715 }
 0x9de   :  { %1953 = vrot.lane.b32.xlu1 %v11358_v52, %s13211_s0  ;;  %v1842_v10 = vsel %vm820_vm5, %v10716_v7, 0.0 }
 0x9df   :  { %1843 = vadd.xlane.f32.xlu0 %v1842_v10 }
 0x9e1   :  { %v10718_v11 = vpop.eup %10717 }
 0x9e2   :  { %2004 = vrot.lane.b32.xlu1 %v11336_v62, %s13207_s30  ;;  %v1845_v12 = vsel %vm820_vm5, %v10718_v11, 0.0 }
 0x9e3   :  { %1846 = vadd.xlane.f32.xlu0 %v1845_v12 }
 0x9e6   :  { %2016 = vrot.lane.b32.xlu1 %v1567_v30, %s13205_s13 }
 0x9ea   :  { %2006 = vrot.lane.b32.xlu1 %v11341_v16, %s13207_s30 }
 0x9f9   :  { %1905 = vrot.lane.b32.xlu0 %v11328_v56, %s13211_s0 }
 0xa52   :  { %v1841_v42 = vpop.xlane.xlu1 %1840 }
 0xa53   :  { %10719 = vrcp.f32 %v1841_v42 }
 0xa56   :  { %v1858_v52 = vpop.permute.xlu1 %1857 }
 0xa57   :  { %v1863_v15 = vsel %vm862_vm6, %v1858_v52, 0 }
 0xa58   :  { %9680 = vmatpush3.bf16.msra.mxu0 %v1863_v15 }
 0xa59   :  { %9691 = vmatprep.subr.bf16.mxu0 %v10888_v0 }
 0xa5a   :  { %v1954_v18 = vpop.permute.xlu1 %1953 }
 0xa5b   :  { %v1959_v21 = vsel %vm862_vm6, %v1954_v18, 0 }
 0xa5e   :  { %v2005_v54 = vpop.permute.xlu1 %2004 }
 0xa5f   :  { %v2037_v60 = vsel %vm672_vm4, %v11262_v34, %v2005_v54  ;;  %v10467_v34 = vld [vmem:[%s13188_s7 + $0x48] sm:$0xff]   ;;  %v10473_v54 = vld [vmem:[#allocation2 + $0x38] sm:$0xff]  }
 0xa60   :  { %v10720_v62 = vpop.eup %10719 }
 0xa61   :  { %v1851_v17 = vmul.f32 %v10720_v62, %v10714_v61 }
 0xa62   :  { %v2017_v55 = vpop.permute.xlu1 %2016 }
 0xa63   :  { %v1854_v19 = vpack.c.bf16 %v1851_v17, %v1851_v17  ;;  %v2041_v14 = vsel %vm2040_vm7, %v2037_v60, %v2017_v55  ;;  %v10474_v55 = vld [vmem:[#allocation2 + $0x30] sm:$0xff]   ;;  %v10476_v60 = vld [vmem:[#allocation2 + $0x28] sm:$0xff]  }
 0xa65   :  { %9682 = vmatmul.mubr.msk.bf16.vlgmr.msra.gmra.mxu0 %vm820_vm5, %v1854_v19 }
 0xa66   :  { %9692 = vmatpush3.bf16.msra.mxu0 %v1959_v21  ;;  %9693 = vmatprep.mubr.msk.bf16.mxu0 %vm10889_vm0, %v10888_v0  ;;  %v2007_v5 = vpop.permute.xlu1 %2006 }
 0xa67   :  { %9709 = vmatprep.subr.bf16.mxu0 %v10888_v0  ;;  %v2038_v6 = vsel %vm672_vm4, %v11264_v38, %v2007_v5 }
 0xa68   :  { %v1844_v56 = vpop.xlane.xlu0 %1843 }
 0xa69   :  { %10721 = vrcp.f32 %v1844_v56 }
 0xa6c   :  { %v1847_v16 = vpop.xlane.xlu0 %1846 }
 0xa6d   :  { %10723 = vrcp.f32 %v1847_v16 }
 0xa70   :  { %v1906_v22 = vpop.permute.xlu0 %1905 }
 0xa71   :  { %v1911_v24 = vsel %vm862_vm6, %v1906_v22, 0 }
 0xa72   :  { %9686 = vmatpush3.bf16.msra.mxu1 %v1911_v24 }
 0xa73   :  { %9697 = vmatprep.subr.bf16.mxu1 %v10888_v0 }
 0xa76   :  { %v10722_v25 = vpop.eup %10721 }
 0xa77   :  { %v1852_v26 = vmul.f32 %v10722_v25, %v10716_v7 }
 0xa79   :  { %v1855_v28 = vpack.c.bf16 %v1852_v26, %v1852_v26 }
 0xa7a   :  { %v10724_v8 = vpop.eup %10723 }
 0xa7b   :  { %9688 = vmatmul.mubr.msk.bf16.vlgmr.msra.gmra.mxu1 %vm820_vm5, %v1855_v28  ;;  %v1853_v29 = vmul.f32 %v10724_v8, %v10718_v11  ;;  %v8623_v8 = vld [vmem:[%s13189_s8 + $0x1] ss:$0 sm:$0xff] }
 0xa7c   :  { %9705 = vmatprep.mubr.msk.bf16.mxu1 %vm10889_vm0, %v10888_v0  ;;  %9698 = vmatpush3.bf16.msra.mxu1 %v10457_v31 }
 0xa7d   :  { %v1856_v30 = vpack.c.bf16 %v1853_v29, %v1853_v29  ;;  %9699 = vmatprep.subr.bf16.mxu1 %v10888_v0 }
 0xa7f   :  { %9694 = vmatmul.mubr.msk.bf16.vlgmr.msra.gmra.mxu0 %vm820_vm5, %v1856_v30 }
 0xa80   :  { %9717 = vmatprep.mubr.msk.bf16.mxu0 %vm10889_vm0, %v10888_v0  ;;  %9700 = vmatpush3.bf16.msra.mxu1 %v10458_v32  ;;  %v10469_v32 = vld [vmem:[#allocation2 + $0x18] sm:$0xff]  }
 0xa81   :  { %9701 = vmatprep.subr.bf16.mxu1 %v10888_v0  ;;  %9710 = vmatpush3.bf16.msra.mxu0 %v10461_v36 }
 0xa82   :  { %9711 = vmatprep.subr.bf16.mxu0 %v10888_v0 }
 0xa84   :  { %9702 = vmatpush3.bf16.msra.mxu1 %v10459_v33 }
 0xa85   :  { %9703 = vmatprep.subr.bf16.mxu1 %v10888_v0  ;;  %9712 = vmatpush3.bf16.msra.mxu0 %v10462_v57  ;;  %v10470_v57 = vld [vmem:[#allocation2 + $0x10] sm:$0xff]  }
 0xa86   :  { %9713 = vmatprep.subr.bf16.mxu0 %v10888_v0 }
 0xa88   :  { %9704 = vmatpush3.bf16.msra.mxu1 %v10460_v35  ;;  %v8624_v35 = vld [vmem:[%s13189_s8 + $0x2] ss:$0 sm:$0xff] }
 0xa89   :  { %9721 = vmatprep.subr.bf16.mxu1 %v10888_v0  ;;  %9714 = vmatpush3.bf16.msra.mxu0 %v10464_v40 }
 0xa8a   :  { %9715 = vmatprep.subr.bf16.mxu0 %v10888_v0 }
 0xa8d   :  { %9716 = vmatpush3.bf16.msra.mxu0 %v10466_v44 }
 0xa8e   :  { %9733 = vmatprep.subr.bf16.mxu0 %v10888_v0 }
 0xb25   :  { %v1899_v13 = vpop.f32.mrf.mxu0 }
 0xb26   :  { %2028 = vrot.lane.b32.xlu0 %v1899_v13, %s13209_s4 }
 0xb27   :  { %v9683_v39 = vpop.f32.mrf.mxu0 }
 0xb29   :  { %v1902_v41 = vpop.f32.mrf.mxu0 }
 0xb2a   :  { %2018 = vrot.lane.b32.xlu0 %v11391_v20, %s13205_s13 }
 0xb2b   :  { %v9684_v43 = vpop.f32.mrf.mxu0 }
 0xb2e   :  { %2008 = vrot.lane.b32.xlu0 %v11338_v3, %s13207_s30 }
 0xb3b   :  { %v1947_v45 = vpop.f32.mrf.mxu1 }
 0xb3c   :  { %2030 = vrot.lane.b32.xlu1 %v1947_v45, %s13209_s4 }
 0xb3d   :  { %v9689_v46 = vpop.f32.mrf.mxu1 }
 0xb3f   :  { %v1950_v48 = vpop.f32.mrf.mxu1  ;;  %v1995_v20 = vpop.f32.mrf.mxu0 }
 0xb40   :  { %2032 = vrot.lane.b32.xlu0 %v1995_v20, %s13209_s4  ;;  %2020 = vrot.lane.b32.xlu1 %v11394_v37, %s13205_s13  ;;  %v10463_v37 = vld [vmem:[%s13188_s7 + $0x58] sm:$0xff]  }
 0xb41   :  { %v9690_v50 = vpop.f32.mrf.mxu1  ;;  %v9695_v3 = vpop.f32.mrf.mxu0 }
 0xb43   :  { %v1998_v58 = vpop.f32.mrf.mxu0 }
 0xb45   :  { %v9696_v53 = vpop.f32.mrf.mxu0 }
 0xb46   :  { %v10471_v53 = vld [vmem:[#allocation2 + $0x8] sm:$0xff]  }
 0xb98   :  { %v2029_v61 = vpop.permute.xlu0 %2028 }
 0xb99   :  { %v2045_v63 = vsel %vm2044_vm8, %v2041_v14, %v2029_v61  ;;  %v10478_v14 = vld [vmem:[#allocation2 + $0x20] sm:$0xff]  }
 0xb9a   :  { %v2048_v1 = vpack.c.bf16 %v2045_v63, %v2045_v63 }
 0xb9c   :  { %9706 = vmatmul.mubr.msk.bf16.vlgmr.msra.gmra.mxu1 %vm156_vm3, %v2048_v1  ;;  %v2019_v4 = vpop.permute.xlu0 %2018 }
 0xb9d   :  { %9722 = vmatpush3.bf16.msra.mxu1 %v10463_v37  ;;  %9729 = vmatprep.mubr.msk.bf16.mxu1 %vm10889_vm0, %v10888_v0  ;;  %v2042_v7 = vsel %vm2040_vm7, %v2038_v6, %v2019_v4 }
 0xb9e   :  { %9723 = vmatprep.subr.bf16.mxu1 %v10888_v0 }
 0xba0   :  { %v2009_v10 = vpop.permute.xlu0 %2008 }
 0xba1   :  { %9724 = vmatpush3.bf16.msra.mxu1 %v10465_v2  ;;  %v2039_v52 = vsel %vm672_vm4, %v11272_v59, %v2009_v10  ;;  %v8622_v59 = vld [vmem:[%s13189_s8] ss:$0 sm:$0xff] }
 0xba2   :  { %9725 = vmatprep.subr.bf16.mxu1 %v10888_v0 }
 0xba5   :  { %9726 = vmatpush3.bf16.msra.mxu1 %v10467_v34 }
 0xba6   :  { %9727 = vmatprep.subr.bf16.mxu1 %v10888_v0 }
 0xba9   :  { %9728 = vmatpush3.bf16.msra.mxu1 %v10468_v9 }
 0xbaa   :  { %9745 = vmatprep.subr.bf16.mxu1 %v10888_v0 }
 0xbae   :  { %v2031_v11 = vpop.permute.xlu1 %2030 }
 0xbaf   :  { %v2046_v12 = vsel %vm2044_vm8, %v2042_v7, %v2031_v11  ;;  %v8640_v7 = vld [vmem:[%s13190_s9] ss:$0 sm:$0xff] }
 0xbb0   :  { %v2049_v42 = vpack.c.bf16 %v2046_v12, %v2046_v12 }
 0xbb2   :  { %v2021_v15 = vpop.permute.xlu1 %2020  ;;  %9718 = vmatmul.mubr.msk.bf16.vlgmr.msra.gmra.mxu0 %vm156_vm3, %v2049_v42  ;;  %v2033_v62 = vpop.permute.xlu0 %2032  ;;  %v8643_v42 = vld [vmem:[%s13191_s10] ss:$0 sm:$0xff] }
 0xbb3   :  { %v2043_v17 = vsel %vm2040_vm7, %v2039_v52, %v2021_v15  ;;  %9741 = vmatprep.mubr.msk.bf16.mxu0 %vm10889_vm0, %v10888_v0  ;;  %9734 = vmatpush3.bf16.msra.mxu0 %v10469_v32  ;;  %v8641_v32 = vld [vmem:[%s13190_s9 + $0x1] ss:$0 sm:$0xff] }
 0xbb4   :  { %v2047_v38 = vsel %vm2044_vm8, %v2043_v17, %v2033_v62  ;;  %9735 = vmatprep.subr.bf16.mxu0 %v10888_v0 }
 0xbb5   :  { %v2050_v18 = vpack.c.bf16 %v2047_v38, %v2047_v38 }
 0xbb7   :  { %9730 = vmatmul.mubr.msk.bf16.vlgmr.msra.gmra.mxu1 %vm156_vm3, %v2050_v18  ;;  %9736 = vmatpush3.bf16.msra.mxu0 %v10470_v57 }
 0xbb8   :  { %9753 = vmatprep.mubr.msk.bf16.mxu1 %vm10889_vm0, %v10888_v0  ;;  %9737 = vmatprep.subr.bf16.mxu0 %v10888_v0 }
 0xbb9   :  { %9746 = vmatpush3.bf16.msra.mxu1 %v10473_v54  ;;  %v10486_v54 = vld [vmem:[%s13196_s15 + $0x10] sm:$0xff]  }
 0xbba   :  { %9747 = vmatprep.subr.bf16.mxu1 %v10888_v0 }
 0xbbb   :  { %9738 = vmatpush3.bf16.msra.mxu0 %v10471_v53  ;;  %v10484_v53 = vld [vmem:[%s13196_s15 + $0x20] sm:$0xff]  }
 0xbbc   :  { %9739 = vmatprep.subr.bf16.mxu0 %v10888_v0 }
 0xbbd   :  { %9748 = vmatpush3.bf16.msra.mxu1 %v10474_v55  ;;  %v10488_v55 = vld [vmem:[%s13196_s15 + $0x8] sm:$0xff]  }
 0xbbe   :  { %9749 = vmatprep.subr.bf16.mxu1 %v10888_v0 }
 0xbc1   :  { %9750 = vmatpush3.bf16.msra.mxu1 %v10476_v60  ;;  %v10489_v60 = vld [vmem:[%s13196_s15 + $0x70] sm:$0xff]  }
 0xbc2   :  { %9751 = vmatprep.subr.bf16.mxu1 %v10888_v0 }
 0xbc5   :  { %9752 = vmatpush3.bf16.msra.mxu1 %v10478_v14  ;;  %v10490_v14 = vld [vmem:[%s13196_s15] sm:$0xff]  }
 0xbc6   :  { %9769 = vmatprep.subr.bf16.mxu1 %v10888_v0 }
 0xc5c   :  { %v2130_v19 = vpop.f32.mrf.mxu1 }
 0xc5d   :  { %v2131_v21 = vadd.f32 %v8622_v59, %v2130_v19  ;;  %v10475_v19 = vld [vmem:[#allocation2 + $0x58] sm:$0xff]  }
 0xc5e   :  { %v9707_v56 = vpop.f32.mrf.mxu1 }
 0xc5f   :  { %v11509_v16 = vadd.f32 %v2131_v21, %v11095_v27 }
 0xc60   :  { %v2133_v22 = vpop.f32.mrf.mxu1 }
 0xc61   :  { %v2273_v24 = vsel %vm156_vm3, %v11509_v16, 0.0  ;;  %v2286_v25 = vmul.f32 %v11509_v16, %v11509_v16 }
 0xc62   :  { %2274 = vadd.xlane.f32.xlu1 %v2273_v24  ;;  %v9708_v26 = vpop.f32.mrf.mxu1 }
 0xc63   :  { %v2289_v28 = vsel %vm156_vm3, %v2286_v25, 0.0  ;;  %v10477_v26 = vld [vmem:[#allocation2 + $0x50] sm:$0xff]  }
 0xc64   :  { %2290 = vadd.xlane.f32.xlu0 %v2289_v28 }
 0xc72   :  { %v2197_v29 = vpop.f32.mrf.mxu0 }
 0xc73   :  { %v2198_v30 = vadd.f32 %v8623_v8, %v2197_v29  ;;  %v10479_v8 = vld [vmem:[#allocation2 + $0x48] sm:$0xff]   ;;  %v10480_v29 = vld [vmem:[#allocation2 + $0x40] sm:$0xff]  }
 0xc74   :  { %v9719_v31 = vpop.f32.mrf.mxu0 }
 0xc75   :  { %v11520_v33 = vadd.f32 %v2198_v30, %v11095_v27 }
 0xc76   :  { %v2200_v36 = vpop.f32.mrf.mxu0 }
 0xc77   :  { %v2264_v13 = vpop.f32.mrf.mxu1  ;;  %v2276_v39 = vsel %vm156_vm3, %v11520_v33, 0.0  ;;  %v2287_v40 = vmul.f32 %v11520_v33, %v11520_v33  ;;  %v8644_v36 = vld [vmem:[%s13191_s10 + $0x1] ss:$0 sm:$0xff] }
 0xc78   :  { %v2265_v41 = vadd.f32 %v8624_v35, %v2264_v13  ;;  %2277 = vadd.xlane.f32.xlu0 %v2276_v39  ;;  %v9720_v43 = vpop.f32.mrf.mxu0 }
 0xc79   :  { %v9731_v44 = vpop.f32.mrf.mxu1  ;;  %v2292_v45 = vsel %vm156_vm3, %v2287_v40, 0.0  ;;  %v10481_v43 = vld [vmem:[%s13196_s15 + $0x38] sm:$0xff]  }
 0xc7a   :  { %v11532_v46 = vadd.f32 %v2265_v41, %v11095_v27  ;;  %2293 = vadd.xlane.f32.xlu1 %v2292_v45  ;;  %v10472_v27 = vld [vmem:[#allocation2] sm:$0xff]  }
 0xc7b   :  { %v2267_v48 = vpop.f32.mrf.mxu1  ;;  %9740 = vmatpush3.bf16.msra.mxu0 %v10472_v27  ;;  %v8645_v45 = vld [vmem:[%s13191_s10 + $0x2] ss:$0 sm:$0xff]  ;;  %v10485_v27 = vld [vmem:[%s13196_s15 + $0x18] sm:$0xff]  }
 0xc7c   :  { %v2279_v20 = vsel %vm156_vm3, %v11532_v46, 0.0  ;;  %v2288_v50 = vmul.f32 %v11532_v46, %v11532_v46  ;;  %9757 = vmatprep.subr.bf16.mxu0 %v10888_v0 }
 0xc7d   :  { %2280 = vadd.xlane.f32.xlu0 %v2279_v20  ;;  %v9732_v3 = vpop.f32.mrf.mxu1  ;;  %v10482_v20 = vld [vmem:[%s13196_s15 + $0x30] sm:$0xff]  }
 0xc7e   :  { %v2295_v58 = vsel %vm156_vm3, %v2288_v50, 0.0  ;;  %v10487_v50 = vld [vmem:[%s13196_s15 + $0x78] sm:$0xff]  }
 0xc7f   :  { %2296 = vadd.xlane.f32.xlu1 %v2295_v58  ;;  %v10483_v58 = vld [vmem:[%s13196_s15 + $0x28] sm:$0xff]  }
 0xceb   :  { %v2275_v61 = vpop.xlane.xlu1 %2274 }
 0xcec   :  { %v2283_v63 = vmul.f32 0.015625, %v2275_v61  ;;  %v10491_v61 = vld [vmem:[%s13196_s15 + $0x68] sm:$0xff]  }
 0xced   :  { %v2291_v37 = vpop.xlane.xlu0 %2290 }
 0xcee   :  { %v2301_v1 = vmul.f32 %v2283_v63, %v2283_v63  ;;  %v2298_v2 = vmul.f32 0.015625, %v2291_v37  ;;  %v2307_v4 = vsub.f32 %v11509_v16, %v2283_v63  ;;  %v10493_v63 = vld [vmem:[%s13196_s15 + $0x60] sm:$0xff]   ;;  %v10495_v37 = vld [vmem:[%s13196_s15 + $0x58] sm:$0xff]  }
 0xcf0   :  { %v2304_v34 = vsub.f32 %v2298_v2, %v2301_v1  ;;  %v10497_v1 = vld [vmem:[%s13196_s15 + $0x50] sm:$0xff]   ;;  %v10499_v2 = vld [vmem:[%s13196_s15 + $0x48] sm:$0xff]  }
 0xcf2   :  { %v2310_v9 = vadd.f32 1e-05, %v2304_v34  ;;  %v10501_v34 = vld [vmem:[%s13196_s15 + $0x40] sm:$0xff]  }
 0xcf4   :  { %10725 = vrsqrt.f32 %v2310_v9  ;;  %v8646_v9 = vld [vmem:[%s13195_s14] ss:$0 sm:$0xff] }
 0xd01   :  { %v10726_v5 = vpop.eup %10725  ;;  %v2278_v6 = vpop.xlane.xlu0 %2277 }
 0xd02   :  { %v2284_v10 = vmul.f32 0.015625, %v2278_v6  ;;  %v2316_v11 = vmul.f32 %v10726_v5, %v2307_v4 }
 0xd03   :  { %v2294_v12 = vpop.xlane.xlu1 %2293 }
 0xd04   :  { %v2302_v52 = vmul.f32 %v2284_v10, %v2284_v10  ;;  %v2299_v15 = vmul.f32 0.015625, %v2294_v12  ;;  %v2337_v62 = vmul.f32 %v8640_v7, %v2316_v11  ;;  %v2308_v30 = vsub.f32 %v11520_v33, %v2284_v10  ;;  %v8642_v33 = vld [vmem:[%s13190_s9 + $0x2] ss:$0 sm:$0xff]  ;;  %v10492_v11 = vld [vmem:[%s13196_s15 + $0xb8] sm:$0xff]  }
 0xd06   :  { %v2305_v17 = vsub.f32 %v2299_v15, %v2302_v52  ;;  %v2281_v38 = vpop.xlane.xlu0 %2280  ;;  %v11553_v18 = vadd.f32 %v8643_v42, %v2337_v62  ;;  %v10494_v52 = vld [vmem:[%s13196_s15 + $0xb0] sm:$0xff]   ;;  %v10496_v15 = vld [vmem:[%s13196_s15 + $0xa8] sm:$0xff]   ;;  %v10498_v62 = vld [vmem:[%s13196_s15 + $0xa0] sm:$0xff]  }
 0xd07   :  { %v2285_v59 = vmul.f32 0.015625, %v2281_v38  ;;  %v10500_v38 = vld [vmem:[%s13196_s15 + $0x98] sm:$0xff]  }
 0xd08   :  { %v2311_v21 = vadd.f32 1e-05, %v2305_v17  ;;  %v2297_v56 = vpop.xlane.xlu1 %2296  ;;  %v2361_v16 = vpack.c.bf16 %v11553_v18, %v11553_v18  ;;  %v8647_v17 = vld [vmem:[%s13195_s14 + $0x1] ss:$0 sm:$0xff] }
 0xd09   :  { %v2303_v22 = vmul.f32 %v2285_v59, %v2285_v59  ;;  %v2300_v24 = vmul.f32 0.015625, %v2297_v56  ;;  %v2309_v13 = vsub.f32 %v11532_v46, %v2285_v59  ;;  %v10502_v56 = vld [vmem:[%s13196_s15 + $0x90] sm:$0xff]  }
 0xd0a   :  { %10727 = vrsqrt.f32 %v2311_v21  ;;  %9742 = vmatmul.mubr.msk.bf16.vlgmr.msra.gmra.mxu0 %vm156_vm3, %v2361_v16 }
 0xd0b   :  { %v2306_v25 = vsub.f32 %v2300_v24, %v2303_v22  ;;  %9758 = vmatpush3.bf16.msra.mxu0 %v10475_v19  ;;  %9765 = vmatprep.mubr.msk.bf16.mxu0 %vm10889_vm0, %v10888_v0  ;;  %v8648_v24 = vld [vmem:[%s13195_s14 + $0x2] ss:$0 sm:$0xff] }
 0xd0c   :  { %9759 = vmatprep.subr.bf16.mxu0 %v10888_v0 }
 0xd0d   :  { %v2312_v28 = vadd.f32 1e-05, %v2306_v25 }
 0xd0f   :  { %10729 = vrsqrt.f32 %v2312_v28  ;;  %9760 = vmatpush3.bf16.msra.mxu0 %v10477_v26 }
 0xd10   :  { %9761 = vmatprep.subr.bf16.mxu0 %v10888_v0 }
 0xd13   :  { %9762 = vmatpush3.bf16.msra.mxu0 %v10479_v8  ;;  %v10503_v8 = vld [vmem:[%s13196_s15 + $0x88] sm:$0xff]  }
 0xd14   :  { %9763 = vmatprep.subr.bf16.mxu0 %v10888_v0 }
 0xd17   :  { %v10728_v31 = vpop.eup %10727  ;;  %9764 = vmatpush3.bf16.msra.mxu0 %v10480_v29 }
 0xd18   :  { %v2317_v35 = vmul.f32 %v10728_v31, %v2308_v30  ;;  %9789 = vmatprep.subr.bf16.mxu0 %v10888_v0 }
 0xd1a   :  { %v2338_v57 = vmul.f32 %v8641_v32, %v2317_v35  ;;  %v10504_v32 = vld [vmem:[%s13196_s15 + $0x80] sm:$0xff]  }
 0xd1c   :  { %v10730_v39 = vpop.eup %10729  ;;  %v11572_v40 = vadd.f32 %v8644_v36, %v2338_v57 }
 0xd1d   :  { %v2318_v41 = vmul.f32 %v10730_v39, %v2309_v13  ;;  %v8664_v13 = vld [vmem:[%s13197_s16] ss:$0 sm:$0xff] }
 0xd1e   :  { %v2362_v44 = vpack.c.bf16 %v11572_v40, %v11572_v40 }
 0xd1f   :  { %v2339_v46 = vmul.f32 %v8642_v33, %v2318_v41 }
 0xd20   :  { %9754 = vmatmul.mubr.msk.bf16.vlgmr.msra.gmra.mxu1 %vm156_vm3, %v2362_v44 }
 0xd21   :  { %v11586_v48 = vadd.f32 %v8645_v45, %v2339_v46  ;;  %9770 = vmatpush3.bf16.msra.mxu1 %v10481_v43  ;;  %9785 = vmatprep.mubr.msk.bf16.mxu1 %vm10889_vm0, %v10888_v0 }
 0xd22   :  { %9771 = vmatprep.subr.bf16.mxu1 %v10888_v0 }
 0xd23   :  { %v2363_v3 = vpack.c.bf16 %v11586_v48, %v11586_v48 }
 0xd25   :  { %9766 = vmatmul.mubr.msk.bf16.vlgmr.msra.gmra.mxu0 %vm156_vm3, %v2363_v3  ;;  %9772 = vmatpush3.bf16.msra.mxu1 %v10482_v20  ;;  %v8665_v3 = vld [vmem:[%s13197_s16 + $0x1] ss:$0 sm:$0xff] }
 0xd26   :  { %9773 = vmatprep.subr.bf16.mxu1 %v10888_v0  ;;  %9790 = vmatpush3.bf16.msra.mxu0 %v10487_v50 }
 0xd27   :  { %9791 = vmatprep.subr.bf16.mxu0 %v10888_v0  ;;  %9805 = vmatprep.mubr.msk.bf16.mxu0 %vm10889_vm0, %v10888_v0 }
 0xd29   :  { %9774 = vmatpush3.bf16.msra.mxu1 %v10483_v58 }
 0xd2a   :  { %9775 = vmatprep.subr.bf16.mxu1 %v10888_v0  ;;  %9792 = vmatpush3.bf16.msra.mxu0 %v10489_v60  ;;  %v10510_v60 = vld [vmem:[%s13222_s26 + $0xe4] ss:$8 sps:$4 sm:$0xff]  }
 0xd2b   :  { %9793 = vmatprep.subr.bf16.mxu0 %v10888_v0 }
 0xd2d   :  { %9776 = vmatpush3.bf16.msra.mxu1 %v10484_v53 }
 0xd2e   :  { %9777 = vmatprep.subr.bf16.mxu1 %v10888_v0  ;;  %9794 = vmatpush3.bf16.msra.mxu0 %v10491_v61 }
 0xd2f   :  { %9795 = vmatprep.subr.bf16.mxu0 %v10888_v0 }
 0xd31   :  { %9778 = vmatpush3.bf16.msra.mxu1 %v10485_v27  ;;  %v10505_v27 = vld [vmem:[%s13222_s26 + $0xf0] ss:$8 sps:$4 sm:$0xff]  }
 0xd32   :  { %9779 = vmatprep.subr.bf16.mxu1 %v10888_v0  ;;  %9796 = vmatpush3.bf16.msra.mxu0 %v10493_v63 }
 0xd33   :  { %9797 = vmatprep.subr.bf16.mxu0 %v10888_v0 }
 0xd35   :  { %9780 = vmatpush3.bf16.msra.mxu1 %v10486_v54  ;;  %v10507_v54 = vld [vmem:[%s13222_s26 + $0xf4] ss:$8 sps:$4 sm:$0xff]  }
 0xd36   :  { %9781 = vmatprep.subr.bf16.mxu1 %v10888_v0  ;;  %9798 = vmatpush3.bf16.msra.mxu0 %v10495_v37  ;;  %v10508_v37 = vld [vmem:[%s13222_s26 + $0xe0] ss:$8 sps:$4 sm:$0xff]  }
 0xd37   :  { %9799 = vmatprep.subr.bf16.mxu0 %v10888_v0 }
 0xd39   :  { %9782 = vmatpush3.bf16.msra.mxu1 %v10488_v55 }
 0xd3a   :  { %9783 = vmatprep.subr.bf16.mxu1 %v10888_v0  ;;  %9800 = vmatpush3.bf16.msra.mxu0 %v10497_v1 }
 0xd3b   :  { %9801 = vmatprep.subr.bf16.mxu0 %v10888_v0 }
 0xd3d   :  { %9784 = vmatpush3.bf16.msra.mxu1 %v10490_v14 }
 0xd3e   :  { %9809 = vmatprep.subr.bf16.mxu1 %v10888_v0  ;;  %9802 = vmatpush3.bf16.msra.mxu0 %v10499_v2  ;;  %v8666_v2 = vld [vmem:[%s13197_s16 + $0x2] ss:$0 sm:$0xff] }
 0xd3f   :  { %9803 = vmatprep.subr.bf16.mxu0 %v10888_v0 }
 0xd42   :  { %9804 = vmatpush3.bf16.msra.mxu0 %v10501_v34 }
 0xd43   :  { %3204 = vmatprep.subr.bf16.mxu0 %v10507_v54  ;;  %v10525_v54 = vld [vmem:[%s13222_s26 + $0x114] ss:$8 sps:$4 sm:$0xff]  }
 0xdca   :  { %v2443_v4 = vpop.f32.mrf.mxu0 }
 0xdcb   :  { %v2444_v5 = vadd.f32 %v8646_v9, %v2443_v4 }
 0xdcc   :  { %v9743_v6 = vpop.f32.mrf.mxu0 }
 0xdcd   :  { %v2583_v7 = vmax.f32 %v2444_v5, 0.0 }
 0xdce   :  { %v2446_v10 = vpop.f32.mrf.mxu0 }
 0xdcf   :  { %v2586_v12 = vpack.c.bf16 %v2583_v7, %v2583_v7 }
 0xdd0   :  { %v9744_v42 = vpop.f32.mrf.mxu0 }
 0xdd1   :  { %9786 = vmatmul.mubr.bf16.vlgmr.msra.gmra.mxu1 %v2586_v12  ;;  %v10511_v42 = vld [vmem:[%s13222_s26 + $0xd0] ss:$8 sps:$4 sm:$0xff]  }
 0xdd2   :  { %9810 = vmatpush3.bf16.msra.mxu1 %v10492_v11  ;;  %9825 = vmatprep.mubr.msk.bf16.mxu1 %vm10889_vm0, %v10888_v0  ;;  %v10513_v11 = vld [vmem:[%s13222_s26 + $0xd4] ss:$8 sps:$4 sm:$0xff]  }
 0xdd3   :  { %9811 = vmatprep.subr.bf16.mxu1 %v10888_v0 }
 0xdd6   :  { %9812 = vmatpush3.bf16.msra.mxu1 %v10494_v52  ;;  %v10516_v52 = vld [vmem:[%s13222_s26 + $0xc4] ss:$8 sps:$4 sm:$0xff]  }
 0xdd7   :  { %9813 = vmatprep.subr.bf16.mxu1 %v10888_v0 }
 0xdda   :  { %9814 = vmatpush3.bf16.msra.mxu1 %v10496_v15  ;;  %v10514_v15 = vld [vmem:[%s13222_s26 + $0xc0] ss:$8 sps:$4 sm:$0xff]  }
 0xddb   :  { %9815 = vmatprep.subr.bf16.mxu1 %v10888_v0 }
 0xdde   :  { %9816 = vmatpush3.bf16.msra.mxu1 %v10498_v62  ;;  %v10519_v62 = vld [vmem:[%s13222_s26 + $0x134] ss:$8 sps:$4 sm:$0xff]  }
 0xddf   :  { %9817 = vmatprep.subr.bf16.mxu1 %v10888_v0 }
 0xde0   :  { %v2510_v59 = vpop.f32.mrf.mxu1 }
 0xde1   :  { %v2511_v19 = vadd.f32 %v8647_v17, %v2510_v59  ;;  %v10526_v17 = vld [vmem:[%s13222_s26 + $0x170] ss:$8 sps:$4 sm:$0xff]   ;;  %v10534_v59 = vld [vmem:[%s13222_s26 + $0x164] ss:$8 sps:$4 sm:$0xff]  }
 0xde2   :  { %9818 = vmatpush3.bf16.msra.mxu1 %v10500_v38  ;;  %v9755_v21 = vpop.f32.mrf.mxu1  ;;  %v10528_v38 = vld [vmem:[%s13222_s26 + $0x174] ss:$8 sps:$4 sm:$0xff]  }
 0xde3   :  { %v2584_v16 = vmax.f32 %v2511_v19, 0.0  ;;  %9819 = vmatprep.subr.bf16.mxu1 %v10888_v0  ;;  %v10532_v19 = vld [vmem:[%s13222_s26 + $0x160] ss:$8 sps:$4 sm:$0xff]   ;;  %v10535_v21 = vld [vmem:[%s13222_s26 + $0x150] ss:$8 sps:$4 sm:$0xff]  }
 0xde4   :  { %v2513_v22 = vpop.f32.mrf.mxu1 }
 0xde5   :  { %v2587_v25 = vpack.c.bf16 %v2584_v16, %v2584_v16  ;;  %v2577_v26 = vpop.f32.mrf.mxu0  ;;  %v10540_v16 = vld [vmem:[%s13222_s26 + $0x144] ss:$8 sps:$4 sm:$0xff]   ;;  %v10538_v22 = vld [vmem:[%s13222_s26 + $0x140] ss:$8 sps:$4 sm:$0xff]  }
 0xde6   :  { %9820 = vmatpush3.bf16.msra.mxu1 %v10502_v56  ;;  %v9756_v28 = vpop.f32.mrf.mxu1  ;;  %v2578_v29 = vadd.f32 %v8648_v24, %v2577_v26  ;;  %v10537_v56 = vld [vmem:[%s13222_s26 + $0x154] ss:$8 sps:$4 sm:$0xff]  }
 0xde7   :  { %v9767_v30 = vpop.f32.mrf.mxu0  ;;  %9806 = vmatmul.mubr.bf16.vlgmr.msra.gmra.mxu0 %v2587_v25  ;;  %9821 = vmatprep.subr.bf16.mxu1 %v10888_v0 }
 0xde8   :  { %3228 = vmatprep.mubr.bf16.mxu0 %v10890_v23  ;;  %v2585_v35 = vmax.f32 %v2578_v29, 0.0  ;;  %3205 = vmatpush1.bf16.msra.mxu0 %v10505_v27 }
 0xde9   :  { %v2580_v31 = vpop.f32.mrf.mxu0  ;;  %3206 = vmatprep.subr.bf16.mxu0 %v10510_v60 }
 0xdea   :  { %9822 = vmatpush3.bf16.msra.mxu1 %v10503_v8  ;;  %v2588_v57 = vpack.c.bf16 %v2585_v35, %v2585_v35 }
 0xdeb   :  { %v9768_v36 = vpop.f32.mrf.mxu0  ;;  %9823 = vmatprep.subr.bf16.mxu1 %v10888_v0 }
 0xdec   :  { %3207 = vmatpush1.bf16.msra.mxu0 %v10508_v37  ;;  %v8691_v36 = vld [vmem:[%s13192_s11] ss:$0 sm:$0xff] }
 0xded   :  { %3208 = vmatprep.subr.bf16.mxu0 %v10513_v11 }
 0xdee   :  { %9824 = vmatpush3.bf16.msra.mxu1 %v10504_v32 }
 0xdef   :  { %3372 = vmatprep.subr.bf16.mxu1 %v10528_v38  ;;  %v11850_v38 = vld [vmem:[%s13187_s6 + $0x6] sm:$0x3] }
 0xdf0   :  { %3209 = vmatpush1.bf16.msra.mxu0 %v10511_v42 }
 0xdf1   :  { %9826 = vmatmul.mubr.bf16.vlgmr.msra.gmra.mxu1 %v2588_v57  ;;  %3210 = vmatprep.subr.bf16.mxu0 %v10516_v52 }
 0xdf2   :  { %3396 = vmatprep.mubr.bf16.mxu1 %v10890_v23  ;;  %3373 = vmatpush1.bf16.msra.mxu1 %v10526_v17 }
 0xdf3   :  { %3374 = vmatprep.subr.bf16.mxu1 %v10534_v59  ;;  %v3126_v59 = vrot.slane %v11850_v38, %v11151_v47 }
 0xdf4   :  { %3211 = vmatpush1.bf16.msra.mxu0 %v10514_v15  ;;  %v8696_v15 = vld [vmem:[%s13193_s12 + $0x2] ss:$0 sm:$0xff] }
 0xdf5   :  { %3288 = vmatprep.subr.bf16.mxu0 %v10519_v62 }
 0xdf6   :  { %3375 = vmatpush1.bf16.msra.mxu1 %v10532_v19 }
 0xdf7   :  { %3376 = vmatprep.subr.bf16.mxu1 %v10537_v56 }
 0xdfa   :  { %3377 = vmatpush1.bf16.msra.mxu1 %v10535_v21 }
 0xdfb   :  { %3378 = vmatprep.subr.bf16.mxu1 %v10540_v16 }
 0xdfe   :  { %3379 = vmatpush1.bf16.msra.mxu1 %v10538_v22 }
 0xdff   :  { %9841 = vmatprep.subr.bf16.mxu1 %v10888_v0 }
 0xe91   :  { %v2689_v39 = vpop.f32.mrf.mxu1 }
 0xe92   :  { %v2690_v33 = vadd.f32 %v8664_v13, %v2689_v39 }
 0xe93   :  { %v9787_v41 = vpop.f32.mrf.mxu1 }
 0xe94   :  { %v11703_v43 = vadd.f32 %v2690_v33, %v11553_v18  ;;  %v8694_v33 = vld [vmem:[%s13193_s12] ss:$0 sm:$0xff] }
 0xe95   :  { %v2692_v44 = vpop.f32.mrf.mxu1 }
 0xe96   :  { %v2874_v45 = vsel %vm156_vm3, %v11703_v43, 0.0  ;;  %v2886_v46 = vmul.f32 %v11703_v43, %v11703_v43 }
 0xe97   :  { %2875 = vadd.xlane.f32.xlu0 %v2874_v45  ;;  %v9788_v20 = vpop.f32.mrf.mxu1 }
 0xe98   :  { %v2889_v50 = vsel %vm156_vm3, %v2886_v46, 0.0 }
 0xe99   :  { %2890 = vadd.xlane.f32.xlu1 %v2889_v50 }
 0xea7   :  { %v2777_v58 = vpop.f32.mrf.mxu0 }
 0xea8   :  { %v2778_v53 = vadd.f32 %v8665_v3, %v2777_v58  ;;  %v10522_v58 = vld [vmem:[%s13222_s26 + $0x124] ss:$8 sps:$4 sm:$0xff]  }
 0xea9   :  { %v9807_v18 = vpop.f32.mrf.mxu0 }
 0xeaa   :  { %v11720_v55 = vadd.f32 %v2778_v53, %v11572_v40  ;;  %v10520_v18 = vld [vmem:[%s13222_s26 + $0x120] ss:$8 sps:$4 sm:$0xff]  }
 0xeab   :  { %v2780_v14 = vpop.f32.mrf.mxu0 }
 0xeac   :  { %v2877_v61 = vsel %vm156_vm3, %v11720_v55, 0.0  ;;  %v2887_v63 = vmul.f32 %v11720_v55, %v11720_v55 }
 0xead   :  { %2878 = vadd.xlane.f32.xlu0 %v2877_v61  ;;  %v9808_v40 = vpop.f32.mrf.mxu0 }
 0xeae   :  { %v2892_v1 = vsel %vm156_vm3, %v2887_v63, 0.0  ;;  %v10523_v63 = vld [vmem:[%s13222_s26 + $0x110] ss:$8 sps:$4 sm:$0xff]   ;;  %v10531_v40 = vld [vmem:[%s13222_s26 + $0x104] ss:$8 sps:$4 sm:$0xff]  }
 0xeaf   :  { %2893 = vadd.xlane.f32.xlu1 %v2892_v1 }
 0xeb1   :  { %v2865_v34 = vpop.f32.mrf.mxu1 }
 0xeb2   :  { %v2866_v9 = vadd.f32 %v8666_v2, %v2865_v34  ;;  %v10529_v2 = vld [vmem:[%s13222_s26 + $0x100] ss:$8 sps:$4 sm:$0xff]  }
 0xeb3   :  { %v9827_v4 = vpop.f32.mrf.mxu1 }
 0xeb4   :  { %v11737_v5 = vadd.f32 %v2866_v9, %v11586_v48  ;;  %v8692_v4 = vld [vmem:[%s13192_s11 + $0x1] ss:$0 sm:$0xff] }
 0xeb5   :  { %v2868_v6 = vpop.f32.mrf.mxu1 }
 0xeb6   :  { %v2880_v7 = vsel %vm156_vm3, %v11737_v5, 0.0  ;;  %v2888_v10 = vmul.f32 %v11737_v5, %v11737_v5 }
 0xeb7   :  { %v9828_v12 = vpop.f32.mrf.mxu1  ;;  %2881 = vadd.xlane.f32.xlu0 %v2880_v7  ;;  %v8695_v7 = vld [vmem:[%s13193_s12 + $0x1] ss:$0 sm:$0xff] }
 0xeb8   :  { %v2895_v48 = vsel %vm156_vm3, %v2888_v10, 0.0 }
 0xeb9   :  { %2896 = vadd.xlane.f32.xlu1 %v2895_v48  ;;  %v8693_v48 = vld [vmem:[%s13192_s11 + $0x2] ss:$0 sm:$0xff] }
 0xf20   :  { %v2876_v24 = vpop.xlane.xlu0 %2875 }
 0xf21   :  { %v2883_v25 = vmul.f32 0.015625, %v2876_v24 }
 0xf22   :  { %v2891_v26 = vpop.xlane.xlu1 %2890 }
 0xf23   :  { %v2901_v28 = vmul.f32 %v2883_v25, %v2883_v25  ;;  %v2898_v8 = vmul.f32 0.015625, %v2891_v26  ;;  %v2907_v31 = vsub.f32 %v11703_v43, %v2883_v25  ;;  %v10517_v43 = vld [vmem:[%s13222_s26 + $0x130] ss:$8 sps:$4 sm:$0xff]   ;;  %v8722_v25 = vld [vmem:[%s13187_s6 + $0x8] sm:$0x3] }
 0xf24   :  { %v3134_v26 = vrot.slane %v8722_v25, %v11151_v47 }
 0xf25   :  { %v2904_v29 = vsub.f32 %v2898_v8, %v2901_v28  ;;  %v3138_v28 = vrot.slane %v8722_v25, %v11156_v49 }
 0xf27   :  { %v2910_v30 = vadd.f32 1e-05, %v2904_v29 }
 0xf29   :  { %10731 = vrsqrt.f32 %v2910_v30 }
 0xf36   :  { %v10732_v32 = vpop.eup %10731  ;;  %v2879_v35 = vpop.xlane.xlu0 %2878 }
 0xf37   :  { %v2884_v57 = vmul.f32 0.015625, %v2879_v35  ;;  %v2916_v13 = vmul.f32 %v10732_v32, %v2907_v31 }
 0xf38   :  { %v2894_v39 = vpop.xlane.xlu1 %2893 }
 0xf39   :  { %v2902_v41 = vmul.f32 %v2884_v57, %v2884_v57  ;;  %v2899_v44 = vmul.f32 0.015625, %v2894_v39  ;;  %v2937_v45 = vmul.f32 %v8691_v36, %v2916_v13  ;;  %v2908_v34 = vsub.f32 %v11720_v55, %v2884_v57  ;;  %v8723_v36 = vld [vmem:[%s13187_s6 + $0xa] sm:$0x3] }
 0xf3a   :  { %v3142_v13 = vrot.slane %v8723_v36, %v11151_v47  ;;  %v3146_v39 = vrot.slane %v8723_v36, %v11156_v49 }
 0xf3b   :  { %v2905_v46 = vsub.f32 %v2899_v44, %v2902_v41  ;;  %v11791_v20 = vadd.f32 %v8694_v33, %v2937_v45 }
 0xf3d   :  { %v2911_v50 = vadd.f32 1e-05, %v2905_v46  ;;  %v3117_v3 = vpack.c.bf16 %v11791_v20, %v11791_v20 }
 0xf3f   :  { %10733 = vrsqrt.f32 %v2911_v50  ;;  %8825 = vmatmul.mubr.msk.bf16.vlgmr.msra.gmra.mxu0 %vm156_vm3, %v3117_v3 }
 0xf40   :  { %v2882_v53 = vpop.xlane.xlu0 %2881  ;;  %3289 = vmatpush1.bf16.msra.mxu0 %v10517_v43  ;;  %3312 = vmatprep.mubr.bf16.mxu0 %v10890_v23 }
 0xf41   :  { %v2885_v27 = vmul.f32 0.015625, %v2882_v53  ;;  %3290 = vmatprep.subr.bf16.mxu0 %v10522_v58 }
 0xf42   :  { %v2897_v60 = vpop.xlane.xlu1 %2896 }
 0xf43   :  { %v2903_v14 = vmul.f32 %v2885_v27, %v2885_v27  ;;  %v2900_v61 = vmul.f32 0.015625, %v2897_v60  ;;  %v2909_v55 = vsub.f32 %v11737_v5, %v2885_v27 }
 0xf44   :  { %3291 = vmatpush1.bf16.msra.mxu0 %v10520_v18 }
 0xf45   :  { %v2906_v37 = vsub.f32 %v2900_v61, %v2903_v14  ;;  %3292 = vmatprep.subr.bf16.mxu0 %v10525_v54 }
 0xf47   :  { %v2912_v1 = vadd.f32 1e-05, %v2906_v37 }
 0xf48   :  { %3293 = vmatpush1.bf16.msra.mxu0 %v10523_v63 }
 0xf49   :  { %10735 = vrsqrt.f32 %v2912_v1  ;;  %3294 = vmatprep.subr.bf16.mxu0 %v10531_v40 }
 0xf4c   :  { %v10734_v9 = vpop.eup %10733  ;;  %3295 = vmatpush1.bf16.msra.mxu0 %v10529_v2 }
 0xf4d   :  { %v2917_v6 = vmul.f32 %v10734_v9, %v2908_v34  ;;  %9829 = vmatprep.subr.bf16.mxu0 %v10888_v0 }
 0xf4f   :  { %v2938_v10 = vmul.f32 %v8692_v4, %v2917_v6 }
 0xf51   :  { %v11826_v11 = vadd.f32 %v8695_v7, %v2938_v10 }
 0xf53   :  { %v3118_v12 = vpack.c.bf16 %v11826_v11, %v11826_v11 }
 0xf55   :  { %8834 = vmatmul.mubr.msk.bf16.vlgmr.msra.gmra.mxu0 %vm156_vm3, %v3118_v12 }
 0xf56   :  { %v10736_v42 = vpop.eup %10735  ;;  %9831 = vmatprep.mubr.msk.bf16.mxu0 %vm10889_vm0, %v10888_v0 }
 0xf57   :  { %v2918_v52 = vmul.f32 %v10736_v42, %v2909_v55 }
 0xf59   :  { %v2939_v62 = vmul.f32 %v8693_v48, %v2918_v52 }
 0xf5b   :  { %v11840_v17 = vadd.f32 %v8696_v15, %v2939_v62 }
 0xf5d   :  { %v3119_v5 = vpack.c.bf16 %v11840_v17, %v11840_v17 }
 0xf5f   :  { %8843 = vmatmul.mubr.msk.bf16.vlgmr.msra.gmra.mxu1 %vm156_vm3, %v3119_v5 }
 0xf60   :  { %9843 = vmatprep.mubr.msk.bf16.mxu1 %vm10889_vm0, %v10888_v0 }
 0xfff   :  { %v3230_v19 = vpop.f32.mrf.mxu0 }
0x1000   :  { %v3231_v21 = vadd.f32 %v3230_v19, %v3126_v59 }
0x1001   :  { %v11854_v56 = vpop.f32.mrf.mxu0 }
0x1002   :  { %v11856_v16 = vpack.c.bf16 %v3231_v21, %v3231_v21 }
0x1003   :  { %v3234_v22 = vpop.f32.mrf.mxu0 }
0x1004   :  { %3409 = vrot.lane.b32.xlu0 %v11856_v16, %s10891_s1 }
0x1005   :  { %v3235_v24 = vpop.f32.mrf.mxu0 }
0x1015   :  { %v3314_v8 = vpop.f32.mrf.mxu0 }
0x1016   :  { %v3315_v29 = vadd.f32 %v3314_v8, %v3134_v26 }
0x1017   :  { %v3316_v30 = vpop.f32.mrf.mxu0 }
0x1018   :  { %v11865_v31 = vpack.c.bf16 %v3315_v29, %v3315_v29  ;;  %v11867_v32 = vadd.f32 %v3316_v30, %v3138_v28 }
0x1019   :  { %v3318_v35 = vpop.f32.mrf.mxu0 }
0x101a   :  { %3458 = vrot.lane.b32.xlu1 %v11865_v31, %s10891_s1 }
0x101b   :  { %v3319_v57 = vpop.f32.mrf.mxu0 }
0x101f   :  { %v3398_v33 = vpop.f32.mrf.mxu1 }
0x1020   :  { %v3399_v41 = vadd.f32 %v3398_v33, %v3142_v13 }
0x1021   :  { %v3400_v44 = vpop.f32.mrf.mxu1 }
0x1022   :  { %v11876_v45 = vpack.c.bf16 %v3399_v41, %v3399_v41  ;;  %v11878_v46 = vadd.f32 %v3400_v44, %v3146_v39 }
0x1023   :  { %v3402_v43 = vpop.f32.mrf.mxu1 }
0x1024   :  { %3507 = vrot.lane.b32.xlu1 %v11876_v45, %s10891_s1 }
0x1025   :  { %v3403_v50 = vpop.f32.mrf.mxu1 }
0x1076   :  { %v3410_v3 = vpop.permute.xlu0 %3409 }
0x1077   :  { %v3415_v58 = vsel %vm672_vm4, %v3410_v3, 0 }
0x1078   :  { %9830 = vmatpush3.bf16.xpose.msra.mxu0 %v3415_v58 }
0x1079   :  { %9835 = vmatprep.subr.bf16.mxu0 %v10888_v0 }
0x107f   :  { %9832 = vmatmul.mubr.msk.bf16.vlgmr.msra.gmra.mxu0 %vm672_vm4, %v11856_v16 }
0x1080   :  { %9837 = vmatprep.mubr.msk.bf16.mxu0 %vm10889_vm0, %v10888_v0 }
0x108c   :  { %v3459_v53 = vpop.permute.xlu1 %3458 }
0x108d   :  { %v3464_v18 = vsel %vm672_vm4, %v3459_v53, 0 }
0x108e   :  { %9836 = vmatpush3.bf16.xpose.msra.mxu0 %v3464_v18 }
0x108f   :  { %9847 = vmatprep.subr.bf16.mxu0 %v10888_v0 }
0x1095   :  { %9838 = vmatmul.mubr.msk.bf16.vlgmr.msra.gmra.mxu0 %vm672_vm4, %v11865_v31 }
0x1096   :  { %v3508_v27 = vpop.permute.xlu1 %3507  ;;  %9849 = vmatprep.mubr.msk.bf16.mxu0 %vm10889_vm0, %v10888_v0 }
0x1097   :  { %v3513_v54 = vsel %vm672_vm4, %v3508_v27, 0 }
0x1098   :  { %9842 = vmatpush3.bf16.xpose.msra.mxu1 %v3513_v54 }
0x1099   :  { %9853 = vmatprep.subr.bf16.mxu1 %v10888_v0 }
0x109f   :  { %9844 = vmatmul.mubr.msk.bf16.vlgmr.msra.gmra.mxu1 %vm672_vm4, %v11876_v45 }
0x10a0   :  { %9855 = vmatprep.mubr.msk.bf16.mxu1 %vm10889_vm0, %v10888_v0 }
0x113f   :  { %v3451_v60 = vpop.f32.mrf.mxu0 }
0x1140   :  { %v3555_v14 = vmul.f32 0.25, %v3451_v60 }
0x1141   :  { %v9833_v61 = vpop.f32.mrf.mxu0 }
0x1142   :  { %v3558_v63 = vsel %vm820_vm5, %v3555_v14, -inf }
0x1143   :  { %3559 = vmax.xlane.f32.xlu1 %v3558_v63  ;;  %v3454_v37 = vpop.f32.mrf.mxu0 }
0x1145   :  { %v9834_v40 = vpop.f32.mrf.mxu0 }
0x1154   :  { %3642 = vrot.lane.b32.xlu1 %v11865_v31, %s10892_s29 }
0x1155   :  { %v3500_v1 = vpop.f32.mrf.mxu0 }
0x1156   :  { %v3556_v2 = vmul.f32 0.25, %v3500_v1 }
0x1157   :  { %v9839_v34 = vpop.f32.mrf.mxu0 }
0x1158   :  { %3594 = vrot.lane.b32.xlu1 %v11856_v16, %s10892_s29  ;;  %v3561_v9 = vsel %vm820_vm5, %v3556_v2, -inf }
0x1159   :  { %3562 = vmax.xlane.f32.xlu0 %v3561_v9  ;;  %v3503_v4 = vpop.f32.mrf.mxu0 }
0x115b   :  { %v9840_v6 = vpop.f32.mrf.mxu0 }
0x115c   :  { %3738 = vrot.lane.b32.xlu1 %v11856_v16, %s13211_s0 }
0x115f   :  { %v3549_v7 = vpop.f32.mrf.mxu1 }
0x1160   :  { %v3557_v10 = vmul.f32 0.25, %v3549_v7 }
0x1161   :  { %v9845_v12 = vpop.f32.mrf.mxu1 }
0x1162   :  { %v3564_v55 = vsel %vm820_vm5, %v3557_v10, -inf }
0x1163   :  { %v3552_v42 = vpop.f32.mrf.mxu1  ;;  %3565 = vmax.xlane.f32.xlu0 %v3564_v55 }
0x1165   :  { %v9846_v48 = vpop.f32.mrf.mxu1 }
0x1179   :  { %3740 = vrot.lane.b32.xlu0 %v11856_v16, %s10886_s27 }
0x11cc   :  { %v3560_v52 = vpop.xlane.xlu1 %3559 }
0x11cd   :  { %v3567_v15 = vsub.f32 %v3555_v14, %v3560_v52 }
0x11cf   :  { %v3570_v62 = vmul.f32 1.442695, %v3567_v15 }
0x11d0   :  { %v3643_v5 = vpop.permute.xlu1 %3642 }
0x11d1   :  { %10737 = vpow2.f32 %v3570_v62  ;;  %v3648_v59 = vsel %vm862_vm6, %v3643_v5, 0 }
0x11d2   :  { %9854 = vmatpush3.bf16.msra.mxu1 %v3648_v59 }
0x11d3   :  { %9865 = vmatprep.subr.bf16.mxu1 %v10888_v0 }
0x11d4   :  { %v3595_v19 = vpop.permute.xlu1 %3594 }
0x11d5   :  { %v3600_v21 = vsel %vm862_vm6, %v3595_v19, 0 }
0x11d6   :  { %9848 = vmatpush3.bf16.msra.mxu0 %v3600_v21 }
0x11d7   :  { %9859 = vmatprep.subr.bf16.mxu0 %v10888_v0 }
0x11d8   :  { %v3739_v39 = vpop.permute.xlu1 %3738 }
0x11de   :  { %v10738_v22 = vpop.eup %10737 }
0x11df   :  { %v3576_v24 = vsel %vm820_vm5, %v10738_v22, 0.0 }
0x11e0   :  { %3577 = vadd.xlane.f32.xlu1 %v3576_v24 }
0x11e2   :  { %v3563_v25 = vpop.xlane.xlu0 %3562 }
0x11e3   :  { %v3568_v26 = vsub.f32 %v3556_v2, %v3563_v25 }
0x11e5   :  { %v3572_v28 = vmul.f32 1.442695, %v3568_v26 }
0x11e7   :  { %10739 = vpow2.f32 %v3572_v28 }
0x11ec   :  { %v3566_v30 = vpop.xlane.xlu0 %3565 }
0x11ed   :  { %v3569_v35 = vsub.f32 %v3557_v10, %v3566_v30 }
0x11ef   :  { %v3574_v36 = vmul.f32 1.442695, %v3569_v35 }
0x11f0   :  { %v3741_v3 = vpop.permute.xlu0 %3740 }
0x11f1   :  { %3690 = vrot.lane.b32.xlu1 %v11876_v45, %s10892_s29  ;;  %10741 = vpow2.f32 %v3574_v36  ;;  %v3746_v60 = vsel %vm672_vm4, %v3741_v3, 0 }
0x11f4   :  { %v10740_v8 = vpop.eup %10739 }
0x11f5   :  { %3838 = vrot.lane.b32.xlu1 %v11876_v45, %s13211_s0  ;;  %v3579_v29 = vsel %vm820_vm5, %v10740_v8, 0.0 }
0x11f6   :  { %3580 = vadd.xlane.f32.xlu0 %v3579_v29 }
0x11fe   :  { %v10742_v57 = vpop.eup %10741 }
0x11ff   :  { %v3582_v13 = vsel %vm820_vm5, %v10742_v57, 0.0 }
0x120c   :  { %3840 = vrot.lane.b32.xlu0 %v11876_v45, %s10886_s27 }
0x122b   :  { %3583 = vadd.xlane.f32.xlu0 %v3582_v13 }
0x1241   :  { %3790 = vrot.lane.b32.xlu0 %v11865_v31, %s10886_s27 }
0x1245   :  { %3788 = vrot.lane.b32.xlu0 %v11865_v31, %s13211_s0 }
0x1269   :  { %v3578_v33 = vpop.xlane.xlu1 %3577 }
0x126a   :  { %10743 = vrcp.f32 %v3578_v33 }
0x126d   :  { %v3691_v43 = vpop.permute.xlu1 %3690 }
0x126e   :  { %v3696_v58 = vsel %vm862_vm6, %v3691_v43, 0 }
0x1271   :  { %v3839_v63 = vpop.permute.xlu1 %3838 }
0x1277   :  { %v10744_v41 = vpop.eup %10743 }
0x1278   :  { %v3588_v44 = vmul.f32 %v10744_v41, %v10738_v22 }
0x127a   :  { %v3591_v50 = vpack.c.bf16 %v3588_v44, %v3588_v44 }
0x127c   :  { %9850 = vmatmul.mubr.msk.bf16.vlgmr.msra.gmra.mxu0 %vm820_vm5, %v3591_v50 }
0x127d   :  { %9860 = vmatpush3.bf16.msra.mxu0 %v3696_v58  ;;  %9861 = vmatprep.mubr.msk.bf16.mxu0 %vm10889_vm0, %v10888_v0 }
0x127e   :  { %9871 = vmatprep.subr.bf16.mxu0 %v10888_v0 }
0x127f   :  { %v3581_v53 = vpop.xlane.xlu0 %3580 }
0x1280   :  { %10745 = vrcp.f32 %v3581_v53 }
0x1283   :  { %v3841_v14 = vpop.permute.xlu0 %3840 }
0x1284   :  { %v3846_v61 = vsel %vm672_vm4, %v3841_v14, 0 }
0x128d   :  { %v10746_v18 = vpop.eup %10745 }
0x128e   :  { %v3589_v27 = vmul.f32 %v10746_v18, %v10740_v8 }
0x1290   :  { %v3592_v54 = vpack.c.bf16 %v3589_v27, %v3589_v27 }
0x1292   :  { %9856 = vmatmul.mubr.msk.bf16.vlgmr.msra.gmra.mxu1 %vm820_vm5, %v3592_v54 }
0x1293   :  { %9866 = vmatpush3.bf16.xpose.msra.mxu1 %v3746_v60  ;;  %9867 = vmatprep.mubr.msk.bf16.mxu1 %vm10889_vm0, %v10888_v0 }
0x1294   :  { %9877 = vmatprep.subr.bf16.mxu1 %v10888_v0 }
0x129a   :  { %9868 = vmatmul.mubr.msk.bf16.vlgmr.msra.gmra.mxu1 %vm672_vm4, %v3739_v39 }
0x129b   :  { %9878 = vmatpush3.bf16.xpose.msra.mxu1 %v3846_v61  ;;  %9879 = vmatprep.mubr.msk.bf16.mxu1 %vm10889_vm0, %v10888_v0 }
0x129c   :  { %9889 = vmatprep.subr.bf16.mxu1 %v10888_v0 }
0x12a2   :  { %9880 = vmatmul.mubr.msk.bf16.vlgmr.msra.gmra.mxu1 %vm672_vm4, %v3839_v63 }
0x12a3   :  { %9891 = vmatprep.mubr.msk.bf16.mxu1 %vm10889_vm0, %v10888_v0 }
0x12b4   :  { %v3584_v37 = vpop.xlane.xlu0 %3583 }
0x12b5   :  { %10747 = vrcp.f32 %v3584_v37 }
0x12b8   :  { %v3791_v2 = vpop.permute.xlu0 %3790 }
0x12b9   :  { %v3796_v9 = vsel %vm672_vm4, %v3791_v2, 0 }
0x12bc   :  { %v3789_v4 = vpop.permute.xlu0 %3788 }
0x12c2   :  { %v10748_v40 = vpop.eup %10747 }
0x12c3   :  { %v3590_v1 = vmul.f32 %v10748_v40, %v10742_v57 }
0x12c5   :  { %v3593_v34 = vpack.c.bf16 %v3590_v1, %v3590_v1 }
0x12c7   :  { %9862 = vmatmul.mubr.msk.bf16.vlgmr.msra.gmra.mxu0 %vm820_vm5, %v3593_v34 }
0x12c8   :  { %9872 = vmatpush3.bf16.xpose.msra.mxu0 %v3796_v9  ;;  %9873 = vmatprep.mubr.msk.bf16.mxu0 %vm10889_vm0, %v10888_v0 }
0x12c9   :  { %9883 = vmatprep.subr.bf16.mxu0 %v10888_v0 }
0x12cf   :  { %9874 = vmatmul.mubr.msk.bf16.vlgmr.msra.gmra.mxu0 %vm672_vm4, %v3789_v4 }
0x12d0   :  { %9885 = vmatprep.mubr.msk.bf16.mxu0 %vm10889_vm0, %v10888_v0 }
0x133c   :  { %v11954_v6 = vpop.f32.mrf.mxu0 }
0x133e   :  { %v9851_v7 = vpop.f32.mrf.mxu0 }
0x1340   :  { %v3639_v10 = vpop.f32.mrf.mxu0 }
0x1342   :  { %v9852_v12 = vpop.f32.mrf.mxu0 }
0x1352   :  { %v11956_v55 = vpop.f32.mrf.mxu1 }
0x1354   :  { %v9857_v42 = vpop.f32.mrf.mxu1 }
0x1356   :  { %v3687_v48 = vpop.f32.mrf.mxu1 }
0x1358   :  { %v9858_v52 = vpop.f32.mrf.mxu1 }
0x1359   :  { %v3130_v52 = vrot.slane %v11850_v38, %v11156_v49 }
0x135a   :  { %v3782_v15 = vpop.f32.mrf.mxu1 }
0x135b   :  { %v3888_v62 = vmul.f32 0.25, %v3782_v15 }
0x135c   :  { %v9869_v5 = vpop.f32.mrf.mxu1 }
0x135d   :  { %v3891_v59 = vsel %vm820_vm5, %v3888_v62, -inf }
0x135e   :  { %3892 = vmax.xlane.f32.xlu1 %v3891_v59  ;;  %v3785_v19 = vpop.f32.mrf.mxu1  ;;  %v3233_v59 = vadd.f32 %v11854_v56, %v3130_v52 }
0x1360   :  { %v9870_v21 = vpop.f32.mrf.mxu1 }
0x1361   :  { %v12001_v21 = vpack.c.bf16 %v3233_v59, %v3233_v59 }
0x1362   :  { %v3882_v22 = vpop.f32.mrf.mxu1 }
0x1363   :  { %v3890_v24 = vmul.f32 0.25, %v3882_v22  ;;  %v4267_v38 = vsel %vm862_vm6, %v12001_v21, 0 }
0x1364   :  { %v9881_v25 = vpop.f32.mrf.mxu1 }
0x1365   :  { %v3897_v26 = vsel %vm820_vm5, %v3890_v24, -inf }
0x1366   :  { %3898 = vmax.xlane.f32.xlu0 %v3897_v26  ;;  %v3885_v28 = vpop.f32.mrf.mxu1 }
0x1368   :  { %v9882_v8 = vpop.f32.mrf.mxu1 }
0x1387   :  { %v11960_v29 = vpop.f32.mrf.mxu0 }
0x1389   :  { %v9863_v30 = vpop.f32.mrf.mxu0 }
0x138b   :  { %v3735_v35 = vpop.f32.mrf.mxu0 }
0x138d   :  { %v9864_v36 = vpop.f32.mrf.mxu0 }
0x138f   :  { %v3832_v57 = vpop.f32.mrf.mxu0 }
0x1390   :  { %v3889_v13 = vmul.f32 0.25, %v3832_v57  ;;  %v12021_v57 = vpack.c.bf16 %v11867_v32, %v11867_v32 }
0x1391   :  { %v9875_v39 = vpop.f32.mrf.mxu0 }
0x1392   :  { %v3894_v33 = vsel %vm820_vm5, %v3889_v13, -inf  ;;  %v4313_v39 = vsel %vm862_vm6, %v12021_v57, 0 }
0x1393   :  { %3895 = vmax.xlane.f32.xlu0 %v3894_v33  ;;  %v3835_v41 = vpop.f32.mrf.mxu0 }
0x1395   :  { %v9876_v44 = vpop.f32.mrf.mxu0 }
0x13e7   :  { %v3893_v43 = vpop.xlane.xlu1 %3892 }
0x13e8   :  { %v3900_v50 = vsub.f32 %v3888_v62, %v3893_v43 }
0x13ea   :  { %v3903_v3 = vmul.f32 1.442695, %v3900_v50 }
0x13ec   :  { %10749 = vpow2.f32 %v3903_v3 }
0x13ef   :  { %v3899_v58 = vpop.xlane.xlu0 %3898 }
0x13f0   :  { %v3902_v53 = vsub.f32 %v3890_v24, %v3899_v58 }
0x13f2   :  { %v3907_v18 = vmul.f32 1.442695, %v3902_v53 }
0x13f4   :  { %10751 = vpow2.f32 %v3907_v18 }
0x13f9   :  { %v10750_v27 = vpop.eup %10749 }
0x13fa   :  { %v3909_v54 = vsel %vm820_vm5, %v10750_v27, 0.0 }
0x13fb   :  { %3910 = vadd.xlane.f32.xlu1 %v3909_v54 }
0x1401   :  { %v10752_v60 = vpop.eup %10751 }
0x1402   :  { %v3915_v14 = vsel %vm820_vm5, %v10752_v60, 0.0 }
0x1403   :  { %3916 = vadd.xlane.f32.xlu0 %v3915_v14 }
0x140c   :  { %4023 = vrot.lane.b32.xlu1 %v11876_v45, %s13209_s4 }
0x1410   :  { %4123 = vrot.lane.b32.xlu1 %v11865_v31, %s13224_s3 }
0x1419   :  { %3927 = vrot.lane.b32.xlu0 %v11856_v16, %s13209_s4 }
0x141c   :  { %v3896_v61 = vpop.xlane.xlu0 %3895 }
0x141d   :  { %v3901_v63 = vsub.f32 %v3889_v13, %v3896_v61  ;;  %3975 = vrot.lane.b32.xlu0 %v11865_v31, %s13209_s4 }
0x141f   :  { %v3905_v37 = vmul.f32 1.442695, %v3901_v63 }
0x1421   :  { %4121 = vrot.lane.b32.xlu0 %v11865_v31, %s13225_s28  ;;  %10753 = vpow2.f32 %v3905_v37 }
0x1425   :  { %4173 = vrot.lane.b32.xlu0 %v11876_v45, %s13224_s3 }
0x142e   :  { %v10754_v40 = vpop.eup %10753 }
0x142f   :  { %v3912_v1 = vsel %vm820_vm5, %v10754_v40, 0.0 }
0x1434   :  { %3913 = vadd.xlane.f32.xlu1 %v3912_v1 }
0x1445   :  { %4073 = vrot.lane.b32.xlu1 %v11856_v16, %s13224_s3 }
0x1449   :  { %4071 = vrot.lane.b32.xlu1 %v11856_v16, %s13225_s28 }
0x144d   :  { %4171 = vrot.lane.b32.xlu1 %v11876_v45, %s13225_s28 }
0x1484   :  { %v3911_v2 = vpop.xlane.xlu1 %3910 }
0x1485   :  { %10755 = vrcp.f32 %v3911_v2 }
0x1488   :  { %v4024_v10 = vpop.permute.xlu1 %4023 }
0x1489   :  { %v4029_v45 = vsel %vm862_vm6, %v4024_v10, 0 }
0x148c   :  { %v3917_v31 = vpop.xlane.xlu0 %3916  ;;  %v4124_v62 = vpop.permute.xlu1 %4123 }
0x148d   :  { %10757 = vrcp.f32 %v3917_v31  ;;  %v4129_v19 = vsel %vm672_vm4, %v4124_v62, 0 }
0x1490   :  { %v3928_v34 = vpop.permute.xlu0 %3927 }
0x1491   :  { %v3933_v9 = vsel %vm862_vm6, %v3928_v34, 0 }
0x1492   :  { %v10756_v4 = vpop.eup %10755  ;;  %9884 = vmatpush3.bf16.msra.mxu0 %v3933_v9 }
0x1493   :  { %9895 = vmatprep.subr.bf16.mxu0 %v10888_v0  ;;  %v3921_v7 = vmul.f32 %v10756_v4, %v10750_v27 }
0x1494   :  { %v3976_v12 = vpop.permute.xlu0 %3975 }
0x1495   :  { %v3981_v42 = vsel %vm862_vm6, %v3976_v12, 0  ;;  %v3924_v16 = vpack.c.bf16 %v3921_v7, %v3921_v7 }
0x1496   :  { %9890 = vmatpush3.bf16.msra.mxu1 %v3981_v42 }
0x1497   :  { %9886 = vmatmul.mubr.msk.bf16.vlgmr.msra.gmra.mxu0 %vm820_vm5, %v3924_v16  ;;  %9901 = vmatprep.subr.bf16.mxu1 %v10888_v0 }
0x1498   :  { %9896 = vmatpush3.bf16.msra.mxu0 %v4029_v45  ;;  %9897 = vmatprep.mubr.msk.bf16.mxu0 %vm10889_vm0, %v10888_v0  ;;  %v4122_v22 = vpop.permute.xlu0 %4121 }
0x1499   :  { %9907 = vmatprep.subr.bf16.mxu0 %v10888_v0 }
0x149a   :  { %v10758_v48 = vpop.eup %10757 }
0x149b   :  { %v3923_v15 = vmul.f32 %v10758_v48, %v10752_v60 }
0x149c   :  { %v4174_v30 = vpop.permute.xlu0 %4173 }
0x149d   :  { %v3926_v5 = vpack.c.bf16 %v3923_v15, %v3923_v15  ;;  %v4179_v36 = vsel %vm672_vm4, %v4174_v30, 0  ;;  %v12049_v30 = vpack.c.bf16 %v11878_v46, %v11878_v46 }
0x149f   :  { %9898 = vmatmul.mubr.msk.bf16.vlgmr.msra.gmra.mxu0 %vm820_vm5, %v3926_v5 }
0x14a0   :  { %9908 = vmatpush3.bf16.xpose.msra.mxu0 %v4129_v19  ;;  %9909 = vmatprep.mubr.msk.bf16.mxu0 %vm10889_vm0, %v10888_v0 }
0x14a1   :  { %9919 = vmatprep.subr.bf16.mxu0 %v10888_v0 }
0x14a7   :  { %9910 = vmatmul.mubr.msk.bf16.vlgmr.msra.gmra.mxu0 %vm672_vm4, %v4122_v22 }
0x14a8   :  { %9920 = vmatpush3.bf16.msra.mxu0 %v4267_v38  ;;  %9921 = vmatprep.mubr.msk.bf16.mxu0 %vm10889_vm0, %v10888_v0 }
0x14a9   :  { %9931 = vmatprep.subr.bf16.mxu0 %v10888_v0 }
0x14bd   :  { %v3914_v56 = vpop.xlane.xlu1 %3913 }
0x14be   :  { %10759 = vrcp.f32 %v3914_v56 }
0x14c1   :  { %v4074_v26 = vpop.permute.xlu1 %4073 }
0x14c2   :  { %v4079_v8 = vsel %vm672_vm4, %v4074_v26, 0 }
0x14c5   :  { %v4072_v35 = vpop.permute.xlu1 %4071 }
0x14c9   :  { %v4172_v13 = vpop.permute.xlu1 %4171 }
0x14cb   :  { %v10760_v24 = vpop.eup %10759 }
0x14cc   :  { %v3922_v25 = vmul.f32 %v10760_v24, %v10754_v40 }
0x14ce   :  { %v3925_v28 = vpack.c.bf16 %v3922_v25, %v3922_v25 }
0x14d0   :  { %9892 = vmatmul.mubr.msk.bf16.vlgmr.msra.gmra.mxu1 %vm820_vm5, %v3925_v28 }
0x14d1   :  { %9902 = vmatpush3.bf16.xpose.msra.mxu1 %v4079_v8  ;;  %9903 = vmatprep.mubr.msk.bf16.mxu1 %vm10889_vm0, %v10888_v0 }
0x14d2   :  { %9913 = vmatprep.subr.bf16.mxu1 %v10888_v0 }
0x14d8   :  { %9904 = vmatmul.mubr.msk.bf16.vlgmr.msra.gmra.mxu1 %vm672_vm4, %v4072_v35 }
0x14d9   :  { %9914 = vmatpush3.bf16.xpose.msra.mxu1 %v4179_v36  ;;  %9915 = vmatprep.mubr.msk.bf16.mxu1 %vm10889_vm0, %v10888_v0 }
0x14da   :  { %9925 = vmatprep.subr.bf16.mxu1 %v10888_v0 }
0x14e0   :  { %9916 = vmatmul.mubr.msk.bf16.vlgmr.msra.gmra.mxu1 %vm672_vm4, %v4172_v13 }
0x14e1   :  { %9926 = vmatpush3.bf16.msra.mxu1 %v4313_v39  ;;  %9927 = vmatprep.mubr.msk.bf16.mxu1 %vm10889_vm0, %v10888_v0 }
0x14e2   :  { %9937 = vmatprep.subr.bf16.mxu1 %v10888_v0 }
0x1557   :  { %v12029_v33 = vpop.f32.mrf.mxu0 }
0x1559   :  { %v9887_v41 = vpop.f32.mrf.mxu0 }
0x155b   :  { %v3972_v44 = vpop.f32.mrf.mxu0 }
0x155d   :  { %v9888_v43 = vpop.f32.mrf.mxu0 }
0x155f   :  { %v12031_v50 = vpop.f32.mrf.mxu0 }
0x1561   :  { %v9899_v32 = vpop.f32.mrf.mxu0 }
0x1563   :  { %v4068_v3 = vpop.f32.mrf.mxu0 }
0x1565   :  { %v9900_v58 = vpop.f32.mrf.mxu0 }
0x1567   :  { %v4165_v53 = vpop.f32.mrf.mxu0 }
0x1568   :  { %v4222_v18 = vmul.f32 0.25, %v4165_v53 }
0x1569   :  { %v9911_v27 = vpop.f32.mrf.mxu0 }
0x156a   :  { %v4227_v54 = vsel %vm820_vm5, %v4222_v18, -inf }
0x156b   :  { %4228 = vmax.xlane.f32.xlu0 %v4227_v54  ;;  %v4168_v60 = vpop.f32.mrf.mxu0 }
0x156d   :  { %v9912_v14 = vpop.f32.mrf.mxu0 }
0x156e   :  { %v4359_v14 = vsel %vm862_vm6, %v12049_v30, 0 }
0x1590   :  { %v12034_v61 = vpop.f32.mrf.mxu1 }
0x1592   :  { %v9893_v63 = vpop.f32.mrf.mxu1 }
0x1594   :  { %v4020_v37 = vpop.f32.mrf.mxu1 }
0x1596   :  { %v9894_v40 = vpop.f32.mrf.mxu1 }
0x1598   :  { %v4115_v1 = vpop.f32.mrf.mxu1 }
0x1599   :  { %v4221_v2 = vmul.f32 0.25, %v4115_v1 }
0x159a   :  { %v9905_v31 = vpop.f32.mrf.mxu1 }
0x159b   :  { %v4224_v34 = vsel %vm820_vm5, %v4221_v2, -inf }
0x159c   :  { %4225 = vmax.xlane.f32.xlu1 %v4224_v34  ;;  %v4118_v9 = vpop.f32.mrf.mxu1 }
0x159e   :  { %v9906_v4 = vpop.f32.mrf.mxu1 }
0x15a0   :  { %v4215_v7 = vpop.f32.mrf.mxu1 }
0x15a1   :  { %v4223_v10 = vmul.f32 0.25, %v4215_v7 }
0x15a2   :  { %v9917_v12 = vpop.f32.mrf.mxu1 }
0x15a3   :  { %v4230_v42 = vsel %vm820_vm5, %v4223_v10, -inf }
0x15a4   :  { %v4218_v16 = vpop.f32.mrf.mxu1  ;;  %4231 = vmax.xlane.f32.xlu0 %v4230_v42 }
0x15a6   :  { %v9918_v45 = vpop.f32.mrf.mxu1 }
0x15f4   :  { %v4229_v48 = vpop.xlane.xlu0 %4228 }
0x15f5   :  { %v4234_v52 = vsub.f32 %v4222_v18, %v4229_v48 }
0x15f7   :  { %v4238_v15 = vmul.f32 1.442695, %v4234_v52 }
0x15f9   :  { %10761 = vpow2.f32 %v4238_v15 }
0x1606   :  { %v10762_v62 = vpop.eup %10761 }
0x1607   :  { %v4245_v5 = vsel %vm820_vm5, %v10762_v62, 0.0 }
0x1608   :  { %4246 = vadd.xlane.f32.xlu0 %v4245_v5 }
0x1625   :  { %v4226_v59 = vpop.xlane.xlu1 %4225 }
0x1626   :  { %v4233_v19 = vsub.f32 %v4221_v2, %v4226_v59 }
0x1628   :  { %v4236_v22 = vmul.f32 1.442695, %v4233_v19 }
0x162a   :  { %10763 = vpow2.f32 %v4236_v22 }
0x162d   :  { %v4232_v38 = vpop.xlane.xlu0 %4231 }
0x162e   :  { %v4235_v56 = vsub.f32 %v4223_v10, %v4232_v38 }
0x1630   :  { %v4240_v24 = vmul.f32 1.442695, %v4235_v56 }
0x1632   :  { %10765 = vpow2.f32 %v4240_v24 }
0x1637   :  { %v10764_v25 = vpop.eup %10763 }
0x1638   :  { %v4242_v26 = vsel %vm820_vm5, %v10764_v25, 0.0 }
0x1639   :  { %4243 = vadd.xlane.f32.xlu1 %v4242_v26 }
0x163f   :  { %v10766_v28 = vpop.eup %10765 }
0x1640   :  { %v4248_v8 = vsel %vm820_vm5, %v10766_v28, 0.0 }
0x1641   :  { %4249 = vadd.xlane.f32.xlu0 %v4248_v8 }
0x164a   :  { %4404 = vrot.lane.b32.xlu1 %v12001_v21, %s10892_s29 }
0x164e   :  { %4455 = vrot.lane.b32.xlu1 %v12021_v57, %s10892_s29 }
0x1652   :  { %4453 = vrot.lane.b32.xlu1 %v12021_v57, %s10891_s1 }
0x1656   :  { %4504 = vrot.lane.b32.xlu1 %v12049_v30, %s10891_s1 }
0x1657   :  { %4402 = vrot.lane.b32.xlu0 %v12001_v21, %s10891_s1 }
0x165b   :  { %4506 = vrot.lane.b32.xlu0 %v12049_v30, %s10892_s29 }
0x1691   :  { %v4247_v35 = vpop.xlane.xlu0 %4246 }
0x1692   :  { %10767 = vrcp.f32 %v4247_v35 }
0x169f   :  { %v10768_v36 = vpop.eup %10767 }
0x16a0   :  { %v4255_v13 = vmul.f32 %v10768_v36, %v10762_v62 }
0x16a2   :  { %v4258_v39 = vpack.c.bf16 %v4255_v13, %v4255_v13 }
0x16a4   :  { %9928 = vmatmul.mubr.msk.bf16.vlgmr.msra.gmra.mxu1 %vm820_vm5, %v4258_v39 }
0x16a5   :  { %9939 = vmatprep.mubr.msk.bf16.mxu1 %vm10889_vm0, %v10888_v0 }
0x16c2   :  { %v4244_v46 = vpop.xlane.xlu1 %4243 }
0x16c3   :  { %10769 = vrcp.f32 %v4244_v46 }
0x16c6   :  { %v4405_v41 = vpop.permute.xlu1 %4404 }
0x16c7   :  { %v4410_v44 = vsel %vm672_vm4, %v4405_v41, 0 }
0x16c8   :  { %9938 = vmatpush3.bf16.xpose.msra.mxu1 %v4410_v44 }
0x16c9   :  { %9949 = vmatprep.subr.bf16.mxu1 %v10888_v0 }
0x16ca   :  { %v4250_v43 = vpop.xlane.xlu0 %4249  ;;  %v4456_v32 = vpop.permute.xlu1 %4455 }
0x16cb   :  { %10771 = vrcp.f32 %v4250_v43  ;;  %v4461_v2 = vsel %vm672_vm4, %v4456_v32, 0 }
0x16ce   :  { %v4403_v3 = vpop.permute.xlu0 %4402  ;;  %v4454_v60 = vpop.permute.xlu1 %4453 }
0x16cf   :  { %9940 = vmatmul.mubr.msk.bf16.vlgmr.msra.gmra.mxu1 %vm672_vm4, %v4403_v3 }
0x16d0   :  { %v10770_v58 = vpop.eup %10769  ;;  %9951 = vmatprep.mubr.msk.bf16.mxu1 %vm10889_vm0, %v10888_v0 }
0x16d1   :  { %v4254_v53 = vmul.f32 %v10770_v58, %v10764_v25 }
0x16d2   :  { %v4507_v18 = vpop.permute.xlu0 %4506  ;;  %v4505_v40 = vpop.permute.xlu1 %4504 }
0x16d3   :  { %v4257_v27 = vpack.c.bf16 %v4254_v53, %v4254_v53  ;;  %v4512_v54 = vsel %vm672_vm4, %v4507_v18, 0 }
0x16d4   :  { %9950 = vmatpush3.bf16.xpose.msra.mxu1 %v4512_v54 }
0x16d5   :  { %9922 = vmatmul.mubr.msk.bf16.vlgmr.msra.gmra.mxu0 %vm820_vm5, %v4257_v27  ;;  %9961 = vmatprep.subr.bf16.mxu1 %v10888_v0 }
0x16d6   :  { %9932 = vmatpush3.bf16.msra.mxu0 %v4359_v14  ;;  %9933 = vmatprep.mubr.msk.bf16.mxu0 %vm10889_vm0, %v10888_v0 }
0x16d7   :  { %9943 = vmatprep.subr.bf16.mxu0 %v10888_v0 }
0x16d8   :  { %v10772_v63 = vpop.eup %10771 }
0x16d9   :  { %v4256_v37 = vmul.f32 %v10772_v63, %v10766_v28 }
0x16db   :  { %v4259_v1 = vpack.c.bf16 %v4256_v37, %v4256_v37  ;;  %9952 = vmatmul.mubr.msk.bf16.vlgmr.msra.gmra.mxu1 %vm672_vm4, %v4505_v40 }
0x16dc   :  { %9963 = vmatprep.mubr.msk.bf16.mxu1 %vm10889_vm0, %v10888_v0 }
0x16dd   :  { %9934 = vmatmul.mubr.msk.bf16.vlgmr.msra.gmra.mxu0 %vm820_vm5, %v4259_v1 }
0x16de   :  { %9944 = vmatpush3.bf16.xpose.msra.mxu0 %v4461_v2  ;;  %9945 = vmatprep.mubr.msk.bf16.mxu0 %vm10889_vm0, %v10888_v0 }
0x16df   :  { %9955 = vmatprep.subr.bf16.mxu0 %v10888_v0 }
0x16e5   :  { %9946 = vmatmul.mubr.msk.bf16.vlgmr.msra.gmra.mxu0 %vm672_vm4, %v4454_v60 }
0x16e6   :  { %9957 = vmatprep.mubr.msk.bf16.mxu0 %vm10889_vm0, %v10888_v0 }
0x1764   :  { %v12084_v31 = vpop.f32.mrf.mxu1 }
0x1766   :  { %v9929_v34 = vpop.f32.mrf.mxu1 }
0x1768   :  { %v4352_v9 = vpop.f32.mrf.mxu1 }
0x176a   :  { %v9930_v4 = vpop.f32.mrf.mxu1 }
0x178f   :  { %v4446_v7 = vpop.f32.mrf.mxu1 }
0x1790   :  { %v4554_v10 = vmul.f32 0.25, %v4446_v7 }
0x1791   :  { %v9941_v12 = vpop.f32.mrf.mxu1 }
0x1792   :  { %v4557_v42 = vsel %vm820_vm5, %v4554_v10, -inf }
0x1793   :  { %4558 = vmax.xlane.f32.xlu0 %v4557_v42  ;;  %v4449_v16 = vpop.f32.mrf.mxu1 }
0x1795   :  { %v4303_v45 = vpop.f32.mrf.mxu0  ;;  %v9942_v48 = vpop.f32.mrf.mxu1 }
0x1797   :  { %v9923_v52 = vpop.f32.mrf.mxu0 }
0x1799   :  { %v4306_v15 = vpop.f32.mrf.mxu0 }
0x179b   :  { %v9924_v62 = vpop.f32.mrf.mxu0  ;;  %v4548_v5 = vpop.f32.mrf.mxu1 }
0x179c   :  { %v4556_v59 = vmul.f32 0.25, %v4548_v5  ;;  %v10541_v62 = vld [vmem:[%s13188_s7 + $0x78] sm:$0xff]   ;;  %v10542_v5 = vld [vmem:[%s13188_s7 + $0x70] sm:$0xff]  }
0x179d   :  { %v12087_v19 = vpop.f32.mrf.mxu0  ;;  %v9953_v22 = vpop.f32.mrf.mxu1 }
0x179e   :  { %v4563_v38 = vsel %vm820_vm5, %v4556_v59, -inf  ;;  %v10544_v22 = vld [vmem:[%s13188_s7 + $0x60] sm:$0xff]  }
0x179f   :  { %4564 = vmax.xlane.f32.xlu0 %v4563_v38  ;;  %v9935_v56 = vpop.f32.mrf.mxu0  ;;  %v4551_v24 = vpop.f32.mrf.mxu1  ;;  %v10545_v38 = vld [vmem:[%s13188_s7 + $0x98] sm:$0xff]  }
0x17a0   :  { %v10546_v56 = vld [vmem:[%s13188_s7 + $0x90] sm:$0xff]  }
0x17a1   :  { %v4398_v25 = vpop.f32.mrf.mxu0  ;;  %v9954_v26 = vpop.f32.mrf.mxu1 }
0x17a2   :  { %v10547_v26 = vld [vmem:[%s13188_s7 + $0x88] sm:$0xff]  }
0x17a3   :  { %v9936_v28 = vpop.f32.mrf.mxu0 }
0x17a5   :  { %v4497_v8 = vpop.f32.mrf.mxu0 }
0x17a6   :  { %v4555_v35 = vmul.f32 0.25, %v4497_v8 }
0x17a7   :  { %v9947_v36 = vpop.f32.mrf.mxu0 }
0x17a8   :  { %v4560_v13 = vsel %vm820_vm5, %v4555_v35, -inf }
0x17a9   :  { %4561 = vmax.xlane.f32.xlu1 %v4560_v13  ;;  %v4500_v39 = vpop.f32.mrf.mxu0 }
0x17ab   :  { %v9948_v46 = vpop.f32.mrf.mxu0 }
0x181c   :  { %v4559_v41 = vpop.xlane.xlu0 %4558 }
0x181d   :  { %v4566_v44 = vsub.f32 %v4554_v10, %v4559_v41 }
0x181f   :  { %v4569_v43 = vmul.f32 1.442695, %v4566_v44 }
0x1821   :  { %10773 = vpow2.f32 %v4569_v43 }
0x1828   :  { %v4565_v60 = vpop.xlane.xlu0 %4564 }
0x1829   :  { %v4568_v14 = vsub.f32 %v4556_v59, %v4565_v60  ;;  %v10543_v59 = vld [vmem:[%s13188_s7 + $0x68] sm:$0xff]   ;;  %v10552_v60 = vld [vmem:[%s13188_s7 + $0xa0] sm:$0xff]  }
0x182b   :  { %v4573_v63 = vmul.f32 1.442695, %v4568_v14 }
0x182e   :  { %v10774_v32 = vpop.eup %10773 }
0x182f   :  { %v4575_v3 = vsel %vm820_vm5, %v10774_v32, 0.0 }
0x1830   :  { %4576 = vadd.xlane.f32.xlu0 %v4575_v3 }
0x1832   :  { %v4562_v58 = vpop.xlane.xlu1 %4561 }
0x1833   :  { %v4567_v53 = vsub.f32 %v4555_v35, %v4562_v58  ;;  %v10548_v35 = vld [vmem:[%s13188_s7 + $0x80] sm:$0xff]  }
0x1835   :  { %v4571_v18 = vmul.f32 1.442695, %v4567_v53 }
0x1837   :  { %10775 = vpow2.f32 %v4571_v18 }
0x1838   :  { %10777 = vpow2.f32 %v4573_v63 }
0x1844   :  { %v10776_v27 = vpop.eup %10775 }
0x1845   :  { %v4578_v54 = vsel %vm820_vm5, %v10776_v27, 0.0  ;;  %v10778_v37 = vpop.eup %10777 }
0x1846   :  { %4593 = vrot.lane.b32.xlu0 %v12001_v21, %s13211_s0  ;;  %4579 = vadd.xlane.f32.xlu1 %v4578_v54  ;;  %v4581_v40 = vsel %vm820_vm5, %v10778_v37, 0.0 }
0x184a   :  { %4689 = vrot.lane.b32.xlu0 %v12049_v30, %s13211_s0 }
0x184e   :  { %4740 = vrot.lane.b32.xlu0 %v12029_v33, %s13224_s3 }
0x1852   :  { %4752 = vrot.lane.b32.xlu0 %v4303_v45, %s13225_s28 }
0x1857   :  { %4641 = vrot.lane.b32.xlu1 %v12021_v57, %s13211_s0 }
0x187b   :  { %4582 = vadd.xlane.f32.xlu1 %v4581_v40 }
0x18b9   :  { %v4577_v21 = vpop.xlane.xlu0 %4576 }
0x18ba   :  { %10779 = vrcp.f32 %v4577_v21 }
0x18bd   :  { %v4594_v1 = vpop.permute.xlu0 %4593 }
0x18be   :  { %v4599_v30 = vsel %vm862_vm6, %v4594_v1, 0 }
0x18bf   :  { %9956 = vmatpush3.bf16.msra.mxu0 %v4599_v30 }
0x18c0   :  { %9967 = vmatprep.subr.bf16.mxu0 %v10888_v0 }
0x18c1   :  { %v4690_v34 = vpop.permute.xlu0 %4689 }
0x18c2   :  { %v4695_v9 = vsel %vm862_vm6, %v4690_v34, 0 }
0x18c5   :  { %v4741_v43 = vpop.permute.xlu0 %4740 }
0x18c6   :  { %v4773_v3 = vsel %vm672_vm4, %v11954_v6, %v4741_v43  ;;  %v10551_v6 = vld [vmem:[%s13188_s7 + $0xa8] sm:$0xff]  }
0x18c7   :  { %v10780_v33 = vpop.eup %10779 }
0x18c8   :  { %v4587_v2 = vmul.f32 %v10780_v33, %v10774_v32 }
0x18c9   :  { %v4753_v32 = vpop.permute.xlu0 %4752 }
0x18ca   :  { %v4590_v57 = vpack.c.bf16 %v4587_v2, %v4587_v2  ;;  %v4776_v58 = vsel %vm2040_vm7, %v4773_v3, %v4753_v32 }
0x18cc   :  { %9958 = vmatmul.mubr.msk.bf16.vlgmr.msra.gmra.mxu0 %vm820_vm5, %v4590_v57 }
0x18cd   :  { %9968 = vmatpush3.bf16.msra.mxu0 %v4695_v9  ;;  %9969 = vmatprep.mubr.msk.bf16.mxu0 %vm10889_vm0, %v10888_v0 }
0x18ce   :  { %9985 = vmatprep.subr.bf16.mxu0 %v10888_v0 }
0x18cf   :  { %v4580_v4 = vpop.xlane.xlu1 %4579 }
0x18d0   :  { %10781 = vrcp.f32 %v4580_v4  ;;  %v8868_v4 = vld [vmem:[%s13189_s8 + $0x3] ss:$0 sm:$0xff] }
0x18d3   :  { %v4642_v7 = vpop.permute.xlu1 %4641 }
0x18d4   :  { %v4647_v10 = vsel %vm862_vm6, %v4642_v7, 0 }
0x18d5   :  { %9962 = vmatpush3.bf16.msra.mxu1 %v4647_v10 }
0x18d6   :  { %9973 = vmatprep.subr.bf16.mxu1 %v10888_v0 }
0x18dd   :  { %v10782_v12 = vpop.eup %10781 }
0x18de   :  { %v4588_v42 = vmul.f32 %v10782_v12, %v10776_v27  ;;  %v10550_v27 = vld [vmem:[%s13188_s7 + $0xb0] sm:$0xff]  }
0x18e0   :  { %v4591_v16 = vpack.c.bf16 %v4588_v42, %v4588_v42 }
0x18e2   :  { %9964 = vmatmul.mubr.msk.bf16.vlgmr.msra.gmra.mxu1 %vm820_vm5, %v4591_v16 }
0x18e3   :  { %9981 = vmatprep.mubr.msk.bf16.mxu1 %vm10889_vm0, %v10888_v0  ;;  %9974 = vmatpush3.bf16.msra.mxu1 %v10541_v62 }
0x18e4   :  { %9975 = vmatprep.subr.bf16.mxu1 %v10888_v0 }
0x18e7   :  { %9976 = vmatpush3.bf16.msra.mxu1 %v10542_v5 }
0x18e8   :  { %9977 = vmatprep.subr.bf16.mxu1 %v10888_v0 }
0x18eb   :  { %9978 = vmatpush3.bf16.msra.mxu1 %v10543_v59 }
0x18ec   :  { %9979 = vmatprep.subr.bf16.mxu1 %v10888_v0 }
0x18ef   :  { %9980 = vmatpush3.bf16.msra.mxu1 %v10544_v22 }
0x18f0   :  { %9997 = vmatprep.subr.bf16.mxu1 %v10888_v0 }
0x1904   :  { %v4583_v45 = vpop.xlane.xlu1 %4582 }
0x1905   :  { %10783 = vrcp.f32 %v4583_v45 }
0x1912   :  { %v10784_v48 = vpop.eup %10783 }
0x1913   :  { %v4589_v52 = vmul.f32 %v10784_v48, %v10778_v37 }
0x1915   :  { %v4592_v15 = vpack.c.bf16 %v4589_v52, %v4589_v52 }
0x1917   :  { %9970 = vmatmul.mubr.msk.bf16.vlgmr.msra.gmra.mxu0 %vm820_vm5, %v4592_v15  ;;  %v8869_v15 = vld [vmem:[%s13189_s8 + $0x4] ss:$0 sm:$0xff] }
0x1918   :  { %9993 = vmatprep.mubr.msk.bf16.mxu0 %vm10889_vm0, %v10888_v0  ;;  %9986 = vmatpush3.bf16.msra.mxu0 %v10545_v38 }
0x1919   :  { %9987 = vmatprep.subr.bf16.mxu0 %v10888_v0 }
0x191c   :  { %9988 = vmatpush3.bf16.msra.mxu0 %v10546_v56 }
0x191d   :  { %9989 = vmatprep.subr.bf16.mxu0 %v10888_v0 }
0x1920   :  { %9990 = vmatpush3.bf16.msra.mxu0 %v10547_v26 }
0x1921   :  { %9991 = vmatprep.subr.bf16.mxu0 %v10888_v0 }
0x1924   :  { %9992 = vmatpush3.bf16.msra.mxu0 %v10548_v35  ;;  %v10557_v35 = vld [vmem:[#allocation2 + $0x98] sm:$0xff]  }
0x1925   :  { %10009 = vmatprep.subr.bf16.mxu0 %v10888_v0 }
0x198c   :  { %v4635_v24 = vpop.f32.mrf.mxu0 }
0x198d   :  { %4764 = vrot.lane.b32.xlu0 %v4635_v24, %s13209_s4 }
0x198e   :  { %v9959_v25 = vpop.f32.mrf.mxu0 }
0x198f   :  { %v10553_v25 = vld [vmem:[#allocation2 + $0x78] sm:$0xff]  }
0x1990   :  { %v4638_v28 = vpop.f32.mrf.mxu0 }
0x1991   :  { %4742 = vrot.lane.b32.xlu0 %v12034_v61, %s13224_s3  ;;  %v10554_v28 = vld [vmem:[#allocation2 + $0x70] sm:$0xff]  }
0x1992   :  { %v9960_v8 = vpop.f32.mrf.mxu0 }
0x1993   :  { %v10556_v8 = vld [vmem:[#allocation2 + $0x60] sm:$0xff]  }
0x1995   :  { %4754 = vrot.lane.b32.xlu0 %v12084_v31, %s13225_s28 }
0x19a2   :  { %v4683_v36 = vpop.f32.mrf.mxu1 }
0x19a3   :  { %4766 = vrot.lane.b32.xlu0 %v4683_v36, %s13209_s4  ;;  %v10558_v36 = vld [vmem:[#allocation2 + $0x90] sm:$0xff]  }
0x19a4   :  { %v9965_v13 = vpop.f32.mrf.mxu1 }
0x19a5   :  { %v10559_v13 = vld [vmem:[#allocation2 + $0x88] sm:$0xff]  }
0x19a6   :  { %v4686_v39 = vpop.f32.mrf.mxu1 }
0x19a7   :  { %4744 = vrot.lane.b32.xlu0 %v12031_v50, %s13224_s3  ;;  %v10560_v39 = vld [vmem:[#allocation2 + $0x80] sm:$0xff]  }
0x19a8   :  { %v9966_v61 = vpop.f32.mrf.mxu1 }
0x19a9   :  { %v8870_v61 = vld [vmem:[%s13189_s8 + $0x5] ss:$0 sm:$0xff] }
0x19ab   :  { %4756 = vrot.lane.b32.xlu0 %v12087_v19, %s13225_s28  ;;  %v10549_v19 = vld [vmem:[%s13188_s7 + $0xb8] sm:$0xff]  }
0x19d7   :  { %v4731_v31 = vpop.f32.mrf.mxu0 }
0x19d8   :  { %4768 = vrot.lane.b32.xlu1 %v4731_v31, %s13209_s4 }
0x19d9   :  { %v9971_v46 = vpop.f32.mrf.mxu0 }
0x19db   :  { %v4734_v41 = vpop.f32.mrf.mxu0 }
0x19dd   :  { %v9972_v44 = vpop.f32.mrf.mxu0 }
0x19ff   :  { %v4765_v53 = vpop.permute.xlu0 %4764 }
0x1a00   :  { %v4779_v50 = vsel %vm2044_vm8, %v4776_v58, %v4765_v53 }
0x1a01   :  { %v4782_v18 = vpack.c.bf16 %v4779_v50, %v4779_v50 }
0x1a03   :  { %9982 = vmatmul.mubr.msk.bf16.vlgmr.msra.gmra.mxu1 %vm156_vm3, %v4782_v18  ;;  %v4743_v54 = vpop.permute.xlu0 %4742 }
0x1a04   :  { %9998 = vmatpush3.bf16.msra.mxu1 %v10549_v19  ;;  %10005 = vmatprep.mubr.msk.bf16.mxu1 %vm10889_vm0, %v10888_v0  ;;  %v4774_v63 = vsel %vm672_vm4, %v11956_v55, %v4743_v54 }
0x1a05   :  { %9999 = vmatprep.subr.bf16.mxu1 %v10888_v0 }
0x1a07   :  { %v4755_v14 = vpop.permute.xlu0 %4754 }
0x1a08   :  { %10000 = vmatpush3.bf16.msra.mxu1 %v10550_v27  ;;  %v4777_v37 = vsel %vm2040_vm7, %v4774_v63, %v4755_v14  ;;  %v8886_v63 = vld [vmem:[%s13190_s9 + $0x3] ss:$0 sm:$0xff] }
0x1a09   :  { %10001 = vmatprep.subr.bf16.mxu1 %v10888_v0 }
0x1a0c   :  { %10002 = vmatpush3.bf16.msra.mxu1 %v10551_v6 }
0x1a0d   :  { %10003 = vmatprep.subr.bf16.mxu1 %v10888_v0 }
0x1a10   :  { %10004 = vmatpush3.bf16.msra.mxu1 %v10552_v60 }
0x1a11   :  { %10021 = vmatprep.subr.bf16.mxu1 %v10888_v0 }
0x1a15   :  { %v4767_v40 = vpop.permute.xlu0 %4766 }
0x1a16   :  { %v4780_v21 = vsel %vm2044_vm8, %v4777_v37, %v4767_v40 }
0x1a17   :  { %v4783_v1 = vpack.c.bf16 %v4780_v21, %v4780_v21 }
0x1a19   :  { %9994 = vmatmul.mubr.msk.bf16.vlgmr.msra.gmra.mxu0 %vm156_vm3, %v4783_v1  ;;  %v4745_v30 = vpop.permute.xlu0 %4744  ;;  %v8889_v1 = vld [vmem:[%s13191_s10 + $0x3] ss:$0 sm:$0xff] }
0x1a1a   :  { %10017 = vmatprep.mubr.msk.bf16.mxu0 %vm10889_vm0, %v10888_v0  ;;  %v4775_v2 = vsel %vm672_vm4, %v11960_v29, %v4745_v30  ;;  %10010 = vmatpush3.bf16.msra.mxu0 %v10553_v25 }
0x1a1b   :  { %10011 = vmatprep.subr.bf16.mxu0 %v10888_v0 }
0x1a1d   :  { %v4757_v33 = vpop.permute.xlu0 %4756 }
0x1a1e   :  { %v4778_v34 = vsel %vm2040_vm7, %v4775_v2, %v4757_v33  ;;  %10012 = vmatpush3.bf16.msra.mxu0 %v10554_v28 }
0x1a1f   :  { %10013 = vmatprep.subr.bf16.mxu0 %v10888_v0 }
0x1a4a   :  { %v4769_v57 = vpop.permute.xlu1 %4768 }
0x1a4b   :  { %v4781_v55 = vsel %vm2044_vm8, %v4778_v34, %v4769_v57 }
0x1a4c   :  { %v4784_v9 = vpack.c.bf16 %v4781_v55, %v4781_v55  ;;  %v10561_v55 = vld [vmem:[#allocation2 + $0xb8] sm:$0xff]  }
0x1a4e   :  { %10006 = vmatmul.mubr.msk.bf16.vlgmr.msra.gmra.mxu1 %vm156_vm3, %v4784_v9 }
0x1a4f   :  { %10029 = vmatprep.mubr.msk.bf16.mxu1 %vm10889_vm0, %v10888_v0  ;;  %10022 = vmatpush3.bf16.msra.mxu1 %v10557_v35 }
0x1a50   :  { %10023 = vmatprep.subr.bf16.mxu1 %v10888_v0 }
0x1a53   :  { %10024 = vmatpush3.bf16.msra.mxu1 %v10558_v36 }
0x1a54   :  { %10025 = vmatprep.subr.bf16.mxu1 %v10888_v0 }
0x1a57   :  { %10026 = vmatpush3.bf16.msra.mxu1 %v10559_v13  ;;  %v10571_v13 = vld [vmem:[%s13196_s15 + $0xc8] sm:$0xff]  }
0x1a58   :  { %10027 = vmatprep.subr.bf16.mxu1 %v10888_v0 }
0x1a5b   :  { %10028 = vmatpush3.bf16.msra.mxu1 %v10560_v39 }
0x1a5c   :  { %10045 = vmatprep.subr.bf16.mxu1 %v10888_v0 }
0x1ac3   :  { %v4864_v7 = vpop.f32.mrf.mxu1 }
0x1ac4   :  { %v4865_v10 = vadd.f32 %v8868_v4, %v4864_v7 }
0x1ac5   :  { %v9983_v12 = vpop.f32.mrf.mxu1 }
0x1ac6   :  { %v12202_v29 = vadd.f32 %v4865_v10, %v11791_v20  ;;  %v10562_v10 = vld [vmem:[#allocation2 + $0xb0] sm:$0xff]   ;;  %v10563_v12 = vld [vmem:[#allocation2 + $0xa8] sm:$0xff]  }
0x1ac7   :  { %v4867_v42 = vpop.f32.mrf.mxu1 }
0x1ac8   :  { %v5007_v16 = vsel %vm156_vm3, %v12202_v29, 0.0  ;;  %v5019_v45 = vmul.f32 %v12202_v29, %v12202_v29 }
0x1ac9   :  { %5008 = vadd.xlane.f32.xlu0 %v5007_v16  ;;  %v9984_v48 = vpop.f32.mrf.mxu1 }
0x1aca   :  { %v5022_v52 = vsel %vm156_vm3, %v5019_v45, 0.0  ;;  %v8887_v45 = vld [vmem:[%s13190_s9 + $0x4] ss:$0 sm:$0xff] }
0x1acb   :  { %5023 = vadd.xlane.f32.xlu1 %v5022_v52  ;;  %v8890_v52 = vld [vmem:[%s13191_s10 + $0x4] ss:$0 sm:$0xff] }
0x1ad9   :  { %v4931_v62 = vpop.f32.mrf.mxu0 }
0x1ada   :  { %v4932_v5 = vadd.f32 %v8869_v15, %v4931_v62 }
0x1adb   :  { %v9995_v20 = vpop.f32.mrf.mxu0 }
0x1adc   :  { %v12213_v59 = vadd.f32 %v4932_v5, %v11826_v11  ;;  %v10555_v11 = vld [vmem:[#allocation2 + $0x68] sm:$0xff]   ;;  %v10565_v5 = vld [vmem:[%s13196_s15 + $0xf8] sm:$0xff]  }
0x1add   :  { %v4934_v22 = vpop.f32.mrf.mxu0  ;;  %10014 = vmatpush3.bf16.msra.mxu0 %v10555_v11 }
0x1ade   :  { %v5010_v38 = vsel %vm156_vm3, %v12213_v59, 0.0  ;;  %v5020_v56 = vmul.f32 %v12213_v59, %v12213_v59  ;;  %10015 = vmatprep.subr.bf16.mxu0 %v10888_v0  ;;  %v10567_v22 = vld [vmem:[%s13196_s15 + $0xe8] sm:$0xff]  }
0x1adf   :  { %5011 = vadd.xlane.f32.xlu0 %v5010_v38  ;;  %v9996_v24 = vpop.f32.mrf.mxu0  ;;  %v10568_v38 = vld [vmem:[%s13196_s15 + $0xe0] sm:$0xff]  }
0x1ae0   :  { %v5025_v26 = vsel %vm156_vm3, %v5020_v56, 0.0  ;;  %v10569_v56 = vld [vmem:[%s13196_s15 + $0xd8] sm:$0xff]   ;;  %v10570_v24 = vld [vmem:[%s13196_s15 + $0xd0] sm:$0xff]  }
0x1ae1   :  { %10016 = vmatpush3.bf16.msra.mxu0 %v10556_v8 }
0x1ae2   :  { %10033 = vmatprep.subr.bf16.mxu0 %v10888_v0 }
0x1ae3   :  { %5026 = vadd.xlane.f32.xlu0 %v5025_v26 }
0x1b0e   :  { %v4998_v31 = vpop.f32.mrf.mxu1 }
0x1b0f   :  { %v4999_v46 = vadd.f32 %v8870_v61, %v4998_v31  ;;  %v10573_v61 = vld [vmem:[%s13196_s15 + $0xc0] sm:$0xff]  }
0x1b10   :  { %v10007_v41 = vpop.f32.mrf.mxu1 }
0x1b11   :  { %v12232_v44 = vadd.f32 %v4999_v46, %v11840_v17  ;;  %v8888_v46 = vld [vmem:[%s13190_s9 + $0x5] ss:$0 sm:$0xff] }
0x1b12   :  { %v5001_v43 = vpop.f32.mrf.mxu1 }
0x1b13   :  { %v5013_v32 = vsel %vm156_vm3, %v12232_v44, 0.0  ;;  %v5021_v3 = vmul.f32 %v12232_v44, %v12232_v44  ;;  %v8891_v43 = vld [vmem:[%s13191_s10 + $0x5] ss:$0 sm:$0xff] }
0x1b14   :  { %v10008_v58 = vpop.f32.mrf.mxu1  ;;  %5014 = vadd.xlane.f32.xlu0 %v5013_v32 }
0x1b15   :  { %v5028_v53 = vsel %vm156_vm3, %v5021_v3, 0.0 }
0x1b18   :  { %5029 = vadd.xlane.f32.xlu0 %v5028_v53  ;;  %v10574_v53 = vld [vmem:[%s13196_s15 + $0x130] sm:$0xff]  }
0x1b52   :  { %v5009_v50 = vpop.xlane.xlu0 %5008 }
0x1b53   :  { %v5016_v19 = vmul.f32 0.015625, %v5009_v50  ;;  %v10575_v50 = vld [vmem:[%s13196_s15 + $0x128] sm:$0xff]  }
0x1b54   :  { %v5024_v18 = vpop.xlane.xlu1 %5023 }
0x1b55   :  { %v5034_v27 = vmul.f32 %v5016_v19, %v5016_v19  ;;  %v5031_v6 = vmul.f32 0.015625, %v5024_v18  ;;  %v5040_v60 = vsub.f32 %v12202_v29, %v5016_v19  ;;  %v10564_v29 = vld [vmem:[#allocation2 + $0xa0] sm:$0xff]   ;;  %v10577_v18 = vld [vmem:[%s13196_s15 + $0x118] sm:$0xff]  }
0x1b56   :  { %v10576_v19 = vld [vmem:[%s13196_s15 + $0x120] sm:$0xff]  }
0x1b57   :  { %v5037_v54 = vsub.f32 %v5031_v6, %v5034_v27  ;;  %v10578_v27 = vld [vmem:[%s13196_s15 + $0x110] sm:$0xff]   ;;  %v10579_v6 = vld [vmem:[%s13196_s15 + $0x108] sm:$0xff]  }
0x1b59   :  { %v5043_v17 = vadd.f32 1e-05, %v5037_v54  ;;  %v10580_v54 = vld [vmem:[%s13196_s15 + $0x100] sm:$0xff]  }
0x1b5b   :  { %10785 = vrsqrt.f32 %v5043_v17  ;;  %v8892_v17 = vld [vmem:[%s13195_s14 + $0x3] ss:$0 sm:$0xff] }
0x1b68   :  { %v10786_v14 = vpop.eup %10785  ;;  %v5012_v37 = vpop.xlane.xlu0 %5011 }
0x1b69   :  { %v5049_v40 = vmul.f32 %v10786_v14, %v5040_v60  ;;  %v5017_v21 = vmul.f32 0.015625, %v5012_v37 }
0x1b6b   :  { %v5070_v30 = vmul.f32 %v8886_v63, %v5049_v40  ;;  %v5035_v2 = vmul.f32 %v5017_v21, %v5017_v21  ;;  %v5041_v42 = vsub.f32 %v12213_v59, %v5017_v21  ;;  %v10566_v59 = vld [vmem:[%s13196_s15 + $0xf0] sm:$0xff]   ;;  %v10581_v21 = vld [vmem:[%s13196_s15 + $0x178] sm:$0xff]  }
0x1b6c   :  { %v5027_v33 = vpop.xlane.xlu0 %5026 }
0x1b6d   :  { %v5032_v34 = vmul.f32 0.015625, %v5027_v33  ;;  %v12246_v57 = vadd.f32 %v8889_v1, %v5070_v30  ;;  %v10582_v33 = vld [vmem:[%s13196_s15 + $0x170] sm:$0xff]  }
0x1b6f   :  { %v5038_v9 = vsub.f32 %v5032_v34, %v5035_v2  ;;  %v5094_v4 = vpack.c.bf16 %v12246_v57, %v12246_v57  ;;  %v10583_v2 = vld [vmem:[%s13196_s15 + $0x168] sm:$0xff]   ;;  %v10584_v34 = vld [vmem:[%s13196_s15 + $0x160] sm:$0xff]  }
0x1b71   :  { %v5044_v7 = vadd.f32 1e-05, %v5038_v9  ;;  %10018 = vmatmul.mubr.msk.bf16.vlgmr.msra.gmra.mxu0 %vm156_vm3, %v5094_v4  ;;  %v8893_v9 = vld [vmem:[%s13195_s14 + $0x4] ss:$0 sm:$0xff] }
0x1b72   :  { %10034 = vmatpush3.bf16.msra.mxu0 %v10561_v55  ;;  %10041 = vmatprep.mubr.msk.bf16.mxu0 %vm10889_vm0, %v10888_v0  ;;  %v10585_v55 = vld [vmem:[%s13196_s15 + $0x158] sm:$0xff]  }
0x1b73   :  { %10787 = vrsqrt.f32 %v5044_v7  ;;  %10035 = vmatprep.subr.bf16.mxu0 %v10888_v0  ;;  %v10586_v7 = vld [vmem:[%s13196_s15 + $0x150] sm:$0xff]  }
0x1b76   :  { %10036 = vmatpush3.bf16.msra.mxu0 %v10562_v10 }
0x1b77   :  { %10037 = vmatprep.subr.bf16.mxu0 %v10888_v0 }
0x1b7a   :  { %10038 = vmatpush3.bf16.msra.mxu0 %v10563_v12 }
0x1b7b   :  { %10039 = vmatprep.subr.bf16.mxu0 %v10888_v0 }
0x1b7e   :  { %10040 = vmatpush3.bf16.msra.mxu0 %v10564_v29 }
0x1b7f   :  { %10065 = vmatprep.subr.bf16.mxu0 %v10888_v0 }
0x1b80   :  { %v10788_v16 = vpop.eup %10787 }
0x1b81   :  { %v5050_v48 = vmul.f32 %v10788_v16, %v5041_v42  ;;  %v10587_v16 = vld [vmem:[%s13196_s15 + $0x148] sm:$0xff]  }
0x1b83   :  { %v5071_v15 = vmul.f32 %v8887_v45, %v5050_v48 }
0x1b85   :  { %v12264_v62 = vadd.f32 %v8890_v52, %v5071_v15  ;;  %v10588_v52 = vld [vmem:[%s13196_s15 + $0x140] sm:$0xff]  }
0x1b86   :  { %v8894_v15 = vld [vmem:[%s13195_s14 + $0x5] ss:$0 sm:$0xff] }
0x1b87   :  { %v5095_v20 = vpack.c.bf16 %v12264_v62, %v12264_v62 }
0x1b89   :  { %10030 = vmatmul.mubr.msk.bf16.vlgmr.msra.gmra.mxu1 %vm156_vm3, %v5095_v20 }
0x1b8a   :  { %10046 = vmatpush3.bf16.msra.mxu1 %v10565_v5  ;;  %10061 = vmatprep.mubr.msk.bf16.mxu1 %vm10889_vm0, %v10888_v0 }
0x1b8b   :  { %10047 = vmatprep.subr.bf16.mxu1 %v10888_v0 }
0x1b8e   :  { %10048 = vmatpush3.bf16.msra.mxu1 %v10566_v59 }
0x1b8f   :  { %10049 = vmatprep.subr.bf16.mxu1 %v10888_v0 }
0x1b92   :  { %10050 = vmatpush3.bf16.msra.mxu1 %v10567_v22 }
0x1b93   :  { %10051 = vmatprep.subr.bf16.mxu1 %v10888_v0 }
0x1b96   :  { %10052 = vmatpush3.bf16.msra.mxu1 %v10568_v38 }
0x1b97   :  { %10053 = vmatprep.subr.bf16.mxu1 %v10888_v0 }
0x1b9a   :  { %10054 = vmatpush3.bf16.msra.mxu1 %v10569_v56 }
0x1b9b   :  { %10055 = vmatprep.subr.bf16.mxu1 %v10888_v0 }
0x1b9d   :  { %v5015_v25 = vpop.xlane.xlu0 %5014 }
0x1b9e   :  { %v5018_v26 = vmul.f32 0.015625, %v5015_v25  ;;  %10056 = vmatpush3.bf16.msra.mxu1 %v10570_v24  ;;  %v8910_v25 = vld [vmem:[%s13197_s16 + $0x3] ss:$0 sm:$0xff] }
0x1b9f   :  { %10057 = vmatprep.subr.bf16.mxu1 %v10888_v0 }
0x1ba0   :  { %v5036_v11 = vmul.f32 %v5018_v26, %v5018_v26  ;;  %v5042_v39 = vsub.f32 %v12232_v44, %v5018_v26  ;;  %v10572_v44 = vld [vmem:[%s13196_s15 + $0x138] sm:$0xff]  }
0x1ba1   :  { %v5030_v28 = vpop.xlane.xlu0 %5029 }
0x1ba2   :  { %v5033_v8 = vmul.f32 0.015625, %v5030_v28  ;;  %10058 = vmatpush3.bf16.msra.mxu1 %v10571_v13 }
0x1ba3   :  { %10059 = vmatprep.subr.bf16.mxu1 %v10888_v0 }
0x1ba4   :  { %v5039_v35 = vsub.f32 %v5033_v8, %v5036_v11 }
0x1ba6   :  { %v5045_v36 = vadd.f32 1e-05, %v5039_v35  ;;  %10060 = vmatpush3.bf16.msra.mxu1 %v10573_v61 }
0x1ba7   :  { %10085 = vmatprep.subr.bf16.mxu1 %v10888_v0 }
0x1ba8   :  { %10789 = vrsqrt.f32 %v5045_v36 }
0x1bb5   :  { %v10790_v31 = vpop.eup %10789 }
0x1bb6   :  { %v5051_v41 = vmul.f32 %v10790_v31, %v5042_v39  ;;  %v8911_v31 = vld [vmem:[%s13197_s16 + $0x4] ss:$0 sm:$0xff] }
0x1bb8   :  { %v5072_v32 = vmul.f32 %v8888_v46, %v5051_v41 }
0x1bba   :  { %v12310_v3 = vadd.f32 %v8891_v43, %v5072_v32 }
0x1bbc   :  { %v5096_v58 = vpack.c.bf16 %v12310_v3, %v12310_v3 }
0x1bbe   :  { %10042 = vmatmul.mubr.msk.bf16.vlgmr.msra.gmra.mxu0 %vm156_vm3, %v5096_v58 }
0x1bbf   :  { %10066 = vmatpush3.bf16.msra.mxu0 %v10572_v44  ;;  %10081 = vmatprep.mubr.msk.bf16.mxu0 %vm10889_vm0, %v10888_v0 }
0x1bc0   :  { %10067 = vmatprep.subr.bf16.mxu0 %v10888_v0 }
0x1bc3   :  { %10068 = vmatpush3.bf16.msra.mxu0 %v10574_v53  ;;  %v10591_v53 = vld [vmem:[%s13222_s26 + $0x1b4] ss:$8 sps:$4 sm:$0xff]  }
0x1bc4   :  { %10069 = vmatprep.subr.bf16.mxu0 %v10888_v0 }
0x1bc7   :  { %10070 = vmatpush3.bf16.msra.mxu0 %v10575_v50 }
0x1bc8   :  { %10071 = vmatprep.subr.bf16.mxu0 %v10888_v0 }
0x1bcb   :  { %10072 = vmatpush3.bf16.msra.mxu0 %v10576_v19  ;;  %v10589_v19 = vld [vmem:[%s13222_s26 + $0x1b0] ss:$8 sps:$4 sm:$0xff]  }
0x1bcc   :  { %10073 = vmatprep.subr.bf16.mxu0 %v10888_v0 }
0x1bcf   :  { %10074 = vmatpush3.bf16.msra.mxu0 %v10577_v18  ;;  %v10594_v18 = vld [vmem:[%s13222_s26 + $0x1a4] ss:$8 sps:$4 sm:$0xff]  }
0x1bd0   :  { %10075 = vmatprep.subr.bf16.mxu0 %v10888_v0 }
0x1bd3   :  { %10076 = vmatpush3.bf16.msra.mxu0 %v10578_v27  ;;  %v10592_v27 = vld [vmem:[%s13222_s26 + $0x1a0] ss:$8 sps:$4 sm:$0xff]  }
0x1bd4   :  { %10077 = vmatprep.subr.bf16.mxu0 %v10888_v0 }
0x1bd7   :  { %10078 = vmatpush3.bf16.msra.mxu0 %v10579_v6  ;;  %v10597_v6 = vld [vmem:[%s13222_s26 + $0x194] ss:$8 sps:$4 sm:$0xff]  }
0x1bd8   :  { %10079 = vmatprep.subr.bf16.mxu0 %v10888_v0 }
0x1bdb   :  { %10080 = vmatpush3.bf16.msra.mxu0 %v10580_v54  ;;  %v10595_v54 = vld [vmem:[%s13222_s26 + $0x190] ss:$8 sps:$4 sm:$0xff]  }
0x1bdc   :  { %5937 = vmatprep.subr.bf16.mxu0 %v10591_v53 }
0x1c31   :  { %v5176_v60 = vpop.f32.mrf.mxu0 }
0x1c32   :  { %v5177_v14 = vadd.f32 %v8892_v17, %v5176_v60  ;;  %v10600_v17 = vld [vmem:[%s13222_s26 + $0x184] ss:$8 sps:$4 sm:$0xff]   ;;  %v10598_v60 = vld [vmem:[%s13222_s26 + $0x180] ss:$8 sps:$4 sm:$0xff]  }
0x1c33   :  { %v10019_v63 = vpop.f32.mrf.mxu0 }
0x1c34   :  { %v5316_v37 = vmax.f32 %v5177_v14, 0.0  ;;  %v10603_v14 = vld [vmem:[%s13222_s26 + $0x1f4] ss:$8 sps:$4 sm:$0xff]   ;;  %v8912_v63 = vld [vmem:[%s13197_s16 + $0x5] ss:$0 sm:$0xff] }
0x1c35   :  { %v5179_v40 = vpop.f32.mrf.mxu0 }
0x1c36   :  { %v5319_v1 = vpack.c.bf16 %v5316_v37, %v5316_v37 }
0x1c37   :  { %v10020_v30 = vpop.f32.mrf.mxu0 }
0x1c38   :  { %10062 = vmatmul.mubr.bf16.vlgmr.msra.gmra.mxu1 %v5319_v1 }
0x1c39   :  { %10086 = vmatpush3.bf16.msra.mxu1 %v10581_v21  ;;  %10101 = vmatprep.mubr.msk.bf16.mxu1 %vm10889_vm0, %v10888_v0 }
0x1c3a   :  { %10087 = vmatprep.subr.bf16.mxu1 %v10888_v0 }
0x1c3d   :  { %10088 = vmatpush3.bf16.msra.mxu1 %v10582_v33 }
0x1c3e   :  { %10089 = vmatprep.subr.bf16.mxu1 %v10888_v0 }
0x1c41   :  { %10090 = vmatpush3.bf16.msra.mxu1 %v10583_v2 }
0x1c42   :  { %10091 = vmatprep.subr.bf16.mxu1 %v10888_v0 }
0x1c45   :  { %10092 = vmatpush3.bf16.msra.mxu1 %v10584_v34 }
0x1c46   :  { %10093 = vmatprep.subr.bf16.mxu1 %v10888_v0 }
0x1c49   :  { %v5243_v4 = vpop.f32.mrf.mxu1  ;;  %10094 = vmatpush3.bf16.msra.mxu1 %v10585_v55 }
0x1c4a   :  { %v5244_v10 = vadd.f32 %v8893_v9, %v5243_v4  ;;  %10095 = vmatprep.subr.bf16.mxu1 %v10888_v0  ;;  %v10615_v9 = vld [vmem:[%s13222_s26 + $0x234] ss:$8 sps:$4 sm:$0xff]   ;;  %v10618_v4 = vld [vmem:[%s13222_s26 + $0x224] ss:$8 sps:$4 sm:$0xff]  }
0x1c4b   :  { %v10031_v12 = vpop.f32.mrf.mxu1 }
0x1c4c   :  { %v5317_v29 = vmax.f32 %v5244_v10, 0.0  ;;  %v10621_v10 = vld [vmem:[%s13222_s26 + $0x214] ss:$8 sps:$4 sm:$0xff]   ;;  %v10619_v12 = vld [vmem:[%s13222_s26 + $0x210] ss:$8 sps:$4 sm:$0xff]  }
0x1c4d   :  { %v5246_v42 = vpop.f32.mrf.mxu1  ;;  %10096 = vmatpush3.bf16.msra.mxu1 %v10586_v7  ;;  %v10616_v7 = vld [vmem:[%s13222_s26 + $0x220] ss:$8 sps:$4 sm:$0xff]  }
0x1c4e   :  { %v5320_v45 = vpack.c.bf16 %v5317_v29, %v5317_v29  ;;  %10097 = vmatprep.subr.bf16.mxu1 %v10888_v0  ;;  %v10622_v29 = vld [vmem:[%s13222_s26 + $0x200] ss:$8 sps:$4 sm:$0xff]   ;;  %v10624_v42 = vld [vmem:[%s13222_s26 + $0x204] ss:$8 sps:$4 sm:$0xff]  }
0x1c4f   :  { %v10032_v48 = vpop.f32.mrf.mxu1 }
0x1c50   :  { %10082 = vmatmul.mubr.bf16.vlgmr.msra.gmra.mxu0 %v5320_v45 }
0x1c51   :  { %10098 = vmatpush3.bf16.msra.mxu1 %v10587_v16  ;;  %5961 = vmatprep.mubr.bf16.mxu0 %v10890_v23 }
0x1c52   :  { %10099 = vmatprep.subr.bf16.mxu1 %v10888_v0  ;;  %5938 = vmatpush1.bf16.msra.mxu0 %v10589_v19 }
0x1c53   :  { %5939 = vmatprep.subr.bf16.mxu0 %v10594_v18 }
0x1c55   :  { %10100 = vmatpush3.bf16.msra.mxu1 %v10588_v52 }
0x1c56   :  { %5940 = vmatpush1.bf16.msra.mxu0 %v10592_v27  ;;  %6105 = vmatprep.subr.bf16.mxu1 %v10615_v9 }
0x1c57   :  { %5941 = vmatprep.subr.bf16.mxu0 %v10597_v6 }
0x1c5a   :  { %5942 = vmatpush1.bf16.msra.mxu0 %v10595_v54 }
0x1c5b   :  { %5943 = vmatprep.subr.bf16.mxu0 %v10600_v17 }
0x1c5e   :  { %5944 = vmatpush1.bf16.msra.mxu0 %v10598_v60 }
0x1c5f   :  { %6021 = vmatprep.subr.bf16.mxu0 %v10603_v14 }
0x1c7e   :  { %v5310_v5 = vpop.f32.mrf.mxu0 }
0x1c7f   :  { %v5311_v20 = vadd.f32 %v8894_v15, %v5310_v5 }
0x1c80   :  { %v10043_v59 = vpop.f32.mrf.mxu0 }
0x1c81   :  { %v5318_v22 = vmax.f32 %v5311_v20, 0.0 }
0x1c82   :  { %v5313_v38 = vpop.f32.mrf.mxu0 }
0x1c83   :  { %v5321_v56 = vpack.c.bf16 %v5318_v22, %v5318_v22  ;;  %v8937_v38 = vld [vmem:[%s13192_s11 + $0x3] ss:$0 sm:$0xff] }
0x1c84   :  { %v10044_v24 = vpop.f32.mrf.mxu0 }
0x1c85   :  { %10102 = vmatmul.mubr.bf16.vlgmr.msra.gmra.mxu1 %v5321_v56 }
0x1c86   :  { %6129 = vmatprep.mubr.bf16.mxu1 %v10890_v23 }
0x1cf8   :  { %v5422_v26 = vpop.f32.mrf.mxu1 }
0x1cf9   :  { %v5423_v28 = vadd.f32 %v8910_v25, %v5422_v26  ;;  %v8940_v25 = vld [vmem:[%s13193_s12 + $0x3] ss:$0 sm:$0xff] }
0x1cfa   :  { %v10063_v11 = vpop.f32.mrf.mxu1 }
0x1cfb   :  { %v12396_v8 = vadd.f32 %v5423_v28, %v12246_v57 }
0x1cfc   :  { %v5425_v35 = vpop.f32.mrf.mxu1 }
0x1cfd   :  { %v5607_v36 = vsel %vm156_vm3, %v12396_v8, 0.0  ;;  %v5619_v13 = vmul.f32 %v12396_v8, %v12396_v8 }
0x1cfe   :  { %5608 = vadd.xlane.f32.xlu0 %v5607_v36  ;;  %v10064_v39 = vpop.f32.mrf.mxu1 }
0x1cff   :  { %v5622_v61 = vsel %vm156_vm3, %v5619_v13, 0.0 }
0x1d00   :  { %5623 = vadd.xlane.f32.xlu1 %v5622_v61 }
0x1d10   :  { %v5510_v46 = vpop.f32.mrf.mxu0 }
0x1d11   :  { %v5511_v41 = vadd.f32 %v8911_v31, %v5510_v46  ;;  %v10606_v31 = vld [vmem:[%s13222_s26 + $0x1e4] ss:$8 sps:$4 sm:$0xff]  }
0x1d12   :  { %v10083_v57 = vpop.f32.mrf.mxu0 }
0x1d13   :  { %v12407_v43 = vadd.f32 %v5511_v41, %v12264_v62  ;;  %v10604_v41 = vld [vmem:[%s13222_s26 + $0x1e0] ss:$8 sps:$4 sm:$0xff]   ;;  %v10609_v57 = vld [vmem:[%s13222_s26 + $0x1d4] ss:$8 sps:$4 sm:$0xff]  }
0x1d14   :  { %v5513_v32 = vpop.f32.mrf.mxu0 }
0x1d15   :  { %v5610_v44 = vsel %vm156_vm3, %v12407_v43, 0.0  ;;  %v5620_v58 = vmul.f32 %v12407_v43, %v12407_v43  ;;  %v10607_v32 = vld [vmem:[%s13222_s26 + $0x1d0] ss:$8 sps:$4 sm:$0xff]  }
0x1d16   :  { %5611 = vadd.xlane.f32.xlu0 %v5610_v44  ;;  %v10084_v50 = vpop.f32.mrf.mxu0  ;;  %v10612_v44 = vld [vmem:[%s13222_s26 + $0x1c4] ss:$8 sps:$4 sm:$0xff]  }
0x1d17   :  { %v5625_v62 = vsel %vm156_vm3, %v5620_v58, 0.0  ;;  %v8938_v50 = vld [vmem:[%s13192_s11 + $0x4] ss:$0 sm:$0xff] }
0x1d18   :  { %5626 = vadd.xlane.f32.xlu1 %v5625_v62  ;;  %v8941_v62 = vld [vmem:[%s13193_s12 + $0x4] ss:$0 sm:$0xff] }
0x1d45   :  { %v5598_v37 = vpop.f32.mrf.mxu1 }
0x1d46   :  { %v5599_v40 = vadd.f32 %v8912_v63, %v5598_v37 }
0x1d47   :  { %v10103_v21 = vpop.f32.mrf.mxu1 }
0x1d48   :  { %v12445_v1 = vadd.f32 %v5599_v40, %v12310_v3  ;;  %v10613_v3 = vld [vmem:[%s13222_s26 + $0x230] ss:$8 sps:$4 sm:$0xff]  }
0x1d49   :  { %v5601_v30 = vpop.f32.mrf.mxu1  ;;  %6106 = vmatpush1.bf16.msra.mxu1 %v10613_v3 }
0x1d4a   :  { %v5613_v33 = vsel %vm156_vm3, %v12445_v1, 0.0  ;;  %v5621_v2 = vmul.f32 %v12445_v1, %v12445_v1  ;;  %6107 = vmatprep.subr.bf16.mxu1 %v10618_v4  ;;  %v8939_v30 = vld [vmem:[%s13192_s11 + $0x5] ss:$0 sm:$0xff] }
0x1d4b   :  { %v10104_v34 = vpop.f32.mrf.mxu1  ;;  %5614 = vadd.xlane.f32.xlu0 %v5613_v33 }
0x1d4c   :  { %v5628_v55 = vsel %vm156_vm3, %v5621_v2, 0.0  ;;  %v8942_v2 = vld [vmem:[%s13193_s12 + $0x5] ss:$0 sm:$0xff] }
0x1d4d   :  { %5629 = vadd.xlane.f32.xlu1 %v5628_v55  ;;  %6108 = vmatpush1.bf16.msra.mxu1 %v10616_v7 }
0x1d4e   :  { %6109 = vmatprep.subr.bf16.mxu1 %v10621_v10 }
0x1d51   :  { %6110 = vmatpush1.bf16.msra.mxu1 %v10619_v12 }
0x1d52   :  { %6111 = vmatprep.subr.bf16.mxu1 %v10624_v42 }
0x1d55   :  { %6112 = vmatpush1.bf16.msra.mxu1 %v10622_v29 }
0x1d56   :  { %10117 = vmatprep.subr.bf16.mxu1 %v10888_v0 }
0x1d87   :  { %v5609_v16 = vpop.xlane.xlu0 %5608 }
0x1d88   :  { %v5616_v45 = vmul.f32 0.015625, %v5609_v16  ;;  %v8968_v16 = vld [vmem:[%s13187_s6 + $0xe] sm:$0x3] }
0x1d89   :  { %v5624_v48 = vpop.xlane.xlu1 %5623 }
0x1d8a   :  { %v5634_v52 = vmul.f32 %v5616_v45, %v5616_v45  ;;  %v5631_v15 = vmul.f32 0.015625, %v5624_v48  ;;  %v5640_v59 = vsub.f32 %v12396_v8, %v5616_v45  ;;  %v10601_v8 = vld [vmem:[%s13222_s26 + $0x1f0] ss:$8 sps:$4 sm:$0xff]   ;;  %v5867_v45 = vrot.slane %v8968_v16, %v11151_v47 }
0x1d8b   :  { %v5871_v48 = vrot.slane %v8968_v16, %v11156_v49 }
0x1d8c   :  { %v5637_v5 = vsub.f32 %v5631_v15, %v5634_v52 }
0x1d8e   :  { %v5643_v20 = vadd.f32 1e-05, %v5637_v5 }
0x1d90   :  { %10791 = vrsqrt.f32 %v5643_v20 }
0x1d9d   :  { %v10792_v22 = vpop.eup %10791 }
0x1d9e   :  { %v5649_v56 = vmul.f32 %v10792_v22, %v5640_v59 }
0x1d9f   :  { %v5612_v24 = vpop.xlane.xlu0 %5611 }
0x1da0   :  { %v5670_v26 = vmul.f32 %v8937_v38, %v5649_v56  ;;  %v5617_v28 = vmul.f32 0.015625, %v5612_v24  ;;  %v8969_v56 = vld [vmem:[%s13187_s6 + $0x10] sm:$0x3] }
0x1da1   :  { %v5627_v11 = vpop.xlane.xlu1 %5626  ;;  %v5875_v24 = vrot.slane %v8969_v56, %v11151_v47 }
0x1da2   :  { %v5635_v35 = vmul.f32 %v5617_v28, %v5617_v28  ;;  %v5632_v36 = vmul.f32 0.015625, %v5627_v11  ;;  %v12484_v13 = vadd.f32 %v8940_v25, %v5670_v26  ;;  %v5641_v58 = vsub.f32 %v12407_v43, %v5617_v28 }
0x1da3   :  { %v5879_v25 = vrot.slane %v8969_v56, %v11156_v49 }
0x1da4   :  { %v5638_v39 = vsub.f32 %v5632_v36, %v5635_v35  ;;  %v5850_v61 = vpack.c.bf16 %v12484_v13, %v12484_v13 }
0x1da6   :  { %v5644_v46 = vadd.f32 1e-05, %v5638_v39  ;;  %9071 = vmatmul.mubr.msk.bf16.vlgmr.msra.gmra.mxu0 %vm156_vm3, %v5850_v61 }
0x1da7   :  { %6022 = vmatpush1.bf16.msra.mxu0 %v10601_v8  ;;  %6045 = vmatprep.mubr.bf16.mxu0 %v10890_v23  ;;  %v10610_v23 = vld [vmem:[%s13222_s26 + $0x1c0] ss:$8 sps:$4 sm:$0xff]  }
0x1da8   :  { %10793 = vrsqrt.f32 %v5644_v46  ;;  %6023 = vmatprep.subr.bf16.mxu0 %v10606_v31 }
0x1dab   :  { %6024 = vmatpush1.bf16.msra.mxu0 %v10604_v41 }
0x1dac   :  { %6025 = vmatprep.subr.bf16.mxu0 %v10609_v57 }
0x1daf   :  { %6026 = vmatpush1.bf16.msra.mxu0 %v10607_v32 }
0x1db0   :  { %6027 = vmatprep.subr.bf16.mxu0 %v10612_v44 }
0x1db3   :  { %6028 = vmatpush1.bf16.msra.mxu0 %v10610_v23 }
0x1db4   :  { %10105 = vmatprep.subr.bf16.mxu0 %v10888_v0 }
0x1db5   :  { %v10794_v53 = vpop.eup %10793 }
0x1db6   :  { %v5650_v19 = vmul.f32 %v10794_v53, %v5641_v58 }
0x1db8   :  { %v5671_v18 = vmul.f32 %v8938_v50, %v5650_v19 }
0x1dba   :  { %v12519_v27 = vadd.f32 %v8941_v62, %v5671_v18 }
0x1dbc   :  { %v5851_v6 = vpack.c.bf16 %v12519_v27, %v12519_v27 }
0x1dbe   :  { %9080 = vmatmul.mubr.msk.bf16.vlgmr.msra.gmra.mxu0 %vm156_vm3, %v5851_v6 }
0x1dbf   :  { %10107 = vmatprep.mubr.msk.bf16.mxu0 %vm10889_vm0, %v10888_v0 }
0x1dd4   :  { %v5615_v43 = vpop.xlane.xlu0 %5614 }
0x1dd5   :  { %v5618_v54 = vmul.f32 0.015625, %v5615_v43 }
0x1dd6   :  { %v5630_v17 = vpop.xlane.xlu1 %5629 }
0x1dd7   :  { %v5636_v60 = vmul.f32 %v5618_v54, %v5618_v54  ;;  %v5633_v14 = vmul.f32 0.015625, %v5630_v17  ;;  %v5642_v40 = vsub.f32 %v12445_v1, %v5618_v54  ;;  %v12543_v1 = vld [vmem:[%s13187_s6 + $0xc] sm:$0x3]  ;;  %s13226_s6 = smov 80  }
0x1dd8   :  { %v5859_v3 = vrot.slane %v12543_v1, %v11151_v47 }
0x1dd9   :  { %v5639_v63 = vsub.f32 %v5633_v14, %v5636_v60 }
0x1ddb   :  { %v5645_v37 = vadd.f32 1e-05, %v5639_v63 }
0x1ddd   :  { %10795 = vrsqrt.f32 %v5645_v37 }
0x1dea   :  { %v10796_v21 = vpop.eup %10795 }
0x1deb   :  { %v5651_v33 = vmul.f32 %v10796_v21, %v5642_v40 }
0x1ded   :  { %v5672_v34 = vmul.f32 %v8939_v30, %v5651_v33 }
0x1def   :  { %v12533_v55 = vadd.f32 %v8942_v2, %v5672_v34 }
0x1df1   :  { %v5852_v9 = vpack.c.bf16 %v12533_v55, %v12533_v55 }
0x1df3   :  { %9089 = vmatmul.mubr.msk.bf16.vlgmr.msra.gmra.mxu1 %vm156_vm3, %v5852_v9 }
0x1df4   :  { %10119 = vmatprep.mubr.msk.bf16.mxu1 %vm10889_vm0, %v10888_v0 }
0x1e66   :  { %v5963_v4 = vpop.f32.mrf.mxu0 }
0x1e67   :  { %v5964_v7 = vadd.f32 %v5963_v4, %v5859_v3 }
0x1e68   :  { %v12547_v10 = vpop.f32.mrf.mxu0 }
0x1e69   :  { %v12549_v12 = vpack.c.bf16 %v5964_v7, %v5964_v7 }
0x1e6a   :  { %v5967_v29 = vpop.f32.mrf.mxu0 }
0x1e6b   :  { %6142 = vrot.lane.b32.xlu0 %v12549_v12, %s10891_s1 }
0x1e6c   :  { %v5968_v42 = vpop.f32.mrf.mxu0 }
0x1e7e   :  { %v6047_v52 = vpop.f32.mrf.mxu0 }
0x1e7f   :  { %v6048_v15 = vadd.f32 %v6047_v52, %v5867_v45 }
0x1e80   :  { %v6049_v5 = vpop.f32.mrf.mxu0 }
0x1e81   :  { %v12558_v20 = vpack.c.bf16 %v6048_v15, %v6048_v15  ;;  %v12560_v59 = vadd.f32 %v6049_v5, %v5871_v48 }
0x1e82   :  { %v6051_v22 = vpop.f32.mrf.mxu0 }
0x1e83   :  { %6191 = vrot.lane.b32.xlu1 %v12558_v20, %s10891_s1 }
0x1e84   :  { %v6052_v38 = vpop.f32.mrf.mxu0 }
0x1eb3   :  { %v6131_v26 = vpop.f32.mrf.mxu1 }
0x1eb4   :  { %v6132_v28 = vadd.f32 %v6131_v26, %v5875_v24 }
0x1eb5   :  { %v6133_v11 = vpop.f32.mrf.mxu1 }
0x1eb6   :  { %v12569_v35 = vpack.c.bf16 %v6132_v28, %v6132_v28  ;;  %v12571_v36 = vadd.f32 %v6133_v11, %v5879_v25 }
0x1eb7   :  { %v6135_v8 = vpop.f32.mrf.mxu1 }
0x1eb8   :  { %6240 = vrot.lane.b32.xlu1 %v12569_v35, %s10891_s1 }
0x1eb9   :  { %v6136_v39 = vpop.f32.mrf.mxu1 }
0x1edd   :  { %v6143_v61 = vpop.permute.xlu0 %6142 }
0x1ede   :  { %v6148_v31 = vsel %vm672_vm4, %v6143_v61, 0 }
0x1edf   :  { %10106 = vmatpush3.bf16.xpose.msra.mxu0 %v6148_v31 }
0x1ee0   :  { %10111 = vmatprep.subr.bf16.mxu0 %v10888_v0 }
0x1ee6   :  { %10108 = vmatmul.mubr.msk.bf16.vlgmr.msra.gmra.mxu0 %vm672_vm4, %v12549_v12 }
0x1ee7   :  { %10113 = vmatprep.mubr.msk.bf16.mxu0 %vm10889_vm0, %v10888_v0 }
0x1ef5   :  { %v6192_v47 = vpop.permute.xlu1 %6191 }
0x1ef6   :  { %v6197_v46 = vsel %vm672_vm4, %v6192_v47, 0 }
0x1ef7   :  { %10112 = vmatpush3.bf16.xpose.msra.mxu0 %v6197_v46 }
0x1ef8   :  { %10123 = vmatprep.subr.bf16.mxu0 %v10888_v0 }
0x1efe   :  { %10114 = vmatmul.mubr.msk.bf16.vlgmr.msra.gmra.mxu0 %vm672_vm4, %v12558_v20 }
0x1eff   :  { %10125 = vmatprep.mubr.msk.bf16.mxu0 %vm10889_vm0, %v10888_v0 }
0x1f2a   :  { %v6241_v41 = vpop.permute.xlu1 %6240 }
0x1f2b   :  { %v6246_v57 = vsel %vm672_vm4, %v6241_v41, 0 }
0x1f2c   :  { %10118 = vmatpush3.bf16.xpose.msra.mxu1 %v6246_v57 }
0x1f2d   :  { %10129 = vmatprep.subr.bf16.mxu1 %v10888_v0 }
0x1f33   :  { %10120 = vmatmul.mubr.msk.bf16.vlgmr.msra.gmra.mxu1 %vm672_vm4, %v12569_v35 }
0x1f34   :  { %10131 = vmatprep.mubr.msk.bf16.mxu1 %vm10889_vm0, %v10888_v0 }
0x1fa6   :  { %v6184_v32 = vpop.f32.mrf.mxu0 }
0x1fa7   :  { %v6288_v44 = vmul.f32 0.25, %v6184_v32 }
0x1fa8   :  { %v10109_v23 = vpop.f32.mrf.mxu0 }
0x1fa9   :  { %v6291_v58 = vsel %vm820_vm5, %v6288_v44, -inf }
0x1faa   :  { %6292 = vmax.xlane.f32.xlu1 %v6291_v58  ;;  %v6187_v53 = vpop.f32.mrf.mxu0 }
0x1fac   :  { %v10110_v50 = vpop.f32.mrf.mxu0 }
0x1fbe   :  { %v6233_v19 = vpop.f32.mrf.mxu0 }
0x1fbf   :  { %v6289_v62 = vmul.f32 0.25, %v6233_v19 }
0x1fc0   :  { %v10115_v18 = vpop.f32.mrf.mxu0 }
0x1fc1   :  { %v6294_v6 = vsel %vm820_vm5, %v6289_v62, -inf }
0x1fc2   :  { %6295 = vmax.xlane.f32.xlu0 %v6294_v6  ;;  %v6236_v43 = vpop.f32.mrf.mxu0 }
0x1fc4   :  { %v10116_v54 = vpop.f32.mrf.mxu0 }
0x1ff3   :  { %v6282_v17 = vpop.f32.mrf.mxu1 }
0x1ff4   :  { %v6290_v60 = vmul.f32 0.25, %v6282_v17 }
0x1ff5   :  { %v10121_v14 = vpop.f32.mrf.mxu1 }
0x1ff6   :  { %v6297_v63 = vsel %vm820_vm5, %v6290_v60, -inf }
0x1ff7   :  { %v6285_v37 = vpop.f32.mrf.mxu1  ;;  %6298 = vmax.xlane.f32.xlu0 %v6297_v63 }
0x1ff9   :  { %v10122_v40 = vpop.f32.mrf.mxu1 }
0x2033   :  { %v6293_v21 = vpop.xlane.xlu1 %6292 }
0x2034   :  { %v6300_v30 = vsub.f32 %v6288_v44, %v6293_v21 }
0x2036   :  { %v6303_v33 = vmul.f32 1.442695, %v6300_v30 }
0x2038   :  { %10797 = vpow2.f32 %v6303_v33 }
0x2045   :  { %v10798_v2 = vpop.eup %10797 }
0x2046   :  { %v6309_v34 = vsel %vm820_vm5, %v10798_v2, 0.0 }
0x2047   :  { %6310 = vadd.xlane.f32.xlu1 %v6309_v34 }
0x204b   :  { %v6296_v9 = vpop.xlane.xlu0 %6295 }
0x204c   :  { %v6301_v3 = vsub.f32 %v6289_v62, %v6296_v9 }
0x204e   :  { %v6305_v4 = vmul.f32 1.442695, %v6301_v3 }
0x2050   :  { %10799 = vpow2.f32 %v6305_v4 }
0x2058   :  { %6473 = vrot.lane.b32.xlu1 %v12549_v12, %s10886_s27 }
0x205c   :  { %6573 = vrot.lane.b32.xlu1 %v12569_v35, %s10886_s27 }
0x205d   :  { %v10800_v7 = vpop.eup %10799 }
0x205e   :  { %v6312_v29 = vsel %vm820_vm5, %v10800_v7, 0.0 }
0x205f   :  { %6313 = vadd.xlane.f32.xlu0 %v6312_v29 }
0x2060   :  { %6327 = vrot.lane.b32.xlu1 %v12549_v12, %s10892_s29 }
0x2075   :  { %6375 = vrot.lane.b32.xlu0 %v12558_v20, %s10892_s29 }
0x2079   :  { %6471 = vrot.lane.b32.xlu0 %v12549_v12, %s13226_s6 }
0x207d   :  { %6571 = vrot.lane.b32.xlu0 %v12569_v35, %s13226_s6 }
0x2080   :  { %v6299_v42 = vpop.xlane.xlu0 %6298 }
0x2081   :  { %v6302_v16 = vsub.f32 %v6290_v60, %v6299_v42  ;;  %6423 = vrot.lane.b32.xlu0 %v12569_v35, %s10892_s29 }
0x2083   :  { %v6307_v45 = vmul.f32 1.442695, %v6302_v16 }
0x2085   :  { %10801 = vpow2.f32 %v6307_v45  ;;  %6521 = vrot.lane.b32.xlu0 %v12558_v20, %s13226_s6 }
0x2092   :  { %v10802_v48 = vpop.eup %10801 }
0x2093   :  { %v6315_v52 = vsel %vm820_vm5, %v10802_v48, 0.0 }
0x2094   :  { %6316 = vadd.xlane.f32.xlu1 %v6315_v52 }
0x20a5   :  { %6523 = vrot.lane.b32.xlu1 %v12558_v20, %s10886_s27  ;;  %s13227_s27 = smov 48  }
0x20d0   :  { %v6311_v15 = vpop.xlane.xlu1 %6310 }
0x20d1   :  { %10803 = vrcp.f32 %v6311_v15 }
0x20d4   :  { %v6474_v5 = vpop.permute.xlu1 %6473 }
0x20d5   :  { %v6479_v32 = vsel %vm672_vm4, %v6474_v5, 0 }
0x20d8   :  { %v6574_v22 = vpop.permute.xlu1 %6573 }
0x20d9   :  { %v6579_v44 = vsel %vm672_vm4, %v6574_v22, 0 }
0x20dc   :  { %v6328_v38 = vpop.permute.xlu1 %6327 }
0x20dd   :  { %v6333_v56 = vsel %vm862_vm6, %v6328_v38, 0 }
0x20de   :  { %v10804_v24 = vpop.eup %10803  ;;  %10124 = vmatpush3.bf16.msra.mxu0 %v6333_v56 }
0x20df   :  { %v6321_v25 = vmul.f32 %v10804_v24, %v10798_v2  ;;  %10135 = vmatprep.subr.bf16.mxu0 %v10888_v0 }
0x20e1   :  { %v6324_v26 = vpack.c.bf16 %v6321_v25, %v6321_v25 }
0x20e3   :  { %10126 = vmatmul.mubr.msk.bf16.vlgmr.msra.gmra.mxu0 %vm820_vm5, %v6324_v26 }
0x20e4   :  { %10137 = vmatprep.mubr.msk.bf16.mxu0 %vm10889_vm0, %v10888_v0 }
0x20e8   :  { %v6314_v28 = vpop.xlane.xlu0 %6313 }
0x20e9   :  { %10805 = vrcp.f32 %v6314_v28 }
0x20ec   :  { %v6376_v11 = vpop.permute.xlu0 %6375 }
0x20ed   :  { %v6381_v8 = vsel %vm862_vm6, %v6376_v11, 0 }
0x20ee   :  { %10130 = vmatpush3.bf16.msra.mxu1 %v6381_v8 }
0x20ef   :  { %10141 = vmatprep.subr.bf16.mxu1 %v10888_v0 }
0x20f0   :  { %v6472_v39 = vpop.permute.xlu0 %6471 }
0x20f4   :  { %v6572_v61 = vpop.permute.xlu0 %6571 }
0x20f6   :  { %v10806_v31 = vpop.eup %10805 }
0x20f7   :  { %v6322_v47 = vmul.f32 %v10806_v31, %v10800_v7 }
0x20f8   :  { %v6424_v46 = vpop.permute.xlu0 %6423 }
0x20f9   :  { %v6325_v41 = vpack.c.bf16 %v6322_v47, %v6322_v47  ;;  %v6429_v57 = vsel %vm862_vm6, %v6424_v46, 0 }
0x20fa   :  { %10136 = vmatpush3.bf16.msra.mxu0 %v6429_v57 }
0x20fb   :  { %10132 = vmatmul.mubr.msk.bf16.vlgmr.msra.gmra.mxu1 %vm820_vm5, %v6325_v41  ;;  %10147 = vmatprep.subr.bf16.mxu0 %v10888_v0 }
0x20fc   :  { %10142 = vmatpush3.bf16.xpose.msra.mxu1 %v6479_v32  ;;  %10143 = vmatprep.mubr.msk.bf16.mxu1 %vm10889_vm0, %v10888_v0  ;;  %v6522_v18 = vpop.permute.xlu0 %6521 }
0x20fd   :  { %10153 = vmatprep.subr.bf16.mxu1 %v10888_v0 }
0x2103   :  { %10144 = vmatmul.mubr.msk.bf16.vlgmr.msra.gmra.mxu1 %vm672_vm4, %v6472_v39 }
0x2104   :  { %10154 = vmatpush3.bf16.xpose.msra.mxu1 %v6579_v44  ;;  %10155 = vmatprep.mubr.msk.bf16.mxu1 %vm10889_vm0, %v10888_v0 }
0x2105   :  { %10165 = vmatprep.subr.bf16.mxu1 %v10888_v0 }
0x210b   :  { %10156 = vmatmul.mubr.msk.bf16.vlgmr.msra.gmra.mxu1 %vm672_vm4, %v6572_v61 }
0x210c   :  { %10167 = vmatprep.mubr.msk.bf16.mxu1 %vm10889_vm0, %v10888_v0 }
0x211d   :  { %v6317_v23 = vpop.xlane.xlu1 %6316 }
0x211e   :  { %10807 = vrcp.f32 %v6317_v23 }
0x2121   :  { %v6524_v50 = vpop.permute.xlu1 %6523 }
0x2122   :  { %v6529_v62 = vsel %vm672_vm4, %v6524_v50, 0 }
0x212b   :  { %v10808_v58 = vpop.eup %10807 }
0x212c   :  { %v6323_v53 = vmul.f32 %v10808_v58, %v10802_v48 }
0x212e   :  { %v6326_v19 = vpack.c.bf16 %v6323_v53, %v6323_v53 }
0x2130   :  { %10138 = vmatmul.mubr.msk.bf16.vlgmr.msra.gmra.mxu0 %vm820_vm5, %v6326_v19 }
0x2131   :  { %10148 = vmatpush3.bf16.xpose.msra.mxu0 %v6529_v62  ;;  %10149 = vmatprep.mubr.msk.bf16.mxu0 %vm10889_vm0, %v10888_v0 }
0x2132   :  { %10159 = vmatprep.subr.bf16.mxu0 %v10888_v0 }
0x2138   :  { %10150 = vmatmul.mubr.msk.bf16.vlgmr.msra.gmra.mxu0 %vm672_vm4, %v6522_v18 }
0x2139   :  { %10161 = vmatprep.mubr.msk.bf16.mxu0 %vm10889_vm0, %v10888_v0 }
0x21a3   :  { %v12647_v6 = vpop.f32.mrf.mxu0 }
0x21a5   :  { %v10127_v43 = vpop.f32.mrf.mxu0 }
0x21a7   :  { %v6372_v54 = vpop.f32.mrf.mxu0 }
0x21a9   :  { %v10128_v17 = vpop.f32.mrf.mxu0 }
0x21bb   :  { %v12649_v60 = vpop.f32.mrf.mxu1 }
0x21bd   :  { %v10133_v14 = vpop.f32.mrf.mxu1 }
0x21bf   :  { %v6420_v63 = vpop.f32.mrf.mxu1 }
0x21c1   :  { %v10134_v37 = vpop.f32.mrf.mxu1 }
0x21c2   :  { %v5863_v37 = vrot.slane %v12543_v1, %v11156_v49 }
0x21c3   :  { %v6515_v40 = vpop.f32.mrf.mxu1 }
0x21c4   :  { %v6621_v21 = vmul.f32 0.25, %v6515_v40 }
0x21c5   :  { %v10145_v30 = vpop.f32.mrf.mxu1 }
0x21c6   :  { %v6624_v33 = vsel %vm820_vm5, %v6621_v21, -inf  ;;  %v5966_v30 = vadd.f32 %v12547_v10, %v5863_v37 }
0x21c7   :  { %6625 = vmax.xlane.f32.xlu1 %v6624_v33  ;;  %v6518_v2 = vpop.f32.mrf.mxu1 }
0x21c8   :  { %v12694_v2 = vpack.c.bf16 %v5966_v30, %v5966_v30 }
0x21c9   :  { %v10146_v34 = vpop.f32.mrf.mxu1 }
0x21ca   :  { %v7000_v49 = vsel %vm862_vm6, %v12694_v2, 0 }
0x21cb   :  { %v6615_v9 = vpop.f32.mrf.mxu1 }
0x21cc   :  { %v6623_v3 = vmul.f32 0.25, %v6615_v9 }
0x21cd   :  { %v10157_v4 = vpop.f32.mrf.mxu1 }
0x21ce   :  { %v6630_v7 = vsel %vm820_vm5, %v6623_v3, -inf }
0x21cf   :  { %6631 = vmax.xlane.f32.xlu0 %v6630_v7  ;;  %v6618_v29 = vpop.f32.mrf.mxu1 }
0x21d1   :  { %v10158_v42 = vpop.f32.mrf.mxu1 }
0x21f0   :  { %v12653_v16 = vpop.f32.mrf.mxu0 }
0x21f2   :  { %v10139_v45 = vpop.f32.mrf.mxu0 }
0x21f3   :  { %v12714_v45 = vpack.c.bf16 %v12560_v59, %v12560_v59 }
0x21f4   :  { %v6468_v48 = vpop.f32.mrf.mxu0 }
0x21f6   :  { %v10140_v52 = vpop.f32.mrf.mxu0 }
0x21f7   :  { %v7046_v52 = vsel %vm862_vm6, %v12714_v45, 0 }
0x21f8   :  { %v6565_v15 = vpop.f32.mrf.mxu0 }
0x21f9   :  { %v6622_v5 = vmul.f32 0.25, %v6565_v15 }
0x21fa   :  { %v10151_v22 = vpop.f32.mrf.mxu0 }
0x21fb   :  { %v6627_v38 = vsel %vm820_vm5, %v6622_v5, -inf }
0x21fc   :  { %6628 = vmax.xlane.f32.xlu0 %v6627_v38  ;;  %v6568_v56 = vpop.f32.mrf.mxu0 }
0x21fe   :  { %v10152_v24 = vpop.f32.mrf.mxu0 }
0x2250   :  { %v6626_v25 = vpop.xlane.xlu1 %6625 }
0x2251   :  { %v6633_v26 = vsub.f32 %v6621_v21, %v6626_v25 }
0x2253   :  { %v6636_v28 = vmul.f32 1.442695, %v6633_v26 }
0x2255   :  { %10809 = vpow2.f32 %v6636_v28 }
0x2258   :  { %v6632_v11 = vpop.xlane.xlu0 %6631 }
0x2259   :  { %v6635_v8 = vsub.f32 %v6623_v3, %v6632_v11 }
0x225b   :  { %v6640_v39 = vmul.f32 1.442695, %v6635_v8 }
0x225d   :  { %10811 = vpow2.f32 %v6640_v39 }
0x2262   :  { %v10810_v61 = vpop.eup %10809 }
0x2263   :  { %v6642_v31 = vsel %vm820_vm5, %v10810_v61, 0.0 }
0x2264   :  { %6643 = vadd.xlane.f32.xlu1 %v6642_v31 }
0x226a   :  { %v10812_v47 = vpop.eup %10811 }
0x226b   :  { %v6648_v46 = vsel %vm820_vm5, %v10812_v47, 0.0 }
0x226c   :  { %6649 = vadd.xlane.f32.xlu0 %v6648_v46 }
0x2275   :  { %6660 = vrot.lane.b32.xlu1 %v12549_v12, %s13227_s27 }
0x2279   :  { %6856 = vrot.lane.b32.xlu1 %v12558_v20, %s13224_s3 }
0x227d   :  { %6854 = vrot.lane.b32.xlu1 %v12558_v20, %s13225_s28 }
0x2281   :  { %6708 = vrot.lane.b32.xlu1 %v12558_v20, %s13227_s27 }
0x2282   :  { %6756 = vrot.lane.b32.xlu0 %v12569_v35, %s13227_s27 }
0x2285   :  { %6804 = vrot.lane.b32.xlu1 %v12549_v12, %s13225_s28  ;;  %v6629_v41 = vpop.xlane.xlu0 %6628 }
0x2286   :  { %v6634_v57 = vsub.f32 %v6622_v5, %v6629_v41 }
0x2288   :  { %v6638_v32 = vmul.f32 1.442695, %v6634_v57 }
0x2289   :  { %6904 = vrot.lane.b32.xlu1 %v12569_v35, %s13225_s28 }
0x228a   :  { %10813 = vpow2.f32 %v6638_v32 }
0x2297   :  { %v10814_v44 = vpop.eup %10813 }
0x2298   :  { %v6645_v23 = vsel %vm820_vm5, %v10814_v44, 0.0 }
0x22a1   :  { %6646 = vadd.xlane.f32.xlu0 %v6645_v23 }
0x22b7   :  { %6806 = vrot.lane.b32.xlu0 %v12549_v12, %s13224_s3 }
0x22bb   :  { %6906 = vrot.lane.b32.xlu0 %v12569_v35, %s13224_s3 }
0x22ed   :  { %v6644_v20 = vpop.xlane.xlu1 %6643 }
0x22ee   :  { %10815 = vrcp.f32 %v6644_v20 }
0x22f1   :  { %v6661_v58 = vpop.permute.xlu1 %6660 }
0x22f2   :  { %v6666_v53 = vsel %vm862_vm6, %v6661_v58, 0 }
0x22f3   :  { %10160 = vmatpush3.bf16.msra.mxu0 %v6666_v53 }
0x22f4   :  { %10171 = vmatprep.subr.bf16.mxu0 %v10888_v0 }
0x22f5   :  { %v6857_v50 = vpop.permute.xlu1 %6856  ;;  %v6650_v19 = vpop.xlane.xlu0 %6649 }
0x22f6   :  { %10817 = vrcp.f32 %v6650_v19  ;;  %v6862_v33 = vsel %vm672_vm4, %v6857_v50, 0 }
0x22f9   :  { %v6855_v62 = vpop.permute.xlu1 %6854  ;;  %v6757_v54 = vpop.permute.xlu0 %6756 }
0x22fa   :  { %v6762_v35 = vsel %vm862_vm6, %v6757_v54, 0 }
0x22fb   :  { %v10816_v18 = vpop.eup %10815 }
0x22fc   :  { %v6654_v43 = vmul.f32 %v10816_v18, %v10810_v61 }
0x22fd   :  { %v6709_v17 = vpop.permute.xlu1 %6708 }
0x22fe   :  { %v6657_v12 = vpack.c.bf16 %v6654_v43, %v6654_v43  ;;  %v6714_v14 = vsel %vm862_vm6, %v6709_v17, 0 }
0x22ff   :  { %10166 = vmatpush3.bf16.msra.mxu1 %v6714_v14 }
0x2300   :  { %10162 = vmatmul.mubr.msk.bf16.vlgmr.msra.gmra.mxu0 %vm820_vm5, %v6657_v12  ;;  %10177 = vmatprep.subr.bf16.mxu1 %v10888_v0 }
0x2301   :  { %10172 = vmatpush3.bf16.msra.mxu0 %v6762_v35  ;;  %10173 = vmatprep.mubr.msk.bf16.mxu0 %vm10889_vm0, %v10888_v0  ;;  %v6805_v29 = vpop.permute.xlu1 %6804 }
0x2302   :  { %10183 = vmatprep.subr.bf16.mxu0 %v10888_v0 }
0x2303   :  { %v10818_v63 = vpop.eup %10817 }
0x2304   :  { %v6656_v40 = vmul.f32 %v10818_v63, %v10812_v47 }
0x2305   :  { %v6905_v48 = vpop.permute.xlu1 %6904 }
0x2306   :  { %v6659_v21 = vpack.c.bf16 %v6656_v40, %v6656_v40 }
0x2308   :  { %10174 = vmatmul.mubr.msk.bf16.vlgmr.msra.gmra.mxu0 %vm820_vm5, %v6659_v21 }
0x2309   :  { %10184 = vmatpush3.bf16.xpose.msra.mxu0 %v6862_v33  ;;  %10185 = vmatprep.mubr.msk.bf16.mxu0 %vm10889_vm0, %v10888_v0 }
0x230a   :  { %10195 = vmatprep.subr.bf16.mxu0 %v10888_v0 }
0x2310   :  { %10186 = vmatmul.mubr.msk.bf16.vlgmr.msra.gmra.mxu0 %vm672_vm4, %v6855_v62 }
0x2311   :  { %10196 = vmatpush3.bf16.msra.mxu0 %v7000_v49  ;;  %10197 = vmatprep.mubr.msk.bf16.mxu0 %vm10889_vm0, %v10888_v0 }
0x2312   :  { %10207 = vmatprep.subr.bf16.mxu0 %v10888_v0 }
0x232a   :  { %v6647_v1 = vpop.xlane.xlu0 %6646 }
0x232b   :  { %10819 = vrcp.f32 %v6647_v1 }
0x232e   :  { %v6807_v9 = vpop.permute.xlu0 %6806 }
0x232f   :  { %v6812_v4 = vsel %vm672_vm4, %v6807_v9, 0 }
0x2332   :  { %v6907_v7 = vpop.permute.xlu0 %6906 }
0x2333   :  { %v6912_v42 = vsel %vm672_vm4, %v6907_v7, 0 }
0x2338   :  { %v10820_v10 = vpop.eup %10819 }
0x2339   :  { %v6655_v34 = vmul.f32 %v10820_v10, %v10814_v44 }
0x233b   :  { %v6658_v3 = vpack.c.bf16 %v6655_v34, %v6655_v34 }
0x233d   :  { %10168 = vmatmul.mubr.msk.bf16.vlgmr.msra.gmra.mxu1 %vm820_vm5, %v6658_v3  ;;  %v12742_v3 = vpack.c.bf16 %v12571_v36, %v12571_v36 }
0x233e   :  { %10178 = vmatpush3.bf16.xpose.msra.mxu1 %v6812_v4  ;;  %10179 = vmatprep.mubr.msk.bf16.mxu1 %vm10889_vm0, %v10888_v0 }
0x233f   :  { %10189 = vmatprep.subr.bf16.mxu1 %v10888_v0 }
0x2345   :  { %10180 = vmatmul.mubr.msk.bf16.vlgmr.msra.gmra.mxu1 %vm672_vm4, %v6805_v29 }
0x2346   :  { %10190 = vmatpush3.bf16.xpose.msra.mxu1 %v6912_v42  ;;  %10191 = vmatprep.mubr.msk.bf16.mxu1 %vm10889_vm0, %v10888_v0 }
0x2347   :  { %10201 = vmatprep.subr.bf16.mxu1 %v10888_v0 }
0x234d   :  { %10192 = vmatmul.mubr.msk.bf16.vlgmr.msra.gmra.mxu1 %vm672_vm4, %v6905_v48 }
0x234e   :  { %10202 = vmatpush3.bf16.msra.mxu1 %v7046_v52  ;;  %10203 = vmatprep.mubr.msk.bf16.mxu1 %vm10889_vm0, %v10888_v0 }
0x234f   :  { %10213 = vmatprep.subr.bf16.mxu1 %v10888_v0 }
0x23c0   :  { %v12722_v15 = vpop.f32.mrf.mxu0 }
0x23c2   :  { %v10163_v5 = vpop.f32.mrf.mxu0 }
0x23c4   :  { %v6705_v22 = vpop.f32.mrf.mxu0 }
0x23c6   :  { %v10164_v38 = vpop.f32.mrf.mxu0 }
0x23c8   :  { %v12724_v56 = vpop.f32.mrf.mxu0 }
0x23ca   :  { %v10175_v59 = vpop.f32.mrf.mxu0 }
0x23cc   :  { %v6801_v24 = vpop.f32.mrf.mxu0 }
0x23ce   :  { %v10176_v25 = vpop.f32.mrf.mxu0 }
0x23d0   :  { %v6898_v26 = vpop.f32.mrf.mxu0 }
0x23d1   :  { %v6955_v28 = vmul.f32 0.25, %v6898_v26 }
0x23d2   :  { %v10187_v11 = vpop.f32.mrf.mxu0 }
0x23d3   :  { %v6960_v8 = vsel %vm820_vm5, %v6955_v28, -inf  ;;  %v7092_v11 = vsel %vm862_vm6, %v12742_v3, 0 }
0x23d4   :  { %6961 = vmax.xlane.f32.xlu0 %v6960_v8  ;;  %v6901_v39 = vpop.f32.mrf.mxu0 }
0x23d6   :  { %v10188_v61 = vpop.f32.mrf.mxu0 }
0x23fd   :  { %v12727_v31 = vpop.f32.mrf.mxu1 }
0x23fe   :  { %v10407_v47 = vpack.i.bf16 %v12724_v56, %v12727_v31 }
0x23ff   :  { %v10169_v46 = vpop.f32.mrf.mxu1 }
0x2401   :  { %v6753_v41 = vpop.f32.mrf.mxu1 }
0x2403   :  { %v10170_v57 = vpop.f32.mrf.mxu1 }
0x2405   :  { %v6848_v32 = vpop.f32.mrf.mxu1 }
0x2406   :  { %v6954_v44 = vmul.f32 0.25, %v6848_v32 }
0x2407   :  { %v10181_v23 = vpop.f32.mrf.mxu1 }
0x2408   :  { %v6957_v20 = vsel %vm820_vm5, %v6954_v44, -inf }
0x2409   :  { %6958 = vmax.xlane.f32.xlu1 %v6957_v20  ;;  %v6851_v58 = vpop.f32.mrf.mxu1 }
0x240b   :  { %v10182_v53 = vpop.f32.mrf.mxu1 }
0x240d   :  { %v6948_v50 = vpop.f32.mrf.mxu1 }
0x240e   :  { %v6956_v19 = vmul.f32 0.25, %v6948_v50 }
0x240f   :  { %v10193_v62 = vpop.f32.mrf.mxu1 }
0x2410   :  { %v6963_v18 = vsel %vm820_vm5, %v6956_v19, -inf }
0x2411   :  { %v6951_v43 = vpop.f32.mrf.mxu1  ;;  %6964 = vmax.xlane.f32.xlu0 %v6963_v18 }
0x2413   :  { %v10194_v54 = vpop.f32.mrf.mxu1 }
0x241a   :  { %7137 = vrot.lane.b32.xlu1 %v12694_v2, %s10892_s29 }
0x245d   :  { %v6962_v17 = vpop.xlane.xlu0 %6961 }
0x245e   :  { %v6967_v12 = vsub.f32 %v6955_v28, %v6962_v17 }
0x2460   :  { %v6971_v14 = vmul.f32 1.442695, %v6967_v12 }
0x2462   :  { %10821 = vpow2.f32 %v6971_v14 }
0x246f   :  { %v10822_v35 = vpop.eup %10821 }
0x2470   :  { %v6978_v63 = vsel %vm820_vm5, %v10822_v35, 0.0 }
0x2471   :  { %6979 = vadd.xlane.f32.xlu0 %v6978_v63 }
0x2492   :  { %v6959_v37 = vpop.xlane.xlu1 %6958 }
0x2493   :  { %v6966_v40 = vsub.f32 %v6954_v44, %v6959_v37 }
0x2495   :  { %v6969_v21 = vmul.f32 1.442695, %v6966_v40 }
0x2496   :  { %v7138_v42 = vpop.permute.xlu1 %7137 }
0x2497   :  { %10823 = vpow2.f32 %v6969_v21  ;;  %v7143_v36 = vsel %vm672_vm4, %v7138_v42, 0 }
0x249a   :  { %v6965_v30 = vpop.xlane.xlu0 %6964 }
0x249b   :  { %v6968_v33 = vsub.f32 %v6956_v19, %v6965_v30 }
0x249d   :  { %v6973_v49 = vmul.f32 1.442695, %v6968_v33 }
0x249f   :  { %10825 = vpow2.f32 %v6973_v49 }
0x24a4   :  { %v10824_v1 = vpop.eup %10823 }
0x24a5   :  { %v6975_v10 = vsel %vm820_vm5, %v10824_v1, 0.0 }
0x24a6   :  { %6976 = vadd.xlane.f32.xlu1 %v6975_v10 }
0x24ac   :  { %v10826_v34 = vpop.eup %10825 }
0x24ad   :  { %v6981_v9 = vsel %vm820_vm5, %v10826_v34, 0.0 }
0x24ae   :  { %6982 = vadd.xlane.f32.xlu0 %v6981_v9 }
0x24b7   :  { %7188 = vrot.lane.b32.xlu1 %v12714_v45, %s10892_s29 }
0x24bb   :  { %7239 = vrot.lane.b32.xlu1 %v12742_v3, %s10892_s29 }
0x24bf   :  { %7237 = vrot.lane.b32.xlu1 %v12742_v3, %s10891_s1 }
0x24c4   :  { %7135 = vrot.lane.b32.xlu0 %v12694_v2, %s10891_s1 }
0x24c8   :  { %7186 = vrot.lane.b32.xlu0 %v12714_v45, %s10891_s1 }
0x24fa   :  { %v6980_v4 = vpop.xlane.xlu0 %6979 }
0x24fb   :  { %10827 = vrcp.f32 %v6980_v4 }
0x2508   :  { %v10828_v7 = vpop.eup %10827 }
0x2509   :  { %v6988_v29 = vmul.f32 %v10828_v7, %v10822_v35 }
0x250b   :  { %v6991_v48 = vpack.c.bf16 %v6988_v29, %v6988_v29 }
0x250d   :  { %10204 = vmatmul.mubr.msk.bf16.vlgmr.msra.gmra.mxu1 %vm820_vm5, %v6991_v48 }
0x250e   :  { %10214 = vmatpush3.bf16.xpose.msra.mxu1 %v7143_v36  ;;  %10215 = vmatprep.mubr.msk.bf16.mxu1 %vm10889_vm0, %v10888_v0 }
0x250f   :  { %10225 = vmatprep.subr.bf16.mxu1 %v10888_v0 }
0x252f   :  { %v6977_v52 = vpop.xlane.xlu1 %6976 }
0x2530   :  { %10829 = vrcp.f32 %v6977_v52 }
0x2533   :  { %v7189_v5 = vpop.permute.xlu1 %7188 }
0x2534   :  { %v7194_v41 = vsel %vm672_vm4, %v7189_v5, 0 }
0x2537   :  { %v6983_v22 = vpop.xlane.xlu0 %6982  ;;  %v7240_v38 = vpop.permute.xlu1 %7239 }
0x2538   :  { %10831 = vrcp.f32 %v6983_v22  ;;  %v7245_v24 = vsel %vm672_vm4, %v7240_v38, 0 }
0x253b   :  { %v7136_v59 = vpop.permute.xlu0 %7135  ;;  %v7238_v8 = vpop.permute.xlu1 %7237 }
0x253c   :  { %10216 = vmatmul.mubr.msk.bf16.vlgmr.msra.gmra.mxu1 %vm672_vm4, %v7136_v59 }
0x253d   :  { %v10830_v25 = vpop.eup %10829  ;;  %10226 = vmatpush3.bf16.xpose.msra.mxu1 %v7245_v24  ;;  %10227 = vmatprep.mubr.msk.bf16.mxu1 %vm10889_vm0, %v10888_v0 }
0x253e   :  { %v6987_v26 = vmul.f32 %v10830_v25, %v10824_v1  ;;  %10237 = vmatprep.subr.bf16.mxu1 %v10888_v0 }
0x253f   :  { %v7187_v57 = vpop.permute.xlu0 %7186 }
0x2540   :  { %v6990_v28 = vpack.c.bf16 %v6987_v26, %v6987_v26 }
0x2542   :  { %10198 = vmatmul.mubr.msk.bf16.vlgmr.msra.gmra.mxu0 %vm820_vm5, %v6990_v28 }
0x2543   :  { %10208 = vmatpush3.bf16.msra.mxu0 %v7092_v11  ;;  %10209 = vmatprep.mubr.msk.bf16.mxu0 %vm10889_vm0, %v10888_v0 }
0x2544   :  { %10228 = vmatmul.mubr.msk.bf16.vlgmr.msra.gmra.mxu1 %vm672_vm4, %v7238_v8  ;;  %10219 = vmatprep.subr.bf16.mxu0 %v10888_v0 }
0x2545   :  { %v10832_v39 = vpop.eup %10831  ;;  %10239 = vmatprep.mubr.msk.bf16.mxu1 %vm10889_vm0, %v10888_v0 }
0x2546   :  { %v6989_v61 = vmul.f32 %v10832_v39, %v10826_v34 }
0x2548   :  { %v6992_v46 = vpack.c.bf16 %v6989_v61, %v6989_v61 }
0x254a   :  { %10210 = vmatmul.mubr.msk.bf16.vlgmr.msra.gmra.mxu0 %vm820_vm5, %v6992_v46 }
0x254b   :  { %10220 = vmatpush3.bf16.xpose.msra.mxu0 %v7194_v41  ;;  %10221 = vmatprep.mubr.msk.bf16.mxu0 %vm10889_vm0, %v10888_v0 }
0x254c   :  { %10231 = vmatprep.subr.bf16.mxu0 %v10888_v0 }
0x2552   :  { %10222 = vmatmul.mubr.msk.bf16.vlgmr.msra.gmra.mxu0 %vm672_vm4, %v7187_v57 }
0x2553   :  { %10233 = vmatprep.mubr.msk.bf16.mxu0 %vm10889_vm0, %v10888_v0 }
0x25cd   :  { %v12779_v32 = vpop.f32.mrf.mxu1 }
0x25cf   :  { %v10205_v44 = vpop.f32.mrf.mxu1 }
0x25d1   :  { %v7085_v23 = vpop.f32.mrf.mxu1 }
0x25d3   :  { %v10206_v20 = vpop.f32.mrf.mxu1 }
0x25fc   :  { %v7179_v58 = vpop.f32.mrf.mxu1 }
0x25fd   :  { %v7287_v53 = vmul.f32 0.25, %v7179_v58 }
0x25fe   :  { %v10217_v50 = vpop.f32.mrf.mxu1 }
0x25ff   :  { %v7290_v19 = vsel %vm820_vm5, %v7287_v53, -inf }
0x2600   :  { %7291 = vmax.xlane.f32.xlu0 %v7290_v19  ;;  %v7182_v62 = vpop.f32.mrf.mxu1 }
0x2602   :  { %v7036_v18 = vpop.f32.mrf.mxu0  ;;  %v10218_v43 = vpop.f32.mrf.mxu1 }
0x2603   :  { %v10626_v43 = vld [vmem:[%s13188_s7 + $0xd0] sm:$0xff]  }
0x2604   :  { %v10199_v54 = vpop.f32.mrf.mxu0  ;;  %v7281_v17 = vpop.f32.mrf.mxu1 }
0x2605   :  { %v7289_v12 = vmul.f32 0.25, %v7281_v17  ;;  %v10627_v54 = vld [vmem:[%s13188_s7 + $0xc8] sm:$0xff]   ;;  %v10628_v17 = vld [vmem:[%s13188_s7 + $0xc0] sm:$0xff]  }
0x2606   :  { %v7039_v14 = vpop.f32.mrf.mxu0  ;;  %v10229_v35 = vpop.f32.mrf.mxu1 }
0x2607   :  { %v7296_v63 = vsel %vm820_vm5, %v7289_v12, -inf  ;;  %v10633_v35 = vld [vmem:[%s13188_s7 + $0xf0] sm:$0xff]  }
0x2608   :  { %7297 = vmax.xlane.f32.xlu0 %v7296_v63  ;;  %v10200_v37 = vpop.f32.mrf.mxu0  ;;  %v7284_v40 = vpop.f32.mrf.mxu1 }
0x2609   :  { %v10635_v40 = vld [vmem:[%s13188_s7 + $0xe8] sm:$0xff]  }
0x260a   :  { %v12783_v21 = vpop.f32.mrf.mxu0  ;;  %v10230_v30 = vpop.f32.mrf.mxu1 }
0x260b   :  { %v10412_v33 = vpack.i.bf16 %v12783_v21, %v12779_v32 }
0x260c   :  { %v10211_v49 = vpop.f32.mrf.mxu0 }
0x260e   :  { %v7131_v1 = vpop.f32.mrf.mxu0 }
0x260f   :  { %v10636_v1 = vld [vmem:[%s13188_s7 + $0xe0] sm:$0xff]  }
0x2610   :  { %v10212_v10 = vpop.f32.mrf.mxu0 }
0x2612   :  { %v7230_v34 = vpop.f32.mrf.mxu0 }
0x2613   :  { %v7288_v9 = vmul.f32 0.25, %v7230_v34 }
0x2614   :  { %v10223_v4 = vpop.f32.mrf.mxu0 }
0x2615   :  { %v7293_v7 = vsel %vm820_vm5, %v7288_v9, -inf }
0x2616   :  { %7294 = vmax.xlane.f32.xlu1 %v7293_v7  ;;  %v7233_v29 = vpop.f32.mrf.mxu0 }
0x2618   :  { %v10224_v42 = vpop.f32.mrf.mxu0 }
0x2627   :  { %7326 = vrot.lane.b32.xlu1 %v12694_v2, %s13226_s6 }
0x262b   :  { %7422 = vrot.lane.b32.xlu1 %v12742_v3, %s13226_s6 }
0x262f   :  { %7473 = vrot.lane.b32.xlu1 %v12722_v15, %s13224_s3 }
0x2633   :  { %7485 = vrot.lane.b32.xlu1 %v7036_v18, %s13225_s28  ;;  %v10625_v18 = vld [vmem:[%s13188_s7 + $0xd8] sm:$0xff]  }
0x2689   :  { %v7292_v48 = vpop.xlane.xlu0 %7291 }
0x268a   :  { %v7299_v36 = vsub.f32 %v7287_v53, %v7292_v48 }
0x268c   :  { %v7302_v52 = vmul.f32 1.442695, %v7299_v36 }
0x268e   :  { %10833 = vpow2.f32 %v7302_v52 }
0x2691   :  { %v7298_v5 = vpop.xlane.xlu0 %7297 }
0x2692   :  { %v7301_v22 = vsub.f32 %v7289_v12, %v7298_v5  ;;  %v10631_v12 = vld [vmem:[%s13188_s7 + $0xf8] sm:$0xff]  }
0x2693   :  { %v10629_v5 = vld [vmem:[%s13188_s7 + $0x118] sm:$0xff]  }
0x2694   :  { %v7306_v38 = vmul.f32 1.442695, %v7301_v22 }
0x2696   :  { %10835 = vpow2.f32 %v7306_v38 }
0x269b   :  { %v10834_v59 = vpop.eup %10833 }
0x269c   :  { %v7308_v24 = vsel %vm820_vm5, %v10834_v59, 0.0 }
0x269d   :  { %7309 = vadd.xlane.f32.xlu0 %v7308_v24  ;;  %v10630_v24 = vld [vmem:[%s13188_s7 + $0x110] sm:$0xff]  }
0x269f   :  { %v7295_v2 = vpop.xlane.xlu1 %7294 }
0x26a0   :  { %v7300_v25 = vsub.f32 %v7288_v9, %v7295_v2 }
0x26a2   :  { %v7304_v3 = vmul.f32 1.442695, %v7300_v25  ;;  %v10632_v25 = vld [vmem:[%s13188_s7 + $0x108] sm:$0xff]  }
0x26a3   :  { %v10836_v26 = vpop.eup %10835  ;;  %v7327_v28 = vpop.permute.xlu1 %7326 }
0x26a4   :  { %10837 = vpow2.f32 %v7304_v3  ;;  %v7332_v15 = vsel %vm862_vm6, %v7327_v28, 0  ;;  %v7314_v11 = vsel %vm820_vm5, %v10836_v26, 0.0 }
0x26a5   :  { %7315 = vadd.xlane.f32.xlu0 %v7314_v11  ;;  %10232 = vmatpush3.bf16.msra.mxu0 %v7332_v15  ;;  %v10634_v15 = vld [vmem:[%s13188_s7 + $0x100] sm:$0xff]  }
0x26a6   :  { %10243 = vmatprep.subr.bf16.mxu0 %v10888_v0 }
0x26a7   :  { %v7423_v44 = vpop.permute.xlu1 %7422 }
0x26a8   :  { %v7428_v20 = vsel %vm862_vm6, %v7423_v44, 0 }
0x26ab   :  { %v7474_v7 = vpop.permute.xlu1 %7473 }
0x26ac   :  { %v7506_v42 = vsel %vm672_vm4, %v12647_v6, %v7474_v7  ;;  %v10640_v7 = vld [vmem:[#allocation2 + $0xc0] sm:$0xff]  }
0x26af   :  { %v7486_v29 = vpop.permute.xlu1 %7485 }
0x26b0   :  { %v7509_v48 = vsel %vm2040_vm7, %v7506_v42, %v7486_v29  ;;  %v10641_v29 = vld [vmem:[#allocation2 + $0xf8] sm:$0xff]   ;;  %v10642_v42 = vld [vmem:[#allocation2 + $0xf0] sm:$0xff]  }
0x26b1   :  { %v10838_v8 = vpop.eup %10837 }
0x26b2   :  { %v7311_v39 = vsel %vm820_vm5, %v10838_v8, 0.0 }
0x26b3   :  { %7312 = vadd.xlane.f32.xlu0 %v7311_v39 }
0x26c9   :  { %7374 = vrot.lane.b32.xlu0 %v12714_v45, %s13226_s6  ;;  %s13228_s6 = sld [smem:[#allocation9_spill]] }
0x26cd   :  { %10408 = vrot.lane.b32.xlu0 %v10407_v47, %s13224_s3 }
0x2726   :  { %v7310_v61 = vpop.xlane.xlu0 %7309 }
0x2727   :  { %10839 = vrcp.f32 %v7310_v61 }
0x272e   :  { %v7316_v46 = vpop.xlane.xlu0 %7315 }
0x272f   :  { %10841 = vrcp.f32 %v7316_v46 }
0x2734   :  { %v10840_v41 = vpop.eup %10839 }
0x2735   :  { %v7320_v57 = vmul.f32 %v10840_v41, %v10834_v59 }
0x2737   :  { %v7323_v23 = vpack.c.bf16 %v7320_v57, %v7320_v57 }
0x2739   :  { %10234 = vmatmul.mubr.msk.bf16.vlgmr.msra.gmra.mxu0 %vm820_vm5, %v7323_v23  ;;  %v9114_v23 = vld [vmem:[%s13189_s8 + $0x6] ss:$0 sm:$0xff] }
0x273a   :  { %10244 = vmatpush3.bf16.msra.mxu0 %v7428_v20  ;;  %10245 = vmatprep.mubr.msk.bf16.mxu0 %vm10889_vm0, %v10888_v0 }
0x273b   :  { %10261 = vmatprep.subr.bf16.mxu0 %v10888_v0 }
0x273c   :  { %v10842_v45 = vpop.eup %10841  ;;  %v7313_v56 = vpop.xlane.xlu0 %7312 }
0x273d   :  { %v7322_v31 = vmul.f32 %v10842_v45, %v10836_v26  ;;  %10843 = vrcp.f32 %v7313_v56 }
0x273f   :  { %v7325_v47 = vpack.c.bf16 %v7322_v31, %v7322_v31 }
0x2740   :  { %v7375_v58 = vpop.permute.xlu0 %7374 }
0x2741   :  { %v7380_v53 = vsel %vm862_vm6, %v7375_v58, 0  ;;  %10246 = vmatmul.mubr.msk.bf16.vlgmr.msra.gmra.mxu0 %vm820_vm5, %v7325_v47 }
0x2742   :  { %10238 = vmatpush3.bf16.msra.mxu1 %v7380_v53  ;;  %10269 = vmatprep.mubr.msk.bf16.mxu0 %vm10889_vm0, %v10888_v0 }
0x2743   :  { %10249 = vmatprep.subr.bf16.mxu1 %v10888_v0  ;;  %10262 = vmatpush3.bf16.msra.mxu0 %v10631_v12 }
0x2744   :  { %10263 = vmatprep.subr.bf16.mxu0 %v10888_v0  ;;  %v10409_v38 = vpop.permute.xlu0 %10408 }
0x2745   :  { %v10411_v6 = vunpack.i.h.bf16 %v10409_v38 }
0x2747   :  { %10264 = vmatpush3.bf16.msra.mxu0 %v10633_v35  ;;  %v7508_v3 = vsel %vm672_vm4, %v12653_v16, %v10411_v6 }
0x2748   :  { %10265 = vmatprep.subr.bf16.mxu0 %v10888_v0 }
0x274a   :  { %v10844_v50 = vpop.eup %10843 }
0x274b   :  { %v7321_v19 = vmul.f32 %v10844_v50, %v10838_v8  ;;  %10266 = vmatpush3.bf16.msra.mxu0 %v10635_v40  ;;  %v10410_v8 = vunpack.i.l.bf16 %v10409_v38 }
0x274c   :  { %10267 = vmatprep.subr.bf16.mxu0 %v10888_v0 }
0x274d   :  { %v7324_v62 = vpack.c.bf16 %v7321_v19, %v7321_v19  ;;  %v7507_v16 = vsel %vm672_vm4, %v12649_v60, %v10410_v8  ;;  %v9135_v8 = vld [vmem:[%s13191_s10 + $0x6] ss:$0 sm:$0xff] }
0x274f   :  { %10240 = vmatmul.mubr.msk.bf16.vlgmr.msra.gmra.mxu1 %vm820_vm5, %v7324_v62  ;;  %10268 = vmatpush3.bf16.msra.mxu0 %v10636_v1 }
0x2750   :  { %10257 = vmatprep.mubr.msk.bf16.mxu1 %vm10889_vm0, %v10888_v0  ;;  %10250 = vmatpush3.bf16.msra.mxu1 %v10625_v18  ;;  %v9116_v18 = vld [vmem:[%s13189_s8 + $0x8] ss:$0 sm:$0xff] }
0x2751   :  { %10251 = vmatprep.subr.bf16.mxu1 %v10888_v0  ;;  %10285 = vmatprep.subr.bf16.mxu0 %v10888_v0 }
0x2754   :  { %10252 = vmatpush3.bf16.msra.mxu1 %v10626_v43  ;;  %v9115_v43 = vld [vmem:[%s13189_s8 + $0x7] ss:$0 sm:$0xff] }
0x2755   :  { %10253 = vmatprep.subr.bf16.mxu1 %v10888_v0 }
0x2758   :  { %10254 = vmatpush3.bf16.msra.mxu1 %v10627_v54 }
0x2759   :  { %10255 = vmatprep.subr.bf16.mxu1 %v10888_v0 }
0x275c   :  { %10256 = vmatpush3.bf16.msra.mxu1 %v10628_v17 }
0x275d   :  { %10273 = vmatprep.subr.bf16.mxu1 %v10888_v0 }
0x27f9   :  { %v7368_v14 = vpop.f32.mrf.mxu0 }
0x27fa   :  { %7497 = vrot.lane.b32.xlu1 %v7368_v14, %s13227_s27 }
0x27fb   :  { %v10235_v63 = vpop.f32.mrf.mxu0 }
0x27fd   :  { %v7371_v37 = vpop.f32.mrf.mxu0 }
0x27fe   :  { %10413 = vrot.lane.b32.xlu1 %v10412_v33, %s13225_s28  ;;  %v8569_v37 = vld [vmem:[%s13228_s6] ss:$0 sm:$0xff] }
0x27ff   :  { %v10236_v30 = vpop.f32.mrf.mxu0 }
0x2801   :  { %v7464_v49 = vpop.f32.mrf.mxu0 }
0x2802   :  { %7501 = vrot.lane.b32.xlu1 %v7464_v49, %s13227_s27 }
0x2803   :  { %v10247_v10 = vpop.f32.mrf.mxu0 }
0x2805   :  { %v7467_v34 = vpop.f32.mrf.mxu0 }
0x2806   :  { %v12926_v34 = vadd.f32 %v8569_v37, %v11159_v51  ;;  %v10638_v51 = vld [vmem:[#allocation2 + $0xd0] sm:$0xff]  }
0x2807   :  { %v10248_v9 = vpop.f32.mrf.mxu0 }
0x2808   :  { %v10637_v9 = vld [vmem:[#allocation2 + $0xd8] sm:$0xff]  }
0x280f   :  { %v7416_v4 = vpop.f32.mrf.mxu1 }
0x2810   :  { %7499 = vrot.lane.b32.xlu0 %v7416_v4, %s13227_s27 }
0x2811   :  { %v10241_v32 = vpop.f32.mrf.mxu1 }
0x2812   :  { %v231_v32 = vsel %vm230_vm9, %v12926_v34, -inf }
0x2813   :  { %v7419_v21 = vpop.f32.mrf.mxu1 }
0x2815   :  { %v10242_v33 = vpop.f32.mrf.mxu1 }
0x2816   :  { %v10639_v33 = vld [vmem:[#allocation2 + $0xc8] sm:$0xff]  }
0x286c   :  { %v7498_v36 = vpop.permute.xlu1 %7497 }
0x286d   :  { %v7512_v52 = vsel %vm2044_vm8, %v7509_v48, %v7498_v36  ;;  %v10644_v48 = vld [vmem:[#allocation2 + $0xe8] sm:$0xff]   ;;  %v10646_v36 = vld [vmem:[#allocation2 + $0xe0] sm:$0xff]  }
0x286e   :  { %v7515_v22 = vpack.c.bf16 %v7512_v52, %v7512_v52 }
0x2870   :  { %10258 = vmatmul.mubr.msk.bf16.vlgmr.msra.gmra.mxu1 %vm156_vm3, %v7515_v22  ;;  %v10414_v59 = vpop.permute.xlu1 %10413 }
0x2871   :  { %10274 = vmatpush3.bf16.msra.mxu1 %v10629_v5  ;;  %10281 = vmatprep.mubr.msk.bf16.mxu1 %vm10889_vm0, %v10888_v0  ;;  %v10416_v2 = vunpack.i.h.bf16 %v10414_v59  ;;  %v10415_v39 = vunpack.i.l.bf16 %v10414_v59 }
0x2872   :  { %10275 = vmatprep.subr.bf16.mxu1 %v10888_v0 }
0x2873   :  { %v7511_v26 = vsel %vm2040_vm7, %v7508_v3, %v10416_v2  ;;  %v7510_v41 = vsel %vm2040_vm7, %v7507_v16, %v10415_v39  ;;  %v9132_v3 = vld [vmem:[%s13190_s9 + $0x6] ss:$0 sm:$0xff] }
0x2874   :  { %v7502_v28 = vpop.permute.xlu1 %7501 }
0x2875   :  { %10276 = vmatpush3.bf16.msra.mxu1 %v10630_v24  ;;  %v7514_v11 = vsel %vm2044_vm8, %v7511_v26, %v7502_v28 }
0x2876   :  { %10277 = vmatprep.subr.bf16.mxu1 %v10888_v0  ;;  %v7517_v61 = vpack.c.bf16 %v7514_v11, %v7514_v11 }
0x2879   :  { %10278 = vmatpush3.bf16.msra.mxu1 %v10632_v25 }
0x287a   :  { %10279 = vmatprep.subr.bf16.mxu1 %v10888_v0 }
0x287d   :  { %10280 = vmatpush3.bf16.msra.mxu1 %v10634_v15 }
0x287e   :  { %10297 = vmatprep.subr.bf16.mxu1 %v10888_v0 }
0x2880   :  { %10282 = vmatmul.mubr.msk.bf16.vlgmr.msra.gmra.mxu1 %vm156_vm3, %v7517_v61 }
0x2881   :  { %10305 = vmatprep.mubr.msk.bf16.mxu1 %vm10889_vm0, %v10888_v0  ;;  %10298 = vmatpush3.bf16.msra.mxu1 %v10641_v29  ;;  %v10653_v29 = vld [vmem:[%s13196_s15 + $0x198] sm:$0xff]  }
0x2882   :  { %v7500_v46 = vpop.permute.xlu0 %7499  ;;  %10299 = vmatprep.subr.bf16.mxu1 %v10888_v0 }
0x2883   :  { %v7513_v57 = vsel %vm2044_vm8, %v7510_v41, %v7500_v46 }
0x2884   :  { %v7516_v44 = vpack.c.bf16 %v7513_v57, %v7513_v57 }
0x2885   :  { %10300 = vmatpush3.bf16.msra.mxu1 %v10642_v42  ;;  %v10654_v42 = vld [vmem:[%s13196_s15 + $0x190] sm:$0xff]  }
0x2886   :  { %10270 = vmatmul.mubr.msk.bf16.vlgmr.msra.gmra.mxu0 %vm156_vm3, %v7516_v44  ;;  %10301 = vmatprep.subr.bf16.mxu1 %v10888_v0 }
0x2887   :  { %10293 = vmatprep.mubr.msk.bf16.mxu0 %vm10889_vm0, %v10888_v0  ;;  %10286 = vmatpush3.bf16.msra.mxu0 %v10637_v9  ;;  %v9137_v9 = vld [vmem:[%s13191_s10 + $0x8] ss:$0 sm:$0xff] }
0x2888   :  { %10287 = vmatprep.subr.bf16.mxu0 %v10888_v0 }
0x2889   :  { %10302 = vmatpush3.bf16.msra.mxu1 %v10644_v48  ;;  %v10656_v48 = vld [vmem:[%s13196_s15 + $0x188] sm:$0xff]  }
0x288a   :  { %10303 = vmatprep.subr.bf16.mxu1 %v10888_v0 }
0x288b   :  { %10288 = vmatpush3.bf16.msra.mxu0 %v10638_v51  ;;  %v10650_v51 = vld [vmem:[%s13196_s15 + $0x1b0] sm:$0xff]  }
0x288c   :  { %10289 = vmatprep.subr.bf16.mxu0 %v10888_v0 }
0x288d   :  { %10304 = vmatpush3.bf16.msra.mxu1 %v10646_v36  ;;  %v10657_v36 = vld [vmem:[%s13196_s15 + $0x1f0] sm:$0xff]  }
0x288e   :  { %10321 = vmatprep.subr.bf16.mxu1 %v10888_v0 }
0x288f   :  { %10290 = vmatpush3.bf16.msra.mxu0 %v10639_v33  ;;  %v10655_v33 = vld [vmem:[%s13196_s15 + $0x1f8] sm:$0xff]  }
0x2890   :  { %10291 = vmatprep.subr.bf16.mxu0 %v10888_v0 }
0x2893   :  { %10292 = vmatpush3.bf16.msra.mxu0 %v10640_v7  ;;  %v10652_v7 = vld [vmem:[%s13196_s15 + $0x1a0] sm:$0xff]  }
0x2894   :  { %10309 = vmatprep.subr.bf16.mxu0 %v10888_v0 }
0x2930   :  { %v7597_v20 = vpop.f32.mrf.mxu1 }
0x2931   :  { %v7598_v60 = vadd.f32 %v9114_v23, %v7597_v20 }
0x2932   :  { %v10259_v45 = vpop.f32.mrf.mxu1 }
0x2933   :  { %v12899_v56 = vadd.f32 %v7598_v60, %v12484_v13  ;;  %v10643_v45 = vld [vmem:[#allocation2 + $0x118] sm:$0xff]  }
0x2934   :  { %v7600_v31 = vpop.f32.mrf.mxu1 }
0x2935   :  { %v7740_v47 = vsel %vm156_vm3, %v12899_v56, 0.0  ;;  %v7752_v58 = vmul.f32 %v12899_v56, %v12899_v56 }
0x2936   :  { %7741 = vadd.xlane.f32.xlu0 %v7740_v47  ;;  %v10260_v53 = vpop.f32.mrf.mxu1 }
0x2937   :  { %v7755_v50 = vsel %vm156_vm3, %v7752_v58, 0.0 }
0x2938   :  { %7756 = vadd.xlane.f32.xlu1 %v7755_v50 }
0x2940   :  { %v7731_v19 = vpop.f32.mrf.mxu1 }
0x2941   :  { %v7732_v12 = vadd.f32 %v9116_v18, %v7731_v19  ;;  %v10645_v19 = vld [vmem:[#allocation2 + $0x110] sm:$0xff]   ;;  %v10647_v18 = vld [vmem:[#allocation2 + $0x108] sm:$0xff]  }
0x2942   :  { %v10283_v62 = vpop.f32.mrf.mxu1 }
0x2943   :  { %v12919_v30 = vadd.f32 %v7732_v12, %v12533_v55 }
0x2944   :  { %v7734_v13 = vpop.f32.mrf.mxu1 }
0x2945   :  { %v7746_v55 = vsel %vm156_vm3, %v12919_v30, 0.0  ;;  %v7754_v4 = vmul.f32 %v12919_v30, %v12919_v30  ;;  %v10648_v13 = vld [vmem:[#allocation2 + $0x100] sm:$0xff]  }
0x2946   :  { %v10284_v54 = vpop.f32.mrf.mxu1  ;;  %v7664_v17 = vpop.f32.mrf.mxu0 }
0x2947   :  { %v7665_v14 = vadd.f32 %v9115_v43, %v7664_v17  ;;  %v7761_v21 = vsel %vm156_vm3, %v7754_v4, 0.0  ;;  %v9133_v17 = vld [vmem:[%s13190_s9 + $0x7] ss:$0 sm:$0xff] }
0x2948   :  { %v10271_v35 = vpop.f32.mrf.mxu0 }
0x2949   :  { %v12913_v63 = vadd.f32 %v7665_v14, %v12519_v27  ;;  %v9136_v35 = vld [vmem:[%s13191_s10 + $0x7] ss:$0 sm:$0xff] }
0x294a   :  { %v7667_v40 = vpop.f32.mrf.mxu0 }
0x294b   :  { %v7743_v49 = vsel %vm156_vm3, %v12913_v63, 0.0  ;;  %v7753_v1 = vmul.f32 %v12913_v63, %v12913_v63 }
0x294c   :  { %7744 = vadd.xlane.f32.xlu0 %v7743_v49  ;;  %v10272_v10 = vpop.f32.mrf.mxu0 }
0x294d   :  { %v7758_v27 = vsel %vm156_vm3, %v7753_v1, 0.0  ;;  %v9134_v10 = vld [vmem:[%s13190_s9 + $0x8] ss:$0 sm:$0xff] }
0x294e   :  { %7759 = vadd.xlane.f32.xlu1 %v7758_v27 }
0x2950   :  { %7747 = vadd.xlane.f32.xlu0 %v7746_v55 }
0x2952   :  { %232 = vmax.xlane.f32.xlu1 %v231_v32  ;;  %v10649_v32 = vld [vmem:[%s13196_s15 + $0x1b8] sm:$0xff]  }
0x2954   :  { %7762 = vadd.xlane.f32.xlu0 %v7761_v21  ;;  %v10651_v21 = vld [vmem:[%s13196_s15 + $0x1a8] sm:$0xff]  }
0x29bf   :  { %v7742_v52 = vpop.xlane.xlu0 %7741 }
0x29c0   :  { %v7749_v5 = vmul.f32 0.015625, %v7742_v52  ;;  %v10658_v52 = vld [vmem:[%s13196_s15 + $0x180] sm:$0xff]  }
0x29c1   :  { %v7757_v22 = vpop.xlane.xlu1 %7756 }
0x29c2   :  { %v7767_v38 = vmul.f32 %v7749_v5, %v7749_v5  ;;  %v7764_v59 = vmul.f32 0.015625, %v7757_v22  ;;  %v7773_v2 = vsub.f32 %v12899_v56, %v7749_v5  ;;  %v10659_v5 = vld [vmem:[%s13196_s15 + $0x1e8] sm:$0xff]   ;;  %v10661_v22 = vld [vmem:[%s13196_s15 + $0x1e0] sm:$0xff]  }
0x29c4   :  { %v7770_v24 = vsub.f32 %v7764_v59, %v7767_v38  ;;  %v10663_v38 = vld [vmem:[%s13196_s15 + $0x1d8] sm:$0xff]   ;;  %v10665_v59 = vld [vmem:[%s13196_s15 + $0x1d0] sm:$0xff]  }
0x29c6   :  { %v7776_v6 = vadd.f32 1e-05, %v7770_v24  ;;  %v10667_v24 = vld [vmem:[%s13196_s15 + $0x1c8] sm:$0xff]  }
0x29c8   :  { %10845 = vrsqrt.f32 %v7776_v6  ;;  %v10669_v6 = vld [vmem:[%s13196_s15 + $0x1c0] sm:$0xff]  }
0x29d5   :  { %v10846_v25 = vpop.eup %10845  ;;  %v7745_v26 = vpop.xlane.xlu0 %7744 }
0x29d6   :  { %v7782_v28 = vmul.f32 %v10846_v25, %v7773_v2  ;;  %v7750_v15 = vmul.f32 0.015625, %v7745_v26  ;;  %v9138_v26 = vld [vmem:[%s13195_s14 + $0x6] ss:$0 sm:$0xff] }
0x29d7   :  { %v7760_v11 = vpop.xlane.xlu1 %7759 }
0x29d8   :  { %v7803_v39 = vmul.f32 %v9132_v3, %v7782_v28  ;;  %v7768_v61 = vmul.f32 %v7750_v15, %v7750_v15  ;;  %v7765_v16 = vmul.f32 0.015625, %v7760_v11  ;;  %v7774_v43 = vsub.f32 %v12913_v63, %v7750_v15 }
0x29d9   :  { %v7748_v46 = vpop.xlane.xlu0 %7747 }
0x29da   :  { %v7771_v41 = vsub.f32 %v7765_v16, %v7768_v61  ;;  %v7751_v57 = vmul.f32 0.015625, %v7748_v46  ;;  %v12951_v44 = vadd.f32 %v9135_v8, %v7803_v39  ;;  %v10660_v61 = vld [vmem:[%s13196_s15 + $0x238] sm:$0xff]  }
0x29db   :  { %v233_v23 = vpop.xlane.xlu1 %232 }
0x29dc   :  { %v7777_v20 = vadd.f32 1e-05, %v7771_v41  ;;  %v234_v60 = vsub.f32 %v12926_v34, %v233_v23  ;;  %v7827_v31 = vpack.c.bf16 %v12951_v44, %v12951_v44  ;;  %v7769_v47 = vmul.f32 %v7751_v57, %v7751_v57  ;;  %v10662_v41 = vld [vmem:[%s13196_s15 + $0x230] sm:$0xff]   ;;  %v10666_v23 = vld [vmem:[%s13196_s15 + $0x220] sm:$0xff]  }
0x29dd   :  { %v7763_v56 = vpop.xlane.xlu0 %7762  ;;  %v7775_v63 = vsub.f32 %v12919_v30, %v7751_v57  ;;  %v10664_v57 = vld [vmem:[%s13196_s15 + $0x228] sm:$0xff]  }
0x29de   :  { %10847 = vrsqrt.f32 %v7777_v20  ;;  %v235_v58 = vmul.f32 1.442695, %v234_v60  ;;  %v7766_v53 = vmul.f32 0.015625, %v7763_v56  ;;  %10294 = vmatmul.mubr.msk.bf16.vlgmr.msra.gmra.mxu0 %vm156_vm3, %v7827_v31  ;;  %v9139_v20 = vld [vmem:[%s13195_s14 + $0x7] ss:$0 sm:$0xff]  ;;  %v10668_v60 = vld [vmem:[%s13196_s15 + $0x218] sm:$0xff]  }
0x29df   :  { %10310 = vmatpush3.bf16.msra.mxu0 %v10643_v45  ;;  %10317 = vmatprep.mubr.msk.bf16.mxu0 %vm10889_vm0, %v10888_v0 }
0x29e0   :  { %10849 = vpow2.f32 %v235_v58  ;;  %v7772_v50 = vsub.f32 %v7766_v53, %v7769_v47  ;;  %10311 = vmatprep.subr.bf16.mxu0 %v10888_v0  ;;  %v10670_v58 = vld [vmem:[%s13196_s15 + $0x210] sm:$0xff]  }
0x29e2   :  { %v7778_v62 = vadd.f32 1e-05, %v7772_v50 }
0x29e3   :  { %10312 = vmatpush3.bf16.msra.mxu0 %v10645_v19  ;;  %v9140_v19 = vld [vmem:[%s13195_s14 + $0x8] ss:$0 sm:$0xff] }
0x29e4   :  { %10851 = vrsqrt.f32 %v7778_v62  ;;  %10313 = vmatprep.subr.bf16.mxu0 %v10888_v0 }
0x29e7   :  { %10314 = vmatpush3.bf16.msra.mxu0 %v10647_v18 }
0x29e8   :  { %10315 = vmatprep.subr.bf16.mxu0 %v10888_v0 }
0x29eb   :  { %v10848_v54 = vpop.eup %10847  ;;  %10316 = vmatpush3.bf16.msra.mxu0 %v10648_v13  ;;  %v10671_v13 = vld [vmem:[%s13196_s15 + $0x208] sm:$0xff]  }
0x29ec   :  { %v7783_v12 = vmul.f32 %v10848_v54, %v7774_v43  ;;  %10341 = vmatprep.subr.bf16.mxu0 %v10888_v0 }
0x29ed   :  { %v12966_v14 = vpop.eup %10849 }
0x29ee   :  { %v7804_v37 = vmul.f32 %v9133_v17, %v7783_v12  ;;  %v237_v40 = vsel %vm230_vm9, %v12966_v14, 0.0  ;;  %v10672_v12 = vld [vmem:[%s13196_s15 + $0x200] sm:$0xff]  }
0x29ef   :  { %238 = vadd.xlane.f32.xlu0 %v237_v40  ;;  %v10897_v40 = vmov 2  }
0x29f0   :  { %v12975_v49 = vadd.f32 %v9136_v35, %v7804_v37 }
0x29f1   :  { %v10852_v1 = vpop.eup %10851 }
0x29f2   :  { %v7784_v34 = vmul.f32 %v10852_v1, %v7775_v63  ;;  %v7828_v27 = vpack.c.bf16 %v12975_v49, %v12975_v49  ;;  %v10898_v63 = vmov 1   ;;  %v9156_v1 = vld [vmem:[%s13197_s16 + $0x6] ss:$0 sm:$0xff] }
0x29f3   :  { %10418 = vset.pattern.permute.xlu0 %v10898_v63 }
0x29f4   :  { %v7805_v55 = vmul.f32 %v9134_v10, %v7784_v34  ;;  %10306 = vmatmul.mubr.msk.bf16.vlgmr.msra.gmra.mxu1 %vm156_vm3, %v7828_v27 }
0x29f5   :  { %10337 = vmatprep.mubr.msk.bf16.mxu1 %vm10889_vm0, %v10888_v0  ;;  %10322 = vmatpush3.bf16.msra.mxu1 %v10649_v32 }
0x29f6   :  { %v12988_v30 = vadd.f32 %v9137_v9, %v7805_v55  ;;  %10323 = vmatprep.subr.bf16.mxu1 %v10888_v0 }
0x29f8   :  { %v7829_v4 = vpack.c.bf16 %v12988_v30, %v12988_v30 }
0x29f9   :  { %10324 = vmatpush3.bf16.msra.mxu1 %v10650_v51 }
0x29fa   :  { %10318 = vmatmul.mubr.msk.bf16.vlgmr.msra.gmra.mxu0 %vm156_vm3, %v7829_v4  ;;  %10325 = vmatprep.subr.bf16.mxu1 %v10888_v0 }
0x29fb   :  { %10357 = vmatprep.mubr.msk.bf16.mxu0 %vm10889_vm0, %v10888_v0  ;;  %10342 = vmatpush3.bf16.msra.mxu0 %v10655_v33  ;;  %v9157_v33 = vld [vmem:[%s13197_s16 + $0x7] ss:$0 sm:$0xff] }
0x29fc   :  { %10343 = vmatprep.subr.bf16.mxu0 %v10888_v0 }
0x29fd   :  { %10326 = vmatpush3.bf16.msra.mxu1 %v10651_v21 }
0x29fe   :  { %10327 = vmatprep.subr.bf16.mxu1 %v10888_v0 }
0x29ff   :  { %10344 = vmatpush3.bf16.msra.mxu0 %v10657_v36 }
0x2a00   :  { %10345 = vmatprep.subr.bf16.mxu0 %v10888_v0 }
0x2a01   :  { %10328 = vmatpush3.bf16.msra.mxu1 %v10652_v7 }
0x2a02   :  { %10329 = vmatprep.subr.bf16.mxu1 %v10888_v0 }
0x2a03   :  { %10346 = vmatpush3.bf16.msra.mxu0 %v10659_v5 }
0x2a04   :  { %10347 = vmatprep.subr.bf16.mxu0 %v10888_v0 }
0x2a05   :  { %10330 = vmatpush3.bf16.msra.mxu1 %v10653_v29 }
0x2a06   :  { %10331 = vmatprep.subr.bf16.mxu1 %v10888_v0 }
0x2a07   :  { %10348 = vmatpush3.bf16.msra.mxu0 %v10661_v22 }
0x2a08   :  { %10349 = vmatprep.subr.bf16.mxu0 %v10888_v0 }
0x2a09   :  { %10332 = vmatpush3.bf16.msra.mxu1 %v10654_v42 }
0x2a0a   :  { %10333 = vmatprep.subr.bf16.mxu1 %v10888_v0 }
0x2a0b   :  { %10350 = vmatpush3.bf16.msra.mxu0 %v10663_v38  ;;  %v9158_v38 = vld [vmem:[%s13197_s16 + $0x8] ss:$0 sm:$0xff] }
0x2a0c   :  { %10351 = vmatprep.subr.bf16.mxu0 %v10888_v0 }
0x2a0d   :  { %10334 = vmatpush3.bf16.msra.mxu1 %v10656_v48 }
0x2a0e   :  { %10335 = vmatprep.subr.bf16.mxu1 %v10888_v0 }
0x2a0f   :  { %10352 = vmatpush3.bf16.msra.mxu0 %v10665_v59 }
0x2a10   :  { %10353 = vmatprep.subr.bf16.mxu0 %v10888_v0 }
0x2a11   :  { %10336 = vmatpush3.bf16.msra.mxu1 %v10658_v52 }
0x2a12   :  { %10361 = vmatprep.subr.bf16.mxu1 %v10888_v0 }
0x2a13   :  { %10354 = vmatpush3.bf16.msra.mxu0 %v10667_v24 }
0x2a14   :  { %10355 = vmatprep.subr.bf16.mxu0 %v10888_v0 }
0x2a17   :  { %10356 = vmatpush3.bf16.msra.mxu0 %v10669_v6 }
0x2a18   :  { %10381 = vmatprep.subr.bf16.mxu0 %v10888_v0 }
0x2a78   :  { %v239_v2 = vpop.xlane.xlu0 %238 }
0x2a79   :  { %10853 = vrcp.f32 %v239_v2 }
0x2a86   :  { %v10854_v25 = vpop.eup %10853 }
0x2a87   :  { %v13060_v3 = vmul.f32 %v10854_v25, %v12966_v14 }
0x2a89   :  { %8429 = vperm.xlu1 %10417, %v13060_v3  }
0x2a8d   :  { %10419 = vset.pattern.permute.xlu1 %v10897_v40 }
0x2a9e   :  { %v7909_v28 = vpop.f32.mrf.mxu0 }
0x2a9f   :  { %v7910_v15 = vadd.f32 %v9138_v26, %v7909_v28 }
0x2aa0   :  { %v10295_v11 = vpop.f32.mrf.mxu0 }
0x2aa1   :  { %v8049_v8 = vmax.f32 %v7910_v15, 0.0 }
0x2aa2   :  { %v7912_v39 = vpop.f32.mrf.mxu0 }
0x2aa3   :  { %v8052_v16 = vpack.c.bf16 %v8049_v8, %v8049_v8 }
0x2aa4   :  { %v10296_v46 = vpop.f32.mrf.mxu0 }
0x2aa5   :  { %10338 = vmatmul.mubr.bf16.vlgmr.msra.gmra.mxu1 %v8052_v16 }
0x2aa6   :  { %10362 = vmatpush3.bf16.msra.mxu1 %v10660_v61  ;;  %10377 = vmatprep.mubr.msk.bf16.mxu1 %vm10889_vm0, %v10888_v0 }
0x2aa7   :  { %10363 = vmatprep.subr.bf16.mxu1 %v10888_v0 }
0x2aaa   :  { %10364 = vmatpush3.bf16.msra.mxu1 %v10662_v41 }
0x2aab   :  { %10365 = vmatprep.subr.bf16.mxu1 %v10888_v0 }
0x2aae   :  { %10366 = vmatpush3.bf16.msra.mxu1 %v10664_v57 }
0x2aaf   :  { %10367 = vmatprep.subr.bf16.mxu1 %v10888_v0 }
0x2ab2   :  { %10368 = vmatpush3.bf16.msra.mxu1 %v10666_v23 }
0x2ab3   :  { %10369 = vmatprep.subr.bf16.mxu1 %v10888_v0 }
0x2ab4   :  { %v7976_v45 = vpop.f32.mrf.mxu1 }
0x2ab5   :  { %v7977_v56 = vadd.f32 %v9139_v20, %v7976_v45 }
0x2ab6   :  { %v10307_v31 = vpop.f32.mrf.mxu1  ;;  %10370 = vmatpush3.bf16.msra.mxu1 %v10668_v60 }
0x2ab7   :  { %v8050_v47 = vmax.f32 %v7977_v56, 0.0  ;;  %10371 = vmatprep.subr.bf16.mxu1 %v10888_v0 }
0x2ab8   :  { %v7979_v53 = vpop.f32.mrf.mxu1 }
0x2ab9   :  { %v8053_v50 = vpack.c.bf16 %v8050_v47, %v8050_v47 }
0x2aba   :  { %v10308_v62 = vpop.f32.mrf.mxu1  ;;  %v8043_v18 = vpop.f32.mrf.mxu0  ;;  %10372 = vmatpush3.bf16.msra.mxu1 %v10670_v58 }
0x2abb   :  { %10358 = vmatmul.mubr.bf16.vlgmr.msra.gmra.mxu0 %v8053_v50  ;;  %v8044_v43 = vadd.f32 %v9140_v19, %v8043_v18  ;;  %10373 = vmatprep.subr.bf16.mxu1 %v10888_v0 }
0x2abc   :  { %v10319_v54 = vpop.f32.mrf.mxu0  ;;  %10389 = vmatprep.mubr.msk.bf16.mxu0 %vm10889_vm0, %v10888_v0 }
0x2abd   :  { %v8051_v14 = vmax.f32 %v8044_v43, 0.0 }
0x2abe   :  { %v8046_v17 = vpop.f32.mrf.mxu0  ;;  %10374 = vmatpush3.bf16.msra.mxu1 %v10671_v13 }
0x2abf   :  { %10375 = vmatprep.subr.bf16.mxu1 %v10888_v0  ;;  %v8054_v37 = vpack.c.bf16 %v8051_v14, %v8051_v14 }
0x2ac0   :  { %v10320_v35 = vpop.f32.mrf.mxu0 }
0x2ac1   :  { %v9183_v35 = vld [vmem:[%s13192_s11 + $0x6] ss:$0 sm:$0xff] }
0x2ac2   :  { %10376 = vmatpush3.bf16.msra.mxu1 %v10672_v12  ;;  %v9184_v12 = vld [vmem:[%s13192_s11 + $0x7] ss:$0 sm:$0xff] }
0x2ac5   :  { %10378 = vmatmul.mubr.bf16.vlgmr.msra.gmra.mxu1 %v8054_v37 }
0x2b04   :  { %v8430_v11 = vpop.permute.xlu1 %8429 }
0x2b65   :  { %v8155_v10 = vpop.f32.mrf.mxu1 }
0x2b66   :  { %v8156_v34 = vadd.f32 %v9156_v1, %v8155_v10  ;;  %v9186_v1 = vld [vmem:[%s13193_s12 + $0x6] ss:$0 sm:$0xff] }
0x2b67   :  { %v10339_v27 = vpop.f32.mrf.mxu1 }
0x2b68   :  { %v13111_v9 = vadd.f32 %v8156_v34, %v12951_v44 }
0x2b69   :  { %v8158_v55 = vpop.f32.mrf.mxu1 }
0x2b6a   :  { %v8340_v4 = vsel %vm156_vm3, %v13111_v9, 0.0  ;;  %v8352_v32 = vmul.f32 %v13111_v9, %v13111_v9 }
0x2b6b   :  { %8341 = vadd.xlane.f32.xlu1 %v8340_v4  ;;  %v10340_v51 = vpop.f32.mrf.mxu1 }
0x2b6c   :  { %v8355_v21 = vsel %vm156_vm3, %v8352_v32, 0.0  ;;  %v9188_v32 = vld [vmem:[%s13193_s12 + $0x8] ss:$0 sm:$0xff] }
0x2b6d   :  { %8356 = vadd.xlane.f32.xlu0 %v8355_v21 }
0x2b7b   :  { %v8243_v7 = vpop.f32.mrf.mxu0 }
0x2b7c   :  { %v8244_v29 = vadd.f32 %v9157_v33, %v8243_v7 }
0x2b7d   :  { %v10359_v44 = vpop.f32.mrf.mxu0 }
0x2b7e   :  { %v8338_v42 = vadd.f32 %v8244_v29, %v12975_v49 }
0x2b7f   :  { %v8246_v48 = vpop.f32.mrf.mxu0 }
0x2b80   :  { %v8343_v36 = vsel %vm156_vm3, %v8338_v42, 0.0  ;;  %v8353_v52 = vmul.f32 %v8338_v42, %v8338_v42 }
0x2b81   :  { %8344 = vadd.xlane.f32.xlu0 %v8343_v36  ;;  %v10360_v5 = vpop.f32.mrf.mxu0 }
0x2b82   :  { %v8358_v22 = vsel %vm156_vm3, %v8353_v52, 0.0 }
0x2b83   :  { %8359 = vadd.xlane.f32.xlu1 %v8358_v22 }
0x2b85   :  { %v8331_v59 = vpop.f32.mrf.mxu1 }
0x2b86   :  { %v8332_v24 = vadd.f32 %v9158_v38, %v8331_v59  ;;  %v10673_v38 = vld [vmem:[%s13200_s19 + $0x18] sm:$0xff]   ;;  %v10674_v59 = vld [vmem:[%s13200_s19 + $0x10] sm:$0xff]  }
0x2b87   :  { %v10379_v6 = vpop.f32.mrf.mxu1  ;;  %10382 = vmatpush3.bf16.msra.mxu0 %v10673_v38 }
0x2b88   :  { %v8339_v2 = vadd.f32 %v8332_v24, %v12988_v30  ;;  %10383 = vmatprep.subr.bf16.mxu0 %v10888_v0  ;;  %v10675_v24 = vld [vmem:[%s13200_s19 + $0x8] sm:$0xff]   ;;  %v10676_v6 = vld [vmem:[%s13200_s19] sm:$0xff]  }
0x2b89   :  { %v8334_v25 = vpop.f32.mrf.mxu1 }
0x2b8a   :  { %v8346_v49 = vsel %vm156_vm3, %v8339_v2, 0.0  ;;  %v8354_v26 = vmul.f32 %v8339_v2, %v8339_v2 }
0x2b8b   :  { %v10380_v28 = vpop.f32.mrf.mxu1  ;;  %8347 = vadd.xlane.f32.xlu1 %v8346_v49  ;;  %10384 = vmatpush3.bf16.msra.mxu0 %v10674_v59 }
0x2b8c   :  { %v8361_v15 = vsel %vm156_vm3, %v8354_v26, 0.0  ;;  %10385 = vmatprep.subr.bf16.mxu0 %v10888_v0 }
0x2b8d   :  { %8362 = vadd.xlane.f32.xlu0 %v8361_v15 }
0x2b8f   :  { %10386 = vmatpush3.bf16.msra.mxu0 %v10675_v24 }
0x2b90   :  { %10387 = vmatprep.subr.bf16.mxu0 %v10888_v0 }
0x2b93   :  { %10388 = vmatpush3.bf16.msra.mxu0 %v10676_v6 }
0x2b9c   :  { %8441 = vperm.xlu1 %10419, %v13060_v3  }
0x2ba3   :  { %8435 = vperm.xlu0 %10418, %v13060_v3  }
0x2ba7   :  { %10420 = vset.pattern.permute.xlu0 %v10897_v40  ;;  %v9187_v40 = vld [vmem:[%s13193_s12 + $0x7] ss:$0 sm:$0xff] }
0x2bf4   :  { %v8342_v8 = vpop.xlane.xlu1 %8341 }
0x2bf5   :  { %v8349_v39 = vmul.f32 0.015625, %v8342_v8 }
0x2bf6   :  { %v8357_v61 = vpop.xlane.xlu0 %8356 }
0x2bf7   :  { %v8367_v16 = vmul.f32 %v8349_v39, %v8349_v39  ;;  %v8364_v30 = vmul.f32 0.015625, %v8357_v61  ;;  %v8373_v54 = vsub.f32 %v13111_v9, %v8349_v39  ;;  %v9185_v9 = vld [vmem:[%s13192_s11 + $0x8] ss:$0 sm:$0xff]  ;;  %v9189_v61 = vld [vmem:[%s13198_s17] ss:$0 sm:$0xff] }
0x2bf9   :  { %v8370_v57 = vsub.f32 %v8364_v30, %v8367_v16  ;;  %v9190_v16 = vld [vmem:[%s13199_s18] ss:$0 sm:$0xff] }
0x2bfb   :  { %v8376_v56 = vadd.f32 1e-05, %v8370_v57  ;;  %v9191_v57 = vld [vmem:[%s13201_s20] ss:$0 sm:$0xff] }
0x2c0a   :  { %v8345_v46 = vpop.xlane.xlu0 %8344 }
0x2c0b   :  { %v8350_v41 = vmul.f32 0.015625, %v8345_v46 }
0x2c0c   :  { %v8360_v23 = vpop.xlane.xlu1 %8359 }
0x2c0d   :  { %v8368_v20 = vmul.f32 %v8350_v41, %v8350_v41  ;;  %v8365_v60 = vmul.f32 0.015625, %v8360_v23  ;;  %v8374_v13 = vsub.f32 %v8338_v42, %v8350_v41 }
0x2c0f   :  { %v8371_v45 = vsub.f32 %v8365_v60, %v8368_v20 }
0x2c11   :  { %v8377_v31 = vadd.f32 1e-05, %v8371_v45 }
0x2c13   :  { %10855 = vrsqrt.f32 %v8377_v31 }
0x2c14   :  { %10857 = vrsqrt.f32 %v8376_v56  ;;  %v8348_v47 = vpop.xlane.xlu1 %8347 }
0x2c15   :  { %v8351_v3 = vmul.f32 0.015625, %v8348_v47 }
0x2c16   :  { %v8363_v58 = vpop.xlane.xlu0 %8362 }
0x2c17   :  { %v8369_v53 = vmul.f32 %v8351_v3, %v8351_v3  ;;  %v8366_v50 = vmul.f32 0.015625, %v8363_v58  ;;  %v8375_v10 = vsub.f32 %v8339_v2, %v8351_v3 }
0x2c18   :  { %v8442_v44 = vpop.permute.xlu1 %8441 }
0x2c19   :  { %v8372_v19 = vsub.f32 %v8366_v50, %v8369_v53 }
0x2c1b   :  { %v8378_v62 = vadd.f32 1e-05, %v8372_v19 }
0x2c1d   :  { %10859 = vrsqrt.f32 %v8378_v62 }
0x2c1e   :  { %v8436_v51 = vpop.permute.xlu0 %8435 }
0x2c20   :  { %v10856_v18 = vpop.eup %10855 }
0x2c21   :  { %v10858_v43 = vpop.eup %10857  ;;  %v8383_v17 = vmul.f32 %v10856_v18, %v8374_v13 }
0x2c22   :  { %v8382_v14 = vmul.f32 %v10858_v43, %v8373_v54 }
0x2c23   :  { %v8404_v37 = vmul.f32 %v9184_v12, %v8383_v17 }
0x2c24   :  { %v8403_v63 = vmul.f32 %v9183_v35, %v8382_v14 }
0x2c25   :  { %v8425_v34 = vadd.f32 %v9187_v40, %v8404_v37 }
0x2c26   :  { %v8424_v4 = vadd.f32 %v9186_v1, %v8403_v63 }
0x2c27   :  { %v8438_v33 = vmul.f32 %v8436_v51, %v8425_v34 }
0x2c28   :  { %v8432_v29 = vmul.f32 %v8430_v11, %v8424_v4 }
0x2c2a   :  { %v10860_v27 = vpop.eup %10859  ;;  %v8439_v48 = vadd.f32 %v8438_v33, %v8432_v29 }
0x2c2b   :  { %v8384_v55 = vmul.f32 %v10860_v27, %v8375_v10 }
0x2c2d   :  { %v8405_v21 = vmul.f32 %v9185_v9, %v8384_v55 }
0x2c2f   :  { %v8426_v7 = vadd.f32 %v9188_v32, %v8405_v21 }
0x2c31   :  { %v8444_v42 = vmul.f32 %v8442_v44, %v8426_v7 }
0x2c33   :  { %v8445_v36 = vadd.f32 %v8444_v42, %v8439_v48 }
0x2c35   :  { %v8448_v52 = vsel %vm156_vm3, %v8445_v36, 0.0  ;;  %v8452_v5 = vmul.f32 %v8445_v36, %v8445_v36 }
0x2c36   :  { %8449 = vadd.xlane.f32.xlu1 %v8448_v52 }
0x2c37   :  { %v8453_v22 = vsel %vm156_vm3, %v8452_v5, 0.0 }
0x2c38   :  { %8454 = vadd.xlane.f32.xlu0 %v8453_v22 }
0x2cbf   :  { %v8450_v2 = vpop.xlane.xlu1 %8449 }
0x2cc0   :  { %v8451_v25 = vmul.f32 0.015625, %v8450_v2 }
0x2cc1   :  { %v8455_v49 = vpop.xlane.xlu0 %8454 }
0x2cc2   :  { %v8457_v26 = vmul.f32 %v8451_v25, %v8451_v25  ;;  %v8456_v28 = vmul.f32 0.015625, %v8455_v49  ;;  %v8459_v8 = vsub.f32 %v8445_v36, %v8451_v25 }
0x2cc4   :  { %v8458_v15 = vsub.f32 %v8456_v28, %v8457_v26 }
0x2cc6   :  { %v8460_v11 = vadd.f32 1e-05, %v8458_v15 }
0x2cc8   :  { %10861 = vrsqrt.f32 %v8460_v11 }
0x2cd5   :  { %v10862_v39 = vpop.eup %10861 }
0x2cd6   :  { %v8462_v0 = vmul.f32 %v10862_v39, %v8459_v8 }
0x2cd8   :  { %v8469_v30 = vmul.f32 %v9189_v61, %v8462_v0 }
0x2cda   :  { %v8476_v46 = vadd.f32 %v9190_v16, %v8469_v30 }
0x2cdc   :  { %v8477_v41 = vpack.c.bf16 %v8476_v46, %v8476_v46 }
0x2cde   :  { %10390 = vmatmul.mubr.msk.bf16.vlgmr.msra.gmra.mxu0 %vm156_vm3, %v8477_v41 }
0x2d9e   :  { %v8554_v23 = vpop.f32.mrf.mxu0 }
0x2d9f   :  { %v8555_v20 = vadd.f32 %v9191_v57, %v8554_v23 }
0x2da0   :  { %v10391_v60 = vpop.f32.mrf.mxu0 }
0x2da1   :  { %8561 = vst.msk [vmem:[%s13202_s21] sm:$0xff] %vm8560_vm10, %v8555_v20 }
0x2da2   :  { %v8557_v45 = vpop.f32.mrf.mxu0 }
0x2da4   :  { %v10392_v56 = vpop.f32.mrf.mxu0 }
0x2da5   :  { %8566 = vsyncpa [#allocation3], 1 }

</bundles_post_ra>
